<compile_context>
chip_gen: v7x
topology: tpu7x:2x2x1
jax: 0.10.0
libtpu: 0.0.40
codegen_flags: <defaults>
</compile_context>

<pallas_src>
import functools
import math

import jax
import jax.numpy as jnp
from jax import lax
from jax.experimental import pallas as pl
from jax.experimental.pallas import tpu as pltpu

# ----------------------- module hyper-parameters -----------------------------
IN_CHANNELS = 4
PATCH = 40                      # patch_size -> n_patches = (160//40)*(120//40) = 12
EMB = 128                       # embedding_dim
HEADS = 4
HEAD_DIM = EMB // HEADS
FF = 1024                       # dim_feedforward (hard-coded in the module)
NUM_LAYERS = 4                  # num_layers      (hard-coded in the module)
N_PATCHES = (160 // PATCH) * (120 // PATCH)
LN_EPS = 1e-5


# ------------------------------ kernel ----------------------------------------
def _layer_norm(x, w, b):
    mu = jnp.mean(x, axis=-1, keepdims=True)
    var = jnp.mean((x - mu) ** 2, axis=-1, keepdims=True)
    return (x - mu) * lax.rsqrt(var + LN_EPS) * w + b


def _fused_kernel(B, Np,
                  patches_ref, w2dq_ref, w2ds_ref, convb_ref, pos_ref,
                  wqkv_ref, sqkv_ref, bqkv_ref,
                  wo_ref, so_ref, bo_ref,
                  w1_ref, s1_ref, b1_ref,
                  w2_ref, s2_ref, b2_ref,
                  ln1w_ref, ln1b_ref, ln2w_ref, ln2b_ref,
                  o_ref):
    """One grid step = one encoder layer (step 0 also does the patch embed)."""
    M = B * Np
    layer = pl.program_id(0)
    bf16 = jnp.bfloat16
    scale = 1.0 / math.sqrt(HEAD_DIM)

    # ---- step 0 only: patch embedding (im2col matmul) + positional encoding ----
    @pl.when(layer == 0)
    def _():
        w2d = w2dq_ref[...].astype(bf16)                                     # int8 -> bf16
        emb = jnp.dot(patches_ref[...], w2d, preferred_element_type=jnp.float32)
        emb = emb * w2ds_ref[...] + convb_ref[...]                           # (M, E)
        emb = emb.reshape(B, Np, EMB) + pos_ref[...]                         # + pos (bcast)
        o_ref[...] = emb.reshape(M, EMB)

    h = o_ref[...]                                                           # (M, E) f32

    # ---- multi-head self-attention (q = k = v = h), heads batched ----
    qkv = jnp.dot(h.astype(bf16), wqkv_ref[0].astype(bf16),
                  preferred_element_type=jnp.float32)
    qkv = qkv * sqkv_ref[0] + bqkv_ref[0]                                    # (M, 3E)
    qkv = qkv.reshape(B, Np, 3 * EMB)

    qs, ks, vs = [], [], []
    for hd in range(HEADS):
        lo = hd * HEAD_DIM
        qs.append(qkv[:, :, lo:lo + HEAD_DIM])
        ks.append(qkv[:, :, EMB + lo:EMB + lo + HEAD_DIM])
        vs.append(qkv[:, :, 2 * EMB + lo:2 * EMB + lo + HEAD_DIM])
    q = jnp.concatenate(qs, axis=0) * scale                                  # (H*B, Np, D)
    k = jnp.concatenate(ks, axis=0)
    v = jnp.concatenate(vs, axis=0)

    s = jnp.einsum('bqd,bkd->bqk', q, k, preferred_element_type=jnp.float32) # (H*B, S, S)
    s = s - jnp.max(s, axis=-1, keepdims=True)
    p = jnp.exp(s)
    p = p * pl.reciprocal(jnp.sum(p, axis=-1, keepdims=True), approx=True)
    ctx = jnp.einsum('bqk,bkd->bqd', p, v, preferred_element_type=jnp.float32)

    attn = jnp.concatenate([ctx[hd * B:(hd + 1) * B] for hd in range(HEADS)],
                           axis=-1).reshape(M, EMB)                          # lane-dense
    attn = jnp.dot(attn.astype(bf16), wo_ref[0].astype(bf16),
                   preferred_element_type=jnp.float32)
    attn = attn * so_ref[0] + bo_ref[0]

    # ---- residual + LayerNorm 1 (post-norm, PyTorch default) ----
    y = _layer_norm(h + attn, ln1w_ref[0], ln1b_ref[0])

    # ---- feed-forward: linear -> relu -> linear ----
    h1 = jnp.dot(y.astype(bf16), w1_ref[0].astype(bf16),
                 preferred_element_type=jnp.float32)
    h1 = jnp.maximum(h1 * s1_ref[0] + b1_ref[0], 0.0)
    ff = jnp.dot(h1.astype(bf16), w2_ref[0].astype(bf16),
                 preferred_element_type=jnp.float32)
    ff = ff * s2_ref[0] + b2_ref[0]

    # ---- residual + LayerNorm 2; write h back to the carried output block ----
    o_ref[...] = _layer_norm(y + ff, ln2w_ref[0], ln2b_ref[0])


def fused_forward(patches, prep, B, Np):
    M, K = patches.shape

    def once(a):                     # same block index every step -> fetched once
        nd = a.ndim
        return pl.BlockSpec(a.shape, lambda l, _nd=nd: (0,) * _nd)

    def per_layer(a):                # one layer slice per grid step (pipelined DMA)
        return pl.BlockSpec((1,) + a.shape[1:], lambda l: (l, 0, 0))

    inputs = (patches, prep["w2d_q"], prep["w2d_s"], prep["conv_b"], prep["pos"],
              prep["wqkv_q"], prep["sqkv"], prep["bqkv"],
              prep["wo_q"], prep["so"], prep["bo"],
              prep["w1_q"], prep["s1"], prep["b1"],
              prep["w2_q"], prep["s2"], prep["b2"],
              prep["ln1w"], prep["ln1b"], prep["ln2w"], prep["ln2b"])
    in_specs = [once(a) for a in inputs[:5]] + [per_layer(a) for a in inputs[5:]]

    flops = (2 * M * K * EMB
             + NUM_LAYERS * (2 * M * EMB * 3 * EMB                 # qkv projection
                             + 4 * B * HEADS * Np * Np * HEAD_DIM  # scores + p@v
                             + 2 * M * EMB * EMB                   # output proj
                             + 4 * M * EMB * FF))                  # two FFN matmuls
    transcendentals = NUM_LAYERS * (B * HEADS * Np * Np + 4 * M)
    bytes_accessed = sum(int(a.size) * a.dtype.itemsize for a in inputs) + M * EMB * 4

    return pl.pallas_call(
        functools.partial(_fused_kernel, B, Np),
        out_shape=jax.ShapeDtypeStruct((M, EMB), jnp.float32),
        grid=(NUM_LAYERS,),
        in_specs=in_specs,
        out_specs=pl.BlockSpec((M, EMB), lambda l: (0, 0)),   # revisited -> carries h
        compiler_params=pltpu.CompilerParams(
            dimension_semantics=("arbitrary",),               # sequential layer dep
            vmem_limit_bytes=32 * 1024 * 1024),
        cost_estimate=pl.CostEstimate(flops=int(flops),
                                      transcendentals=int(transcendentals),
                                      bytes_accessed=int(bytes_accessed)),
    )(*inputs)


# --------------------------- parameter init ----------------------------------
def init_params(key):
    keys = iter(jax.random.split(key, 64))

    def nrm(shape, scale=0.02):
        return (scale * jax.random.normal(next(keys), shape)).astype(jnp.float32)

    params = {
        "conv_w": nrm((EMB, IN_CHANNELS, PATCH, PATCH)),   # Conv2d weight (E,C,P,P)
        "conv_b": nrm((EMB,)),
        # pos_enc ~ torch.rand((1, E, n_patches))
        "pos_enc": jax.random.uniform(next(keys), (1, EMB, N_PATCHES), dtype=jnp.float32),
        "layers": [],
    }
    for _ in range(NUM_LAYERS):
        params["layers"].append(dict(
            wqkv=nrm((3 * EMB, EMB)), bqkv=nrm((3 * EMB,)),
            wo=nrm((EMB, EMB)), bo=nrm((EMB,)),
            w1=nrm((FF, EMB)), b1=nrm((FF,)),
            w2=nrm((EMB, FF)), b2=nrm((EMB,)),
            ln1w=jnp.ones((EMB,), jnp.float32), ln1b=jnp.zeros((EMB,), jnp.float32),
            ln2w=jnp.ones((EMB,), jnp.float32), ln2b=jnp.zeros((EMB,), jnp.float32),
        ))
    return params


def _quant_cols(w):
    """int8 per-output-channel quantization of a (..., K, N) weight (scale over K)."""
    amax = jnp.max(jnp.abs(w), axis=-2, keepdims=True)
    scl = jnp.maximum(amax, 1e-8) / 127.0
    q = jnp.clip(jnp.round(w / scl), -127, 127).astype(jnp.int8)
    return q, scl.astype(jnp.float32)


def prepare_params(params):
    """One-time layout prep: transpose, stack layers, quantize matmul weights to int8."""
    K = IN_CHANNELS * PATCH * PATCH
    ls = params["layers"]
    L = NUM_LAYERS
    stk = lambda name: jnp.stack([l[name] for l in ls])

    w2d_q, w2d_s = _quant_cols(params["conv_w"].reshape(EMB, K).T)            # (K, E)
    wqkv_q, sqkv = _quant_cols(jnp.stack([l["wqkv"].T for l in ls]))          # (L, E, 3E)
    wo_q, so = _quant_cols(jnp.stack([l["wo"].T for l in ls]))                # (L, E, E)
    w1_q, s1 = _quant_cols(jnp.stack([l["w1"].T for l in ls]))                # (L, E, FF)
    w2_q, s2 = _quant_cols(jnp.stack([l["w2"].T for l in ls]))                # (L, FF, E)

    prep = {
        "w2d_q": w2d_q, "w2d_s": w2d_s,
        "conv_b": params["conv_b"].reshape(1, EMB),
        "pos": params["pos_enc"][0].T,                                        # (Np, E)
        "wqkv_q": wqkv_q, "sqkv": sqkv, "bqkv": stk("bqkv").reshape(L, 1, 3 * EMB),
        "wo_q": wo_q, "so": so, "bo": stk("bo").reshape(L, 1, EMB),
        "w1_q": w1_q, "s1": s1, "b1": stk("b1").reshape(L, 1, FF),
        "w2_q": w2_q, "s2": s2, "b2": stk("b2").reshape(L, 1, EMB),
        "ln1w": stk("ln1w").reshape(L, 1, EMB), "ln1b": stk("ln1b").reshape(L, 1, EMB),
        "ln2w": stk("ln2w").reshape(L, 1, EMB), "ln2b": stk("ln2b").reshape(L, 1, EMB),
    }
    return jax.block_until_ready(prep)


# ------------------------------ forward ---------------------------------------
def patch_transformer_encoder(x, prep):
    B, C, H, W = x.shape
    Hp, Wp = H // PATCH, W // PATCH
    Np = Hp * Wp
    K = C * PATCH * PATCH

    # im2col for the stride==kernel_size conv (layout glue); cast to bf16 first
    # so the transpose moves half the bytes.
    # TODO(synk): fold this gather into the kernel with per-patch DMAs
    # (memory_space=pl.ANY) so layer-0 weight DMA overlaps the patch gather.
    patches = x.astype(jnp.bfloat16).reshape(B, C, Hp, PATCH, Wp, PATCH)
    patches = patches.transpose(0, 2, 4, 1, 3, 5).reshape(B * Np, K)

    out = fused_forward(patches, prep, B, Np)          # (B*Np, E) f32
    return out.reshape(B, Np, EMB).transpose(1, 0, 2)  # (S, B, E) like PyTorch


# -------------------------------- main -----------------------------------------
if __name__ == "__main__":
    key = jax.random.PRNGKey(0)
    pkey, xkey = jax.random.split(key)
    params = init_params(pkey)
    prep = prepare_params(params)   # one-time, NOT on the per-forward path

    # NCHW input; H=160, W=120 so the module's hard-coded
    # n_patches = (160 // patch_size) * (120 // patch_size) = 12 is consistent.
    x = jax.random.normal(xkey, (2, IN_CHANNELS, 160, 120), dtype=jnp.float32)

    fwd = jax.jit(patch_transformer_encoder)
    out = jax.block_until_ready(fwd(x, prep))
    assert out.shape == (N_PATCHES, 2, EMB)
    assert bool(jnp.all(jnp.isfinite(out)))
    print("KERNEL_OK")
</pallas_src>

<mosaic_0001>
module attributes {stable_mosaic.version = 11 : i64} {
  func.func @_fused_kernel(%arg0: i32, %arg1: memref<24x6400xbf16, #tpu.memory_space<vmem>>, %arg2: memref<6400x128xi8, #tpu.memory_space<vmem>>, %arg3: memref<1x128xf32, #tpu.memory_space<vmem>>, %arg4: memref<1x128xf32, #tpu.memory_space<vmem>>, %arg5: memref<12x128xf32, #tpu.memory_space<vmem>>, %arg6: memref<1x128x384xi8, #tpu.memory_space<vmem>>, %arg7: memref<1x1x384xf32, #tpu.memory_space<vmem>>, %arg8: memref<1x1x384xf32, #tpu.memory_space<vmem>>, %arg9: memref<1x128x128xi8, #tpu.memory_space<vmem>>, %arg10: memref<1x1x128xf32, #tpu.memory_space<vmem>>, %arg11: memref<1x1x128xf32, #tpu.memory_space<vmem>>, %arg12: memref<1x128x1024xi8, #tpu.memory_space<vmem>>, %arg13: memref<1x1x1024xf32, #tpu.memory_space<vmem>>, %arg14: memref<1x1x1024xf32, #tpu.memory_space<vmem>>, %arg15: memref<1x1024x128xi8, #tpu.memory_space<vmem>>, %arg16: memref<1x1x128xf32, #tpu.memory_space<vmem>>, %arg17: memref<1x1x128xf32, #tpu.memory_space<vmem>>, %arg18: memref<1x1x128xf32, #tpu.memory_space<vmem>>, %arg19: memref<1x1x128xf32, #tpu.memory_space<vmem>>, %arg20: memref<1x1x128xf32, #tpu.memory_space<vmem>>, %arg21: memref<1x1x128xf32, #tpu.memory_space<vmem>>, %arg22: memref<24x128xf32, #tpu.memory_space<vmem>>) attributes {dimension_semantics = [#tpu.dimension_semantics<arbitrary>], iteration_bounds = array<i64: 4>, scalar_prefetch = 0 : i64, scratch_operands = 0 : i64, tpu.core_type = #tpu.core_type<tc>, window_params = [{pipeline_mode = #tpu.pipeline_mode<synchronous>, transform_indices = @transform_0, window_bounds = array<i64: 24, 6400>}, {pipeline_mode = #tpu.pipeline_mode<synchronous>, transform_indices = @transform_1, window_bounds = array<i64: 6400, 128>}, {pipeline_mode = #tpu.pipeline_mode<synchronous>, transform_indices = @transform_2, window_bounds = array<i64: 1, 128>}, {pipeline_mode = #tpu.pipeline_mode<synchronous>, transform_indices = @transform_3, window_bounds = array<i64: 1, 128>}, {pipeline_mode = #tpu.pipeline_mode<synchronous>, transform_indices = @transform_4, window_bounds = array<i64: 12, 128>}, {transform_indices = @transform_5, window_bounds = array<i64: 1, 128, 384>}, {transform_indices = @transform_6, window_bounds = array<i64: 1, 1, 384>}, {transform_indices = @transform_7, window_bounds = array<i64: 1, 1, 384>}, {transform_indices = @transform_8, window_bounds = array<i64: 1, 128, 128>}, {transform_indices = @transform_9, window_bounds = array<i64: 1, 1, 128>}, {transform_indices = @transform_10, window_bounds = array<i64: 1, 1, 128>}, {transform_indices = @transform_11, window_bounds = array<i64: 1, 128, 1024>}, {transform_indices = @transform_12, window_bounds = array<i64: 1, 1, 1024>}, {transform_indices = @transform_13, window_bounds = array<i64: 1, 1, 1024>}, {transform_indices = @transform_14, window_bounds = array<i64: 1, 1024, 128>}, {transform_indices = @transform_15, window_bounds = array<i64: 1, 1, 128>}, {transform_indices = @transform_16, window_bounds = array<i64: 1, 1, 128>}, {transform_indices = @transform_17, window_bounds = array<i64: 1, 1, 128>}, {transform_indices = @transform_18, window_bounds = array<i64: 1, 1, 128>}, {transform_indices = @transform_19, window_bounds = array<i64: 1, 1, 128>}, {transform_indices = @transform_20, window_bounds = array<i64: 1, 1, 128>}, {pipeline_mode = #tpu.pipeline_mode<synchronous>, transform_indices = @transform_21, window_bounds = array<i64: 24, 128>}]} {
    %c0_i32 = arith.constant 0 : i32
    %0 = arith.cmpi eq, %arg0, %c0_i32 : i32
    %1 = arith.extui %0 : i1 to i32
    %c0_i32_0 = arith.constant 0 : i32
    %2 = arith.cmpi ne, %1, %c0_i32_0 : i32
    scf.if %2 {
      %c0_71 = arith.constant 0 : index
      %c0_72 = arith.constant 0 : index
      %149 = vector.load %arg2[%c0_71, %c0_72] : memref<6400x128xi8, #tpu.memory_space<vmem>>, vector<6400x128xi8>
      %150 = arith.sitofp %149 : vector<6400x128xi8> to vector<6400x128xbf16>
      %c0_73 = arith.constant 0 : index
      %c0_74 = arith.constant 0 : index
      %151 = vector.load %arg1[%c0_73, %c0_74] : memref<24x6400xbf16, #tpu.memory_space<vmem>>, vector<24x6400xbf16>
      %cst_75 = arith.constant dense<0.000000e+00> : vector<24x128xf32>
      %152 = tpu.matmul %151, %150, %cst_75 {dimension_numbers = #tpu.dot_dimension_numbers<[1], [0], [0], [1], [0, 0, 1, 1], [], []>} : vector<24x6400xbf16>, vector<6400x128xbf16>, vector<24x128xf32> -> vector<24x128xf32>
      %c0_76 = arith.constant 0 : index
      %c0_77 = arith.constant 0 : index
      %153 = vector.load %arg3[%c0_76, %c0_77] : memref<1x128xf32, #tpu.memory_space<vmem>>, vector<1x128xf32>
      %154 = vector.broadcast %153 : vector<1x128xf32> to vector<24x128xf32>
      %155 = arith.mulf %152, %154 : vector<24x128xf32>
      %c0_78 = arith.constant 0 : index
      %c0_79 = arith.constant 0 : index
      %156 = vector.load %arg4[%c0_78, %c0_79] : memref<1x128xf32, #tpu.memory_space<vmem>>, vector<1x128xf32>
      %157 = vector.broadcast %156 : vector<1x128xf32> to vector<24x128xf32>
      %158 = arith.addf %155, %157 : vector<24x128xf32>
      %159 = vector.shape_cast %158 : vector<24x128xf32> to vector<2x12x128xf32>
      %c0_80 = arith.constant 0 : index
      %c0_81 = arith.constant 0 : index
      %160 = vector.load %arg5[%c0_80, %c0_81] : memref<12x128xf32, #tpu.memory_space<vmem>>, vector<12x128xf32>
      %161 = vector.shape_cast %160 : vector<12x128xf32> to vector<1x12x128xf32>
      %162 = vector.broadcast %161 : vector<1x12x128xf32> to vector<2x12x128xf32>
      %163 = arith.addf %159, %162 : vector<2x12x128xf32>
      %164 = vector.shape_cast %163 : vector<2x12x128xf32> to vector<24x128xf32>
      %c0_82 = arith.constant 0 : index
      %c0_83 = arith.constant 0 : index
      %165 = vector.load %arg22[%c0_82, %c0_83] : memref<24x128xf32, #tpu.memory_space<vmem>>, vector<24x128xf32>
      tpu.vector_store %arg22[%c0_82, %c0_83], %164 {strides = array<i32>} : memref<24x128xf32, #tpu.memory_space<vmem>>, vector<24x128xf32>,
    } else {
    }
    %c0 = arith.constant 0 : index
    %c0_1 = arith.constant 0 : index
    %3 = vector.load %arg22[%c0, %c0_1] : memref<24x128xf32, #tpu.memory_space<vmem>>, vector<24x128xf32>
    %4 = arith.truncf %3 : vector<24x128xf32> to vector<24x128xbf16>
    %c0_2 = arith.constant 0 : index
    %c0_3 = arith.constant 0 : index
    %c0_4 = arith.constant 0 : index
    %5 = vector.load %arg6[%c0_2, %c0_3, %c0_4] : memref<1x128x384xi8, #tpu.memory_space<vmem>>, vector<1x128x384xi8>
    %6 = vector.shape_cast %5 : vector<1x128x384xi8> to vector<128x384xi8>
    %7 = arith.sitofp %6 : vector<128x384xi8> to vector<128x384xbf16>
    %cst = arith.constant dense<0.000000e+00> : vector<24x384xf32>
    %8 = tpu.matmul %4, %7, %cst {dimension_numbers = #tpu.dot_dimension_numbers<[1], [0], [0], [1], [0, 0, 1, 1], [], []>} : vector<24x128xbf16>, vector<128x384xbf16>, vector<24x384xf32> -> vector<24x384xf32>
    %c0_5 = arith.constant 0 : index
    %c0_6 = arith.constant 0 : index
    %c0_7 = arith.constant 0 : index
    %9 = vector.load %arg7[%c0_5, %c0_6, %c0_7] : memref<1x1x384xf32, #tpu.memory_space<vmem>>, vector<1x1x384xf32>
    %10 = vector.shape_cast %9 : vector<1x1x384xf32> to vector<1x384xf32>
    %11 = vector.broadcast %10 : vector<1x384xf32> to vector<24x384xf32>
    %12 = arith.mulf %8, %11 : vector<24x384xf32>
    %c0_8 = arith.constant 0 : index
    %c0_9 = arith.constant 0 : index
    %c0_10 = arith.constant 0 : index
    %13 = vector.load %arg8[%c0_8, %c0_9, %c0_10] : memref<1x1x384xf32, #tpu.memory_space<vmem>>, vector<1x1x384xf32>
    %14 = vector.shape_cast %13 : vector<1x1x384xf32> to vector<1x384xf32>
    %15 = vector.broadcast %14 : vector<1x384xf32> to vector<24x384xf32>
    %16 = arith.addf %12, %15 : vector<24x384xf32>
    %17 = vector.shape_cast %16 : vector<24x384xf32> to vector<2x12x384xf32>
    %18 = vector.extract_strided_slice %17 {offsets = [0, 0, 0], sizes = [2, 12, 32], strides = [1, 1, 1]} : vector<2x12x384xf32> to vector<2x12x32xf32>
    %19 = vector.extract_strided_slice %17 {offsets = [0, 0, 128], sizes = [2, 12, 32], strides = [1, 1, 1]} : vector<2x12x384xf32> to vector<2x12x32xf32>
    %20 = vector.extract_strided_slice %17 {offsets = [0, 0, 256], sizes = [2, 12, 32], strides = [1, 1, 1]} : vector<2x12x384xf32> to vector<2x12x32xf32>
    %21 = vector.extract_strided_slice %17 {offsets = [0, 0, 32], sizes = [2, 12, 32], strides = [1, 1, 1]} : vector<2x12x384xf32> to vector<2x12x32xf32>
    %22 = vector.extract_strided_slice %17 {offsets = [0, 0, 160], sizes = [2, 12, 32], strides = [1, 1, 1]} : vector<2x12x384xf32> to vector<2x12x32xf32>
    %23 = vector.extract_strided_slice %17 {offsets = [0, 0, 288], sizes = [2, 12, 32], strides = [1, 1, 1]} : vector<2x12x384xf32> to vector<2x12x32xf32>
    %24 = vector.extract_strided_slice %17 {offsets = [0, 0, 64], sizes = [2, 12, 32], strides = [1, 1, 1]} : vector<2x12x384xf32> to vector<2x12x32xf32>
    %25 = vector.extract_strided_slice %17 {offsets = [0, 0, 192], sizes = [2, 12, 32], strides = [1, 1, 1]} : vector<2x12x384xf32> to vector<2x12x32xf32>
    %26 = vector.extract_strided_slice %17 {offsets = [0, 0, 320], sizes = [2, 12, 32], strides = [1, 1, 1]} : vector<2x12x384xf32> to vector<2x12x32xf32>
    %27 = vector.extract_strided_slice %17 {offsets = [0, 0, 96], sizes = [2, 12, 32], strides = [1, 1, 1]} : vector<2x12x384xf32> to vector<2x12x32xf32>
    %28 = vector.extract_strided_slice %17 {offsets = [0, 0, 224], sizes = [2, 12, 32], strides = [1, 1, 1]} : vector<2x12x384xf32> to vector<2x12x32xf32>
    %29 = vector.extract_strided_slice %17 {offsets = [0, 0, 352], sizes = [2, 12, 32], strides = [1, 1, 1]} : vector<2x12x384xf32> to vector<2x12x32xf32>
    %30 = tpu.concatenate %18, %21, %24, %27 in 0 : vector<2x12x32xf32>, vector<2x12x32xf32>, vector<2x12x32xf32>, vector<2x12x32xf32> -> vector<8x12x32xf32>
    %cst_11 = arith.constant 0.176776692 : f32
    %31 = vector.broadcast %cst_11 : f32 to vector<8x12x32xf32>
    %32 = arith.mulf %30, %31 : vector<8x12x32xf32>
    %33 = tpu.concatenate %19, %22, %25, %28 in 0 : vector<2x12x32xf32>, vector<2x12x32xf32>, vector<2x12x32xf32>, vector<2x12x32xf32> -> vector<8x12x32xf32>
    %34 = tpu.concatenate %20, %23, %26, %29 in 0 : vector<2x12x32xf32>, vector<2x12x32xf32>, vector<2x12x32xf32>, vector<2x12x32xf32> -> vector<8x12x32xf32>
    "tpu.trace_start"() <{level = 10 : i32, message = "bqd,bkd->bqk"}> : () -> ()
    %cst_12 = arith.constant dense<0.000000e+00> : vector<8x12x12xf32>
    %35 = tpu.matmul %32, %33, %cst_12 {dimension_numbers = #tpu.dot_dimension_numbers<[2], [2], [1], [1], [0, 0, 0, 1, 1, 1], [0], [0]>} : vector<8x12x32xf32>, vector<8x12x32xf32>, vector<8x12x12xf32> -> vector<8x12x12xf32>
    "tpu.trace_stop"() : () -> ()
    %cst_13 = arith.constant dense<0xFF800000> : vector<8x12xf32>
    %36 = vector.multi_reduction <maximumf>, %35, %cst_13 [2] : vector<8x12x12xf32> to vector<8x12xf32>
    %37 = vector.shape_cast %36 : vector<8x12xf32> to vector<8x12x1xf32>
    %38 = vector.broadcast %37 : vector<8x12x1xf32> to vector<8x12x12xf32>
    %39 = arith.subf %35, %38 : vector<8x12x12xf32>
    %40 = math.exp %39 : vector<8x12x12xf32>
    %cst_14 = arith.constant dense<0.000000e+00> : vector<8x12xf32>
    %41 = vector.multi_reduction <add>, %40, %cst_14 [2] : vector<8x12x12xf32> to vector<8x12xf32>
    %42 = vector.shape_cast %41 : vector<8x12xf32> to vector<8x12x1xf32>
    %43 = tpu.reciprocal %42 {approx = true} : vector<8x12x1xf32> -> vector<8x12x1xf32>
    %44 = vector.broadcast %43 : vector<8x12x1xf32> to vector<8x12x12xf32>
    %45 = arith.mulf %40, %44 : vector<8x12x12xf32>
    "tpu.trace_start"() <{level = 10 : i32, message = "bqk,bkd->bqd"}> : () -> ()
    %cst_15 = arith.constant dense<0.000000e+00> : vector<8x12x32xf32>
    %46 = tpu.matmul %45, %34, %cst_15 {dimension_numbers = #tpu.dot_dimension_numbers<[2], [1], [1], [2], [0, 0, 0, 1, 1, 2], [0], [0]>} : vector<8x12x12xf32>, vector<8x12x32xf32>, vector<8x12x32xf32> -> vector<8x12x32xf32>
    "tpu.trace_stop"() : () -> ()
    %47 = vector.extract_strided_slice %46 {offsets = [0, 0, 0], sizes = [2, 12, 32], strides = [1, 1, 1]} : vector<8x12x32xf32> to vector<2x12x32xf32>
    %48 = vector.extract_strided_slice %46 {offsets = [2, 0, 0], sizes = [2, 12, 32], strides = [1, 1, 1]} : vector<8x12x32xf32> to vector<2x12x32xf32>
    %49 = vector.extract_strided_slice %46 {offsets = [4, 0, 0], sizes = [2, 12, 32], strides = [1, 1, 1]} : vector<8x12x32xf32> to vector<2x12x32xf32>
    %50 = vector.extract_strided_slice %46 {offsets = [6, 0, 0], sizes = [2, 12, 32], strides = [1, 1, 1]} : vector<8x12x32xf32> to vector<2x12x32xf32>
    %51 = tpu.concatenate %47, %48, %49, %50 in 2 : vector<2x12x32xf32>, vector<2x12x32xf32>, vector<2x12x32xf32>, vector<2x12x32xf32> -> vector<2x12x128xf32>
    %52 = vector.shape_cast %51 : vector<2x12x128xf32> to vector<24x128xf32>
    %53 = arith.truncf %52 : vector<24x128xf32> to vector<24x128xbf16>
    %c0_16 = arith.constant 0 : index
    %c0_17 = arith.constant 0 : index
    %c0_18 = arith.constant 0 : index
    %54 = vector.load %arg9[%c0_16, %c0_17, %c0_18] : memref<1x128x128xi8, #tpu.memory_space<vmem>>, vector<1x128x128xi8>
    %55 = vector.shape_cast %54 : vector<1x128x128xi8> to vector<128x128xi8>
    %56 = arith.sitofp %55 : vector<128x128xi8> to vector<128x128xbf16>
    %cst_19 = arith.constant dense<0.000000e+00> : vector<24x128xf32>
    %57 = tpu.matmul %53, %56, %cst_19 {dimension_numbers = #tpu.dot_dimension_numbers<[1], [0], [0], [1], [0, 0, 1, 1], [], []>} : vector<24x128xbf16>, vector<128x128xbf16>, vector<24x128xf32> -> vector<24x128xf32>
    %c0_20 = arith.constant 0 : index
    %c0_21 = arith.constant 0 : index
    %c0_22 = arith.constant 0 : index
    %58 = vector.load %arg10[%c0_20, %c0_21, %c0_22] : memref<1x1x128xf32, #tpu.memory_space<vmem>>, vector<1x1x128xf32>
    %59 = vector.shape_cast %58 : vector<1x1x128xf32> to vector<1x128xf32>
    %60 = vector.broadcast %59 : vector<1x128xf32> to vector<24x128xf32>
    %61 = arith.mulf %57, %60 : vector<24x128xf32>
    %c0_23 = arith.constant 0 : index
    %c0_24 = arith.constant 0 : index
    %c0_25 = arith.constant 0 : index
    %62 = vector.load %arg11[%c0_23, %c0_24, %c0_25] : memref<1x1x128xf32, #tpu.memory_space<vmem>>, vector<1x1x128xf32>
    %63 = vector.shape_cast %62 : vector<1x1x128xf32> to vector<1x128xf32>
    %64 = vector.broadcast %63 : vector<1x128xf32> to vector<24x128xf32>
    %65 = arith.addf %61, %64 : vector<24x128xf32>
    %66 = arith.addf %3, %65 : vector<24x128xf32>
    %c0_26 = arith.constant 0 : index
    %c0_27 = arith.constant 0 : index
    %c0_28 = arith.constant 0 : index
    %67 = vector.load %arg18[%c0_26, %c0_27, %c0_28] : memref<1x1x128xf32, #tpu.memory_space<vmem>>, vector<1x1x128xf32>
    %68 = vector.shape_cast %67 : vector<1x1x128xf32> to vector<1x128xf32>
    %c0_29 = arith.constant 0 : index
    %c0_30 = arith.constant 0 : index
    %c0_31 = arith.constant 0 : index
    %69 = vector.load %arg19[%c0_29, %c0_30, %c0_31] : memref<1x1x128xf32, #tpu.memory_space<vmem>>, vector<1x1x128xf32>
    %70 = vector.shape_cast %69 : vector<1x1x128xf32> to vector<1x128xf32>
    %cst_32 = arith.constant dense<0.000000e+00> : vector<24xf32>
    %71 = vector.multi_reduction <add>, %66, %cst_32 [1] : vector<24x128xf32> to vector<24xf32>
    %72 = vector.shape_cast %71 : vector<24xf32> to vector<24x1xf32>
    %cst_33 = arith.constant 1.280000e+02 : f32
    %73 = vector.broadcast %cst_33 : f32 to vector<24x1xf32>
    %74 = arith.divf %72, %73 : vector<24x1xf32>
    %75 = vector.broadcast %74 : vector<24x1xf32> to vector<24x128xf32>
    %76 = arith.subf %66, %75 : vector<24x128xf32>
    %77 = arith.mulf %76, %76 : vector<24x128xf32>
    %cst_34 = arith.constant dense<0.000000e+00> : vector<24xf32>
    %78 = vector.multi_reduction <add>, %77, %cst_34 [1] : vector<24x128xf32> to vector<24xf32>
    %79 = vector.shape_cast %78 : vector<24xf32> to vector<24x1xf32>
    %cst_35 = arith.constant 1.280000e+02 : f32
    %80 = vector.broadcast %cst_35 : f32 to vector<24x1xf32>
    %81 = arith.divf %79, %80 : vector<24x1xf32>
    %82 = vector.broadcast %74 : vector<24x1xf32> to vector<24x128xf32>
    %83 = arith.subf %66, %82 : vector<24x128xf32>
    %cst_36 = arith.constant 9.99999974E-6 : f32
    %84 = vector.broadcast %cst_36 : f32 to vector<24x1xf32>
    %85 = arith.addf %81, %84 : vector<24x1xf32>
    %86 = math.rsqrt %85 : vector<24x1xf32>
    %87 = vector.broadcast %86 : vector<24x1xf32> to vector<24x128xf32>
    %88 = arith.mulf %83, %87 : vector<24x128xf32>
    %89 = vector.broadcast %68 : vector<1x128xf32> to vector<24x128xf32>
    %90 = arith.mulf %88, %89 : vector<24x128xf32>
    %91 = vector.broadcast %70 : vector<1x128xf32> to vector<24x128xf32>
    %92 = arith.addf %90, %91 : vector<24x128xf32>
    %93 = arith.truncf %92 : vector<24x128xf32> to vector<24x128xbf16>
    %c0_37 = arith.constant 0 : index
    %c0_38 = arith.constant 0 : index
    %c0_39 = arith.constant 0 : index
    %94 = vector.load %arg12[%c0_37, %c0_38, %c0_39] : memref<1x128x1024xi8, #tpu.memory_space<vmem>>, vector<1x128x1024xi8>
    %95 = vector.shape_cast %94 : vector<1x128x1024xi8> to vector<128x1024xi8>
    %96 = arith.sitofp %95 : vector<128x1024xi8> to vector<128x1024xbf16>
    %cst_40 = arith.constant dense<0.000000e+00> : vector<24x1024xf32>
    %97 = tpu.matmul %93, %96, %cst_40 {dimension_numbers = #tpu.dot_dimension_numbers<[1], [0], [0], [1], [0, 0, 1, 1], [], []>} : vector<24x128xbf16>, vector<128x1024xbf16>, vector<24x1024xf32> -> vector<24x1024xf32>
    %c0_41 = arith.constant 0 : index
    %c0_42 = arith.constant 0 : index
    %c0_43 = arith.constant 0 : index
    %98 = vector.load %arg13[%c0_41, %c0_42, %c0_43] : memref<1x1x1024xf32, #tpu.memory_space<vmem>>, vector<1x1x1024xf32>
    %99 = vector.shape_cast %98 : vector<1x1x1024xf32> to vector<1x1024xf32>
    %100 = vector.broadcast %99 : vector<1x1024xf32> to vector<24x1024xf32>
    %101 = arith.mulf %97, %100 : vector<24x1024xf32>
    %c0_44 = arith.constant 0 : index
    %c0_45 = arith.constant 0 : index
    %c0_46 = arith.constant 0 : index
    %102 = vector.load %arg14[%c0_44, %c0_45, %c0_46] : memref<1x1x1024xf32, #tpu.memory_space<vmem>>, vector<1x1x1024xf32>
    %103 = vector.shape_cast %102 : vector<1x1x1024xf32> to vector<1x1024xf32>
    %104 = vector.broadcast %103 : vector<1x1024xf32> to vector<24x1024xf32>
    %105 = arith.addf %101, %104 : vector<24x1024xf32>
    %cst_47 = arith.constant 0.000000e+00 : f32
    %106 = vector.broadcast %cst_47 : f32 to vector<24x1024xf32>
    %107 = arith.maximumf %105, %106 : vector<24x1024xf32>
    %108 = arith.truncf %107 : vector<24x1024xf32> to vector<24x1024xbf16>
    %c0_48 = arith.constant 0 : index
    %c0_49 = arith.constant 0 : index
    %c0_50 = arith.constant 0 : index
    %109 = vector.load %arg15[%c0_48, %c0_49, %c0_50] : memref<1x1024x128xi8, #tpu.memory_space<vmem>>, vector<1x1024x128xi8>
    %110 = vector.shape_cast %109 : vector<1x1024x128xi8> to vector<1024x128xi8>
    %111 = arith.sitofp %110 : vector<1024x128xi8> to vector<1024x128xbf16>
    %cst_51 = arith.constant dense<0.000000e+00> : vector<24x128xf32>
    %112 = tpu.matmul %108, %111, %cst_51 {dimension_numbers = #tpu.dot_dimension_numbers<[1], [0], [0], [1], [0, 0, 1, 1], [], []>} : vector<24x1024xbf16>, vector<1024x128xbf16>, vector<24x128xf32> -> vector<24x128xf32>
    %c0_52 = arith.constant 0 : index
    %c0_53 = arith.constant 0 : index
    %c0_54 = arith.constant 0 : index
    %113 = vector.load %arg16[%c0_52, %c0_53, %c0_54] : memref<1x1x128xf32, #tpu.memory_space<vmem>>, vector<1x1x128xf32>
    %114 = vector.shape_cast %113 : vector<1x1x128xf32> to vector<1x128xf32>
    %115 = vector.broadcast %114 : vector<1x128xf32> to vector<24x128xf32>
    %116 = arith.mulf %112, %115 : vector<24x128xf32>
    %c0_55 = arith.constant 0 : index
    %c0_56 = arith.constant 0 : index
    %c0_57 = arith.constant 0 : index
    %117 = vector.load %arg17[%c0_55, %c0_56, %c0_57] : memref<1x1x128xf32, #tpu.memory_space<vmem>>, vector<1x1x128xf32>
    %118 = vector.shape_cast %117 : vector<1x1x128xf32> to vector<1x128xf32>
    %119 = vector.broadcast %118 : vector<1x128xf32> to vector<24x128xf32>
    %120 = arith.addf %116, %119 : vector<24x128xf32>
    %121 = arith.addf %92, %120 : vector<24x128xf32>
    %c0_58 = arith.constant 0 : index
    %c0_59 = arith.constant 0 : index
    %c0_60 = arith.constant 0 : index
    %122 = vector.load %arg20[%c0_58, %c0_59, %c0_60] : memref<1x1x128xf32, #tpu.memory_space<vmem>>, vector<1x1x128xf32>
    %123 = vector.shape_cast %122 : vector<1x1x128xf32> to vector<1x128xf32>
    %c0_61 = arith.constant 0 : index
    %c0_62 = arith.constant 0 : index
    %c0_63 = arith.constant 0 : index
    %124 = vector.load %arg21[%c0_61, %c0_62, %c0_63] : memref<1x1x128xf32, #tpu.memory_space<vmem>>, vector<1x1x128xf32>
    %125 = vector.shape_cast %124 : vector<1x1x128xf32> to vector<1x128xf32>
    %cst_64 = arith.constant dense<0.000000e+00> : vector<24xf32>
    %126 = vector.multi_reduction <add>, %121, %cst_64 [1] : vector<24x128xf32> to vector<24xf32>
    %127 = vector.shape_cast %126 : vector<24xf32> to vector<24x1xf32>
    %cst_65 = arith.constant 1.280000e+02 : f32
    %128 = vector.broadcast %cst_65 : f32 to vector<24x1xf32>
    %129 = arith.divf %127, %128 : vector<24x1xf32>
    %130 = vector.broadcast %129 : vector<24x1xf32> to vector<24x128xf32>
    %131 = arith.subf %121, %130 : vector<24x128xf32>
    %132 = arith.mulf %131, %131 : vector<24x128xf32>
    %cst_66 = arith.constant dense<0.000000e+00> : vector<24xf32>
    %133 = vector.multi_reduction <add>, %132, %cst_66 [1] : vector<24x128xf32> to vector<24xf32>
    %134 = vector.shape_cast %133 : vector<24xf32> to vector<24x1xf32>
    %cst_67 = arith.constant 1.280000e+02 : f32
    %135 = vector.broadcast %cst_67 : f32 to vector<24x1xf32>
    %136 = arith.divf %134, %135 : vector<24x1xf32>
    %137 = vector.broadcast %129 : vector<24x1xf32> to vector<24x128xf32>
    %138 = arith.subf %121, %137 : vector<24x128xf32>
    %cst_68 = arith.constant 9.99999974E-6 : f32
    %139 = vector.broadcast %cst_68 : f32 to vector<24x1xf32>
    %140 = arith.addf %136, %139 : vector<24x1xf32>
    %141 = math.rsqrt %140 : vector<24x1xf32>
    %142 = vector.broadcast %141 : vector<24x1xf32> to vector<24x128xf32>
    %143 = arith.mulf %138, %142 : vector<24x128xf32>
    %144 = vector.broadcast %123 : vector<1x128xf32> to vector<24x128xf32>
    %145 = arith.mulf %143, %144 : vector<24x128xf32>
    %146 = vector.broadcast %125 : vector<1x128xf32> to vector<24x128xf32>
    %147 = arith.addf %145, %146 : vector<24x128xf32>
    %c0_69 = arith.constant 0 : index
    %c0_70 = arith.constant 0 : index
    %148 = vector.load %arg22[%c0_69, %c0_70] : memref<24x128xf32, #tpu.memory_space<vmem>>, vector<24x128xf32>
    tpu.vector_store %arg22[%c0_69, %c0_70], %147 {strides = array<i32>} : memref<24x128xf32, #tpu.memory_space<vmem>>, vector<24x128xf32>,
    return
  }
  func.func @transform_0(%arg0: i32) -> (i32, i32) {
    %c0_i32 = arith.constant 0 : i32
    %c0_i32_0 = arith.constant 0 : i32
    %c0_i32_1 = arith.constant 0 : i32
    return %c0_i32, %c0_i32_0 : i32, i32
  }
  func.func @transform_1(%arg0: i32) -> (i32, i32) {
    %c0_i32 = arith.constant 0 : i32
    %c0_i32_0 = arith.constant 0 : i32
    %c0_i32_1 = arith.constant 0 : i32
    return %c0_i32, %c0_i32_0 : i32, i32
  }
  func.func @transform_2(%arg0: i32) -> (i32, i32) {
    %c0_i32 = arith.constant 0 : i32
    %c0_i32_0 = arith.constant 0 : i32
    %c0_i32_1 = arith.constant 0 : i32
    return %c0_i32, %c0_i32_0 : i32, i32
  }
  func.func @transform_3(%arg0: i32) -> (i32, i32) {
    %c0_i32 = arith.constant 0 : i32
    %c0_i32_0 = arith.constant 0 : i32
    %c0_i32_1 = arith.constant 0 : i32
    return %c0_i32, %c0_i32_0 : i32, i32
  }
  func.func @transform_4(%arg0: i32) -> (i32, i32) {
    %c0_i32 = arith.constant 0 : i32
    %c0_i32_0 = arith.constant 0 : i32
    %c0_i32_1 = arith.constant 0 : i32
    return %c0_i32, %c0_i32_0 : i32, i32
  }
  func.func @transform_5(%arg0: i32) -> (i32, i32, i32) {
    %c0_i32 = arith.constant 0 : i32
    %c0_i32_0 = arith.constant 0 : i32
    %c0_i32_1 = arith.constant 0 : i32
    return %arg0, %c0_i32, %c0_i32_0 : i32, i32, i32
  }
  func.func @transform_6(%arg0: i32) -> (i32, i32, i32) {
    %c0_i32 = arith.constant 0 : i32
    %c0_i32_0 = arith.constant 0 : i32
    %c0_i32_1 = arith.constant 0 : i32
    return %arg0, %c0_i32, %c0_i32_0 : i32, i32, i32
  }
  func.func @transform_7(%arg0: i32) -> (i32, i32, i32) {
    %c0_i32 = arith.constant 0 : i32
    %c0_i32_0 = arith.constant 0 : i32
    %c0_i32_1 = arith.constant 0 : i32
    return %arg0, %c0_i32, %c0_i32_0 : i32, i32, i32
  }
  func.func @transform_8(%arg0: i32) -> (i32, i32, i32) {
    %c0_i32 = arith.constant 0 : i32
    %c0_i32_0 = arith.constant 0 : i32
    %c0_i32_1 = arith.constant 0 : i32
    return %arg0, %c0_i32, %c0_i32_0 : i32, i32, i32
  }
  func.func @transform_9(%arg0: i32) -> (i32, i32, i32) {
    %c0_i32 = arith.constant 0 : i32
    %c0_i32_0 = arith.constant 0 : i32
    %c0_i32_1 = arith.constant 0 : i32
    return %arg0, %c0_i32, %c0_i32_0 : i32, i32, i32
  }
  func.func @transform_10(%arg0: i32) -> (i32, i32, i32) {
    %c0_i32 = arith.constant 0 : i32
    %c0_i32_0 = arith.constant 0 : i32
    %c0_i32_1 = arith.constant 0 : i32
    return %arg0, %c0_i32, %c0_i32_0 : i32, i32, i32
  }
  func.func @transform_11(%arg0: i32) -> (i32, i32, i32) {
    %c0_i32 = arith.constant 0 : i32
    %c0_i32_0 = arith.constant 0 : i32
    %c0_i32_1 = arith.constant 0 : i32
    return %arg0, %c0_i32, %c0_i32_0 : i32, i32, i32
  }
  func.func @transform_12(%arg0: i32) -> (i32, i32, i32) {
    %c0_i32 = arith.constant 0 : i32
    %c0_i32_0 = arith.constant 0 : i32
    %c0_i32_1 = arith.constant 0 : i32
    return %arg0, %c0_i32, %c0_i32_0 : i32, i32, i32
  }
  func.func @transform_13(%arg0: i32) -> (i32, i32, i32) {
    %c0_i32 = arith.constant 0 : i32
    %c0_i32_0 = arith.constant 0 : i32
    %c0_i32_1 = arith.constant 0 : i32
    return %arg0, %c0_i32, %c0_i32_0 : i32, i32, i32
  }
  func.func @transform_14(%arg0: i32) -> (i32, i32, i32) {
    %c0_i32 = arith.constant 0 : i32
    %c0_i32_0 = arith.constant 0 : i32
    %c0_i32_1 = arith.constant 0 : i32
    return %arg0, %c0_i32, %c0_i32_0 : i32, i32, i32
  }
  func.func @transform_15(%arg0: i32) -> (i32, i32, i32) {
    %c0_i32 = arith.constant 0 : i32
    %c0_i32_0 = arith.constant 0 : i32
    %c0_i32_1 = arith.constant 0 : i32
    return %arg0, %c0_i32, %c0_i32_0 : i32, i32, i32
  }
  func.func @transform_16(%arg0: i32) -> (i32, i32, i32) {
    %c0_i32 = arith.constant 0 : i32
    %c0_i32_0 = arith.constant 0 : i32
    %c0_i32_1 = arith.constant 0 : i32
    return %arg0, %c0_i32, %c0_i32_0 : i32, i32, i32
  }
  func.func @transform_17(%arg0: i32) -> (i32, i32, i32) {
    %c0_i32 = arith.constant 0 : i32
    %c0_i32_0 = arith.constant 0 : i32
    %c0_i32_1 = arith.constant 0 : i32
    return %arg0, %c0_i32, %c0_i32_0 : i32, i32, i32
  }
  func.func @transform_18(%arg0: i32) -> (i32, i32, i32) {
    %c0_i32 = arith.constant 0 : i32
    %c0_i32_0 = arith.constant 0 : i32
    %c0_i32_1 = arith.constant 0 : i32
    return %arg0, %c0_i32, %c0_i32_0 : i32, i32, i32
  }
  func.func @transform_19(%arg0: i32) -> (i32, i32, i32) {
    %c0_i32 = arith.constant 0 : i32
    %c0_i32_0 = arith.constant 0 : i32
    %c0_i32_1 = arith.constant 0 : i32
    return %arg0, %c0_i32, %c0_i32_0 : i32, i32, i32
  }
  func.func @transform_20(%arg0: i32) -> (i32, i32, i32) {
    %c0_i32 = arith.constant 0 : i32
    %c0_i32_0 = arith.constant 0 : i32
    %c0_i32_1 = arith.constant 0 : i32
    return %arg0, %c0_i32, %c0_i32_0 : i32, i32, i32
  }
  func.func @transform_21(%arg0: i32) -> (i32, i32) {
    %c0_i32 = arith.constant 0 : i32
    %c0_i32_0 = arith.constant 0 : i32
    %c0_i32_1 = arith.constant 0 : i32
    return %c0_i32, %c0_i32_0 : i32, i32
  }
}

</mosaic_0001>

<bundles_post_ra>
// kernel: patch_transformer_encoder.1
= control target key start
LH: loop header
LB: loop body
LE: loop exit
PB: predicated region body
PF: predicated region fallthrough
CT: control target
= control target key end

     0   :  { %s9815_s0 = inlined_call_operand.vmem [shape: bf16[24,6400], index: 0, kind: input, shape index: {}]   ;;  %s9816_s1 = inlined_call_operand.vmem [shape: s8[6400,128], index: 1, kind: input, shape index: {}]   ;;  %s9817_s2 = inlined_call_operand.vmem [shape: f32[1,128], index: 2, kind: input, shape index: {}]   ;;  %s9818_s3 = inlined_call_operand.vmem [shape: f32[1,128], index: 3, kind: input, shape index: {}]   ;;  %s9819_s4 = inlined_call_operand.vmem [shape: f32[12,128], index: 4, kind: input, shape index: {}]   ;;  %s9820_s5 = inlined_call_operand.vmem [shape: s8[4,128,384], index: 5, kind: input, shape index: {}]   ;;  %s9821_s6 = inlined_call_operand.vmem [shape: f32[4,1,384], index: 6, kind: input, shape index: {}]   ;;  %s9822_s7 = inlined_call_operand.vmem [shape: f32[4,1,384], index: 7, kind: input, shape index: {}]   ;;  %s9823_s8 = inlined_call_operand.vmem [shape: s8[4,128,128], index: 8, kind: input, shape index: {}]   ;;  %s9824_s9 = inlined_call_operand.vmem [shape: f32[4,1,128], index: 9, kind: input, shape index: {}]   ;;  %s9825_s10 = inlined_call_operand.vmem [shape: f32[4,1,128], index: 10, kind: input, shape index: {}]   ;;  %s9826_s11 = inlined_call_operand.vmem [shape: s8[4,128,1024], index: 11, kind: input, shape index: {}]   ;;  %s9827_s12 = inlined_call_operand.vmem [shape: f32[4,1,1024], index: 12, kind: input, shape index: {}]   ;;  %s9828_s13 = inlined_call_operand.vmem [shape: f32[4,1,1024], index: 13, kind: input, shape index: {}]   ;;  %s9829_s14 = inlined_call_operand.vmem [shape: s8[4,1024,128], index: 14, kind: input, shape index: {}]   ;;  %s9830_s15 = inlined_call_operand.vmem [shape: f32[4,1,128], index: 15, kind: input, shape index: {}]   ;;  %s9831_s16 = inlined_call_operand.vmem [shape: f32[4,1,128], index: 16, kind: input, shape index: {}]   ;;  %s9832_s17 = inlined_call_operand.vmem [shape: f32[4,1,128], index: 17, kind: input, shape index: {}]   ;;  %s9833_s18 = inlined_call_operand.vmem [shape: f32[4,1,128], index: 18, kind: input, shape index: {}]   ;;  %s9834_s19 = inlined_call_operand.vmem [shape: f32[4,1,128], index: 19, kind: input, shape index: {}]   ;;  %s9835_s20 = inlined_call_operand.vmem [shape: f32[4,1,128], index: 20, kind: input, shape index: {}]   ;;  %s9836_s21 = inlined_call_operand.vmem [shape: f32[24,128], index: 21, kind: output, shape index: {}]  }
   0x1   :  { %9844 = sst [smem:[#allocation6_spill]] %s9815_s0 }
   0x2   :  { %9845 = sst [smem:[#allocation7_spill]] %s9816_s1 }
   0x3   :  { %9846 = sst [smem:[#allocation8_spill]] %s9817_s2  ;;  %s8101_s2 = smov 0  }
   0x4   :  { %9847 = sst [smem:[#allocation9_spill]] %s9818_s3 }
   0x5   :  { %9848 = sst [smem:[#allocation10_spill]] %s9819_s4 }
   0x6   :  { %9849 = sst [smem:[#allocation11_spill]] %s9820_s5 }
   0x7   :  { %9850 = sst [smem:[#allocation12_spill]] %s9821_s6 }
   0x8   :  { %9851 = sst [smem:[#allocation13_spill]] %s9822_s7 }
   0x9   :  { %9852 = sst [smem:[#allocation14_spill]] %s9823_s8 }
   0xa   :  { %9853 = sst [smem:[#allocation15_spill]] %s9826_s11 }
   0xb   :  { %9854 = sst [smem:[#allocation16_spill]] %s9827_s12 }
   0xc   :  { %9855 = sst [smem:[#allocation17_spill]] %s9828_s13 }
   0xd   :  { %9856 = sst [smem:[#allocation18_spill]] %s9829_s14 }
   0xe   :  { %9857 = sst [smem:[#allocation19_spill]] %s9834_s19 }
   0xf   :  { %9858 = sst [smem:[#allocation20_spill]] %s9835_s20 }
  0x10   :  { %9859 = sst [smem:[#allocation21_spill]] %s9836_s21 }
  0x11 LB: > { %9860 = sst [smem:[#allocation2_spill]] %s7984_s2  ;;  %s6398_s25 = sadd.s32 4294967295, %s7984_s2   ;;  %s7984_s2 = sphi %s8101_s2, %s31_s2  }
  0x12   : > { %p6401_p0 = scmp.ge.s32.totalorder %s7984_s2, 1  ;;  %p712_p1 = scmp.lt.s32.totalorder %s7984_s2, 5 }
  0x14   : > { %p713_p2 = pnand %p6401_p0, %p712_p1 }
  0x16   : > { %716 = sbr.rel (%p713_p2) target bundleno = 3317 (0xcf5), region = 104 }
  0x1d   : > { %p822_p3 = scmp.lt.s32.totalorder %s6398_s25, 3  ;;  %s9861_s8 = sld [smem:[#allocation14_spill]] }
  0x1e   : > { %s9863_s22 = sld [smem:[#allocation11_spill]]  ;;  %s9864_s6 = sld [smem:[#allocation12_spill]] }
  0x1f   : > { %s8109_s26 = scalar_select %p822_p3, %s6398_s25, 3 }
  0x20   : > { %s9865_s7 = sld [smem:[#allocation13_spill]]  ;;  %s9866_s11 = sld [smem:[#allocation15_spill]] }
  0x21   : > { %s7743_s27 = smul.u32 96, %s8109_s26  ;;  %s6580_s3 = sshll.u32 %s8109_s26, 5 }
  0x22   : > { %s7744_s28 = smul.u32 3, %s8109_s26  ;;  %s6581_s5 = sshll.u32 %s8109_s26, 8 }
  0x23   : > { %s8117_s4 = scalar_lea.vmem %s9861_s8, %s6580_s3  ;;  %s6407_s24 = sshll.u32 %s8109_s26, 3 }
  0x24   : > { %9862 = sst [smem:[#allocation3_spill]] %s8117_s4  ;;  %s8122_s23 = scalar_lea.vmem %s9863_s22, %s7743_s27 }
  0x25   : > { %s8131_s19 = scalar_lea.vmem %s9864_s6, %s7744_s28  ;;  %s9867_s12 = sld [smem:[#allocation16_spill]] }
  0x26   : > { %s8136_s3 = scalar_lea.vmem %s9865_s7, %s7744_s28  ;;  %s8146_s1 = scalar_lea.vmem %s9866_s11, %s6581_s5 }
  0x27   : > { %s9869_s13 = sld [smem:[#allocation17_spill]]  ;;  %s9871_s14 = sld [smem:[#allocation18_spill]] }
  0x28   : > { %s875_s29 = scalar_lea.vmem %s9833_s18, %s8109_s26  ;;  %s9873_s27 = sld [smem:[#allocation20_spill]] }
  0x29   : > { %p6411_p4 = scmp.ne.s32.totalorder %s6398_s25, 0 }
  0x2a   : > { %s9874_s2 = sld [smem:[#allocation7_spill]] (!%p6411_p4)  ;;  %s9876_s6 = sld [smem:[#allocation6_spill]] (!%p6411_p4) }
  0x2b   : > { %s8152_s21 = scalar_lea.vmem %s9867_s12, %s6407_s24  ;;  %s9880_s20 = sld [smem:[#allocation21_spill]] (!%p6411_p4) }
  0x2c   : > { %9868 = sst [smem:[#allocation4_spill]] %s8152_s21  ;;  %s872_s21 = scalar_lea.vmem %s9832_s17, %s8109_s26 }
  0x2d   : > { %s8157_s28 = scalar_lea.vmem %s9869_s13, %s6407_s24  ;;  %s8162_s30 = scalar_lea.vmem %s9871_s14, %s6581_s5 }
  0x2e   : > { %9870 = sst [smem:[#allocation5_spill]] %s8157_s28  ;;  %s9872_s5 = sld [smem:[#allocation19_spill]] }
  0x2f   : > { %s881_s4 = scalar_lea.vmem %s9873_s27, %s8109_s26  ;;  %886 = sbr.rel (%p6411_p4) target bundleno = 698 (0x2ba), region = 108 }
  0x30   : > { %s9875_s22 = smov (!%p6411_p4), %s9874_s2  ;;  %v891_v0 = vld [vmem:[%s9874_s2 + $0x20] sm:$0xff] (!%p6411_p4)  ;;  %v7763_v19 = vld [vmem:[%s9876_s6 + $0xc] ss:$200 sps:$4 sm:$0xff] (!%p6411_p4)   ;;  %v7761_v57 = vld [vmem:[%s9876_s6 + $0x8] ss:$200 sps:$4 sm:$0xff] (!%p6411_p4)   ;;  %s9877_s13 = sld [smem:[#allocation8_spill]] (!%p6411_p4) }
  0x31   : > { %v899_v1 = vld [vmem:[%s9875_s22 + $0x60] sm:$0xff] (!%p6411_p4)  ;;  %v1095_v3 = vunpack.c.l.s8.bf16 (!%p6411_p4), %v891_v0  ;;  %v1096_v4 = vunpack.c.h.s8.bf16 (!%p6411_p4), %v891_v0  ;;  %v892_v10 = vld [vmem:[%s9875_s22 + $0x28] sm:$0xff] (!%p6411_p4)  ;;  %v893_v24 = vld [vmem:[%s9875_s22 + $0x30] sm:$0xff] (!%p6411_p4)  ;;  %2067 = vmatprep.mubr.bf16.mxu1 (!%p6411_p4), %v7763_v19  ;;  %s9878_s28 = sld [smem:[#allocation9_spill]] (!%p6411_p4) }
  0x32   : > { %v887_v2 = vld [vmem:[%s9875_s22] sm:$0xff] (!%p6411_p4)  ;;  %v1111_v5 = vunpack.c.l.s8.bf16 (!%p6411_p4), %v899_v1  ;;  %v1112_v6 = vunpack.c.h.s8.bf16 (!%p6411_p4), %v899_v1  ;;  %v900_v11 = vld [vmem:[%s9875_s22 + $0x68] sm:$0xff] (!%p6411_p4)  ;;  %v1097_v15 = vunpack.c.l.s8.bf16 (!%p6411_p4), %v892_v10  ;;  %v1098_v22 = vunpack.c.h.s8.bf16 (!%p6411_p4), %v892_v10  ;;  %v901_v25 = vld [vmem:[%s9875_s22 + $0x70] sm:$0xff] (!%p6411_p4) }
  0x33   : > { %v895_v7 = vld [vmem:[%s9875_s22 + $0x40] sm:$0xff] (!%p6411_p4)  ;;  %v1087_v8 = vunpack.c.l.s8.bf16 (!%p6411_p4), %v887_v2  ;;  %6583 = vmatprep.subr.bf16.mxu0 (!%p6411_p4), %v1095_v3  ;;  %v1088_v12 = vunpack.c.h.s8.bf16 (!%p6411_p4), %v887_v2  ;;  %v888_v14 = vld [vmem:[%s9875_s22 + $0x8] sm:$0xff] (!%p6411_p4)  ;;  %v1113_v16 = vunpack.c.l.s8.bf16 (!%p6411_p4), %v900_v11  ;;  %v1114_v23 = vunpack.c.h.s8.bf16 (!%p6411_p4), %v900_v11  ;;  %v889_v30 = vld [vmem:[%s9875_s22 + $0x10] sm:$0xff] (!%p6411_p4) }
  0x34   : > { %s878_s8 = scalar_lea.vmem %s9872_s5, %s8109_s26  ;;  %v1103_v9 = vunpack.c.l.s8.bf16 (!%p6411_p4), %v895_v7  ;;  %6611 = vmatprep.subr.bf16.mxu1 (!%p6411_p4), %v1111_v5  ;;  %v1104_v13 = vunpack.c.h.s8.bf16 (!%p6411_p4), %v895_v7  ;;  %v896_v17 = vld [vmem:[%s9875_s22 + $0x48] sm:$0xff] (!%p6411_p4)  ;;  %v1089_v20 = vunpack.c.l.s8.bf16 (!%p6411_p4), %v888_v14  ;;  %v1090_v26 = vunpack.c.h.s8.bf16 (!%p6411_p4), %v888_v14  ;;  %v897_v31 = vld [vmem:[%s9875_s22 + $0x50] sm:$0xff] (!%p6411_p4)  ;;  %v894_v36 = vld [vmem:[%s9875_s22 + $0x38] sm:$0xff] (!%p6411_p4)  ;;  %s9879_s5 = sld [smem:[#allocation10_spill]] (!%p6411_p4) }
  0x35   : > { %6584 = vmatpush3.bf16.msra.mxu0 (!%p6411_p4), %v1087_v8  ;;  %v7760_v18 = vld [vmem:[%s9876_s6 + $0x4] ss:$200 sps:$4 sm:$0xff] (!%p6411_p4)   ;;  %v1105_v21 = vunpack.c.l.s8.bf16 (!%p6411_p4), %v896_v17  ;;  %v1106_v27 = vunpack.c.h.s8.bf16 (!%p6411_p4), %v896_v17  ;;  %v1099_v28 = vunpack.c.l.s8.bf16 (!%p6411_p4), %v893_v24  ;;  %v1115_v29 = vunpack.c.l.s8.bf16 (!%p6411_p4), %v901_v25  ;;  %v902_v37 = vld [vmem:[%s9875_s22 + $0x78] sm:$0xff] (!%p6411_p4)  ;;  %v7758_v56 = vld [vmem:[%s9876_s6] ss:$200 sps:$4 sm:$0xff] (!%p6411_p4)  }
  0x36   : > { %6612 = vmatpush3.bf16.msra.mxu1 %v1103_v9  ;;  %6585 = vmatprep.subr.bf16.mxu0 %v1096_v4  ;;  %v1091_v32 = vunpack.c.l.s8.bf16 %v889_v30  ;;  %v1107_v33 = vunpack.c.l.s8.bf16 %v897_v31  ;;  %v1100_v34 = vunpack.c.h.s8.bf16 %v893_v24  ;;  %v1116_v35 = vunpack.c.h.s8.bf16 %v901_v25  ;;  %v890_v42 = vld [vmem:[%s9875_s22 + $0x18] sm:$0xff]  ;;  %v907_v48 = vld [vmem:[%s9875_s22 + $0xa0] sm:$0xff]  ;;  %v1537_v58 = vld [vmem:[%s9876_s6 + $0x190] sm:$0xff] }
  0x37   : > { %6613 = vmatprep.subr.bf16.mxu1 %v1112_v6  ;;  %2019 = vmatprep.mubr.bf16.mxu0 %v7760_v18  ;;  %v1092_v38 = vunpack.c.h.s8.bf16 %v889_v30  ;;  %v1108_v39 = vunpack.c.h.s8.bf16 %v897_v31  ;;  %v1101_v40 = vunpack.c.l.s8.bf16 %v894_v36  ;;  %v1117_v41 = vunpack.c.l.s8.bf16 %v902_v37  ;;  %v898_v43 = vld [vmem:[%s9875_s22 + $0x58] sm:$0xff]  ;;  %v915_v49 = vld [vmem:[%s9875_s22 + $0xe0] sm:$0xff]  ;;  %v908_v0 = vld [vmem:[%s9875_s22 + $0xa8] sm:$0xff] }
  0x38   : > { %v1093_v44 = vunpack.c.l.s8.bf16 %v890_v42  ;;  %v1109_v45 = vunpack.c.l.s8.bf16 %v898_v43  ;;  %v1102_v46 = vunpack.c.h.s8.bf16 %v894_v36  ;;  %v1118_v47 = vunpack.c.h.s8.bf16 %v902_v37  ;;  %v903_v54 = vld [vmem:[%s9875_s22 + $0x80] sm:$0xff]  ;;  %v1538_v59 = vld [vmem:[%s9876_s6 + $0x198] sm:$0xff]  ;;  %v916_v1 = vld [vmem:[%s9875_s22 + $0xe8] sm:$0xff] }
  0x39   : > { %6586 = vmatpush3.bf16.msra.mxu0 %v1088_v12  ;;  %v1094_v50 = vunpack.c.h.s8.bf16 %v890_v42  ;;  %v1110_v51 = vunpack.c.h.s8.bf16 %v898_v43  ;;  %v1127_v52 = vunpack.c.l.s8.bf16 %v907_v48  ;;  %v1143_v53 = vunpack.c.l.s8.bf16 %v915_v49  ;;  %v911_v55 = vld [vmem:[%s9875_s22 + $0xc0] sm:$0xff]  ;;  %v904_v8 = vld [vmem:[%s9875_s22 + $0x88] sm:$0xff]  ;;  %v917_v17 = vld [vmem:[%s9875_s22 + $0xf0] sm:$0xff] }
  0x3a   : > { %6614 = vmatpush3.bf16.msra.mxu1 %v1104_v13  ;;  %6587 = vmatprep.subr.bf16.mxu0 %v1097_v15  ;;  %v1119_v60 = vunpack.c.l.s8.bf16 %v903_v54  ;;  %v1135_v61 = vunpack.c.l.s8.bf16 %v911_v55  ;;  %v1128_v62 = vunpack.c.h.s8.bf16 %v907_v48  ;;  %v1144_v63 = vunpack.c.h.s8.bf16 %v915_v49  ;;  %v912_v9 = vld [vmem:[%s9875_s22 + $0xc8] sm:$0xff]  ;;  %v7770_v18 = vld [vmem:[%s9876_s6 + $0x14] ss:$200 sps:$4 sm:$0xff]   ;;  %v923_v42 = vld [vmem:[%s9875_s22 + $0x120] sm:$0xff] }
  0x3b   : > { %6615 = vmatprep.subr.bf16.mxu1 %v1113_v16  ;;  %v6463_v2 = vcombine.high %v1537_v58, %v1537_v58  ;;  %v6465_v3 = vcombine.high %v1538_v59, %v1538_v59  ;;  %v1120_v4 = vunpack.c.h.s8.bf16 %v903_v54  ;;  %v1136_v5 = vunpack.c.h.s8.bf16 %v911_v55  ;;  %v909_v16 = vld [vmem:[%s9875_s22 + $0xb0] sm:$0xff]  ;;  %v7773_v19 = vld [vmem:[%s9876_s6 + $0x1c] ss:$200 sps:$4 sm:$0xff]  }
  0x3c   : > { %v1129_v6 = vunpack.c.l.s8.bf16 %v908_v0  ;;  %v1145_v7 = vunpack.c.l.s8.bf16 %v916_v1  ;;  %v6462_v10 = vcombine.low %v1537_v58, %v1537_v58  ;;  %v6464_v11 = vcombine.low %v1538_v59, %v1538_v59  ;;  %v905_v24 = vld [vmem:[%s9875_s22 + $0x90] sm:$0xff]  ;;  %v910_v30 = vld [vmem:[%s9875_s22 + $0xb8] sm:$0xff]  ;;  %v931_v43 = vld [vmem:[%s9875_s22 + $0x160] sm:$0xff] }
  0x3d   : > { %6588 = vmatpush3.bf16.msra.mxu0 %v1089_v20  ;;  %v1121_v12 = vunpack.c.l.s8.bf16 %v904_v8  ;;  %v1137_v13 = vunpack.c.l.s8.bf16 %v912_v9  ;;  %v1130_v14 = vunpack.c.h.s8.bf16 %v908_v0  ;;  %v1146_v15 = vunpack.c.h.s8.bf16 %v916_v1  ;;  %v913_v25 = vld [vmem:[%s9875_s22 + $0xd0] sm:$0xff]  ;;  %v918_v31 = vld [vmem:[%s9875_s22 + $0xf8] sm:$0xff]  ;;  %v919_v48 = vld [vmem:[%s9875_s22 + $0x100] sm:$0xff] }
  0x3e   : > { %6616 = vmatpush3.bf16.msra.mxu1 %v1105_v21  ;;  %6589 = vmatprep.subr.bf16.mxu0 %v1098_v22  ;;  %v1122_v20 = vunpack.c.h.s8.bf16 %v904_v8  ;;  %v1138_v21 = vunpack.c.h.s8.bf16 %v912_v9  ;;  %v1131_v22 = vunpack.c.l.s8.bf16 %v909_v16  ;;  %v1133_v36 = vunpack.c.l.s8.bf16 %v910_v30  ;;  %v927_v49 = vld [vmem:[%s9875_s22 + $0x140] sm:$0xff]  ;;  %v924_v59 = vld [vmem:[%s9875_s22 + $0x128] sm:$0xff] }
  0x3f   : > { %6617 = vmatprep.subr.bf16.mxu1 %v1114_v23  ;;  %v1147_v23 = vunpack.c.l.s8.bf16 %v917_v17  ;;  %v1149_v37 = vunpack.c.l.s8.bf16 %v918_v31  ;;  %v1151_v54 = vunpack.c.l.s8.bf16 %v919_v48  ;;  %v1167_v55 = vunpack.c.l.s8.bf16 %v927_v49 }
  0x40   : > { %v1161_v0 = vunpack.c.l.s8.bf16 %v924_v59  ;;  %v1162_v8 = vunpack.c.h.s8.bf16 %v924_v59 }
  0x41   : > { %6590 = vmatpush3.bf16.msra.mxu0 %v1090_v26  ;;  %v1123_v26 = vunpack.c.l.s8.bf16 %v905_v24 }
  0x42   : > { %6618 = vmatpush3.bf16.msra.mxu1 %v1106_v27  ;;  %6591 = vmatprep.subr.bf16.mxu0 %v1099_v28  ;;  %v1139_v27 = vunpack.c.l.s8.bf16 %v913_v25  ;;  %v1132_v28 = vunpack.c.h.s8.bf16 %v909_v16 }
  0x43   : > { %6619 = vmatprep.subr.bf16.mxu1 %v1115_v29  ;;  %v1148_v29 = vunpack.c.h.s8.bf16 %v917_v17 }
  0x45   : > { %6592 = vmatpush3.bf16.msra.mxu0 %v1091_v32  ;;  %v906_v32 = vld [vmem:[%s9875_s22 + $0x98] sm:$0xff] }
  0x46   : > { %6620 = vmatpush3.bf16.msra.mxu1 %v1107_v33  ;;  %6593 = vmatprep.subr.bf16.mxu0 %v1100_v34  ;;  %v914_v33 = vld [vmem:[%s9875_s22 + $0xd8] sm:$0xff]  ;;  %v1124_v34 = vunpack.c.h.s8.bf16 %v905_v24 }
  0x47   : > { %6621 = vmatprep.subr.bf16.mxu1 %v1116_v35  ;;  %v1140_v35 = vunpack.c.h.s8.bf16 %v913_v25  ;;  %v926_v24 = vld [vmem:[%s9875_s22 + $0x138] sm:$0xff] }
  0x48   : > { %v934_v25 = vld [vmem:[%s9875_s22 + $0x178] sm:$0xff] }
  0x49   : > { %6594 = vmatpush3.bf16.msra.mxu0 %v1092_v38  ;;  %v1125_v38 = vunpack.c.l.s8.bf16 %v906_v32 }
  0x4a   : > { %6622 = vmatpush3.bf16.msra.mxu1 %v1108_v39  ;;  %6595 = vmatprep.subr.bf16.mxu0 %v1101_v40  ;;  %v1141_v39 = vunpack.c.l.s8.bf16 %v914_v33  ;;  %v1134_v40 = vunpack.c.h.s8.bf16 %v910_v30  ;;  %v922_v30 = vld [vmem:[%s9875_s22 + $0x118] sm:$0xff] }
  0x4b   : > { %6623 = vmatprep.subr.bf16.mxu1 %v1117_v41  ;;  %v1150_v41 = vunpack.c.h.s8.bf16 %v918_v31  ;;  %v930_v31 = vld [vmem:[%s9875_s22 + $0x158] sm:$0xff] }
  0x4d   : > { %6596 = vmatpush3.bf16.msra.mxu0 %v1093_v44  ;;  %v1126_v44 = vunpack.c.h.s8.bf16 %v906_v32  ;;  %v1157_v32 = vunpack.c.l.s8.bf16 %v922_v30 }
  0x4e   : > { %6624 = vmatpush3.bf16.msra.mxu1 %v1109_v45  ;;  %6597 = vmatprep.subr.bf16.mxu0 %v1102_v46  ;;  %v1142_v45 = vunpack.c.h.s8.bf16 %v914_v33  ;;  %v1159_v46 = vunpack.c.l.s8.bf16 %v923_v42  ;;  %v1173_v33 = vunpack.c.l.s8.bf16 %v930_v31 }
  0x4f   : > { %6625 = vmatprep.subr.bf16.mxu1 %v1118_v47  ;;  %v1175_v47 = vunpack.c.l.s8.bf16 %v931_v43 }
  0x51   : > { %6598 = vmatpush3.bf16.msra.mxu0 %v1094_v50  ;;  %v7768_v50 = vld [vmem:[%s9876_s6 + $0x10] ss:$200 sps:$4 sm:$0xff]  }
  0x52   : > { %6626 = vmatpush3.bf16.msra.mxu1 %v1110_v51  ;;  %6639 = vmatprep.subr.bf16.mxu0 %v1127_v52  ;;  %v7771_v51 = vld [vmem:[%s9876_s6 + $0x18] ss:$200 sps:$4 sm:$0xff]  }
  0x53   : > { %6667 = vmatprep.subr.bf16.mxu1 %v1143_v53  ;;  %v1539_v52 = vld [vmem:[%s9876_s6 + $0x1a0] sm:$0xff]  ;;  %v1540_v53 = vld [vmem:[%s9876_s6 + $0x1a8] sm:$0xff] }
  0x54   : > { %2020 = vmatmul.mubr.bf16.vlgmr.msra.gmra.mrb[0].mxu0 %v7758_v56  ;;  %v1160_v56 = vunpack.c.h.s8.bf16 %v923_v42  ;;  %v6467_v58 = vcombine.high %v1539_v52, %v1539_v52  ;;  %v935_v42 = vld [vmem:[%s9875_s22 + $0x180] sm:$0xff] }
  0x55   : > { %2068 = vmatmul.mubr.bf16.vlgmr.msra.gmra.mrb[0].mxu1 %v7761_v57  ;;  %6640 = vmatpush3.bf16.msra.mxu0 %v1119_v60  ;;  %v1176_v57 = vunpack.c.h.s8.bf16 %v931_v43  ;;  %v932_v60 = vld [vmem:[%s9875_s22 + $0x168] sm:$0xff]  ;;  %v943_v43 = vld [vmem:[%s9875_s22 + $0x1c0] sm:$0xff] }
  0x56   : > { %6668 = vmatpush3.bf16.msra.mxu1 %v1135_v61  ;;  %6641 = vmatprep.subr.bf16.mxu0 %v1128_v62  ;;  %v6469_v61 = vcombine.high %v1540_v53, %v1540_v53  ;;  %v1152_v62 = vunpack.c.h.s8.bf16 %v919_v48  ;;  %v1177_v1 = vunpack.c.l.s8.bf16 %v932_v60  ;;  %v1178_v9 = vunpack.c.h.s8.bf16 %v932_v60  ;;  %v936_v60 = vld [vmem:[%s9875_s22 + $0x188] sm:$0xff] }
  0x57   : > { %6669 = vmatprep.subr.bf16.mxu1 %v1144_v63  ;;  %2027 = vmatprep.mubr.bf16.mxu0 %v6463_v2  ;;  %v1168_v63 = vunpack.c.h.s8.bf16 %v927_v49  ;;  %v920_v2 = vld [vmem:[%s9875_s22 + $0x108] sm:$0xff]  ;;  %v1183_v48 = vunpack.c.l.s8.bf16 %v935_v42  ;;  %v1199_v49 = vunpack.c.l.s8.bf16 %v943_v43 }
  0x58   : > { %2075 = vmatprep.mubr.bf16.mxu1 %v6465_v3  ;;  %v928_v3 = vld [vmem:[%s9875_s22 + $0x148] sm:$0xff] }
  0x59   : > { %6642 = vmatpush3.bf16.msra.mxu0 %v1120_v4  ;;  %v6466_v4 = vcombine.low %v1539_v52, %v1539_v52 }
  0x5a   : > { %6670 = vmatpush3.bf16.msra.mxu1 %v1136_v5  ;;  %6643 = vmatprep.subr.bf16.mxu0 %v1129_v6  ;;  %v6468_v5 = vcombine.low %v1540_v53, %v1540_v53  ;;  %v1153_v6 = vunpack.c.l.s8.bf16 %v920_v2  ;;  %v940_v53 = vld [vmem:[%s9875_s22 + $0x1a8] sm:$0xff] }
  0x5b   : > { %6671 = vmatprep.subr.bf16.mxu1 %v1145_v7  ;;  %v1169_v7 = vunpack.c.l.s8.bf16 %v928_v3 }
  0x5c   : > { %2028 = vmatmul.mubr.bf16.gmra.mrb[4].mxu0 %v6462_v10  ;;  %v925_v10 = vld [vmem:[%s9875_s22 + $0x130] sm:$0xff] }
  0x5d   : > { %2076 = vmatmul.mubr.bf16.gmra.mrb[4].mxu1 %v6464_v11  ;;  %6644 = vmatpush3.bf16.msra.mxu0 %v1121_v12  ;;  %v933_v11 = vld [vmem:[%s9875_s22 + $0x170] sm:$0xff]  ;;  %v7780_v12 = vld [vmem:[%s9876_s6 + $0x24] ss:$200 sps:$4 sm:$0xff]   ;;  %v1163_v16 = vunpack.c.l.s8.bf16 %v925_v10 }
  0x5e   : > { %6672 = vmatpush3.bf16.msra.mxu1 %v1137_v13  ;;  %6645 = vmatprep.subr.bf16.mxu0 %v1130_v14  ;;  %v7783_v13 = vld [vmem:[%s9876_s6 + $0x2c] ss:$200 sps:$4 sm:$0xff]   ;;  %v1154_v14 = vunpack.c.h.s8.bf16 %v920_v2  ;;  %v1179_v17 = vunpack.c.l.s8.bf16 %v933_v11  ;;  %v1194_v2 = vunpack.c.h.s8.bf16 %v940_v53 }
  0x5f   : > { %6673 = vmatprep.subr.bf16.mxu1 %v1146_v15  ;;  %2115 = vmatprep.mubr.bf16.mxu0 %v7770_v18  ;;  %v1170_v15 = vunpack.c.h.s8.bf16 %v928_v3  ;;  %v921_v18 = vld [vmem:[%s9875_s22 + $0x110] sm:$0xff] }
  0x60   : > { %2163 = vmatprep.mubr.bf16.mxu1 %v7773_v19  ;;  %v929_v19 = vld [vmem:[%s9875_s22 + $0x150] sm:$0xff] }
  0x61   : > { %6646 = vmatpush3.bf16.msra.mxu0 %v1122_v20  ;;  %v1155_v20 = vunpack.c.l.s8.bf16 %v921_v18 }
  0x62   : > { %6674 = vmatpush3.bf16.msra.mxu1 %v1138_v21  ;;  %6647 = vmatprep.subr.bf16.mxu0 %v1131_v22  ;;  %v1171_v21 = vunpack.c.l.s8.bf16 %v929_v19  ;;  %v1164_v22 = vunpack.c.h.s8.bf16 %v925_v10 }
  0x63   : > { %6675 = vmatprep.subr.bf16.mxu1 %v1147_v23  ;;  %v1180_v23 = vunpack.c.h.s8.bf16 %v933_v11 }
  0x65   : > { %6648 = vmatpush3.bf16.msra.mxu0 %v1123_v26  ;;  %v1156_v26 = vunpack.c.h.s8.bf16 %v921_v18  ;;  %v942_v18 = vld [vmem:[%s9875_s22 + $0x1b8] sm:$0xff] }
  0x66   : > { %6676 = vmatpush3.bf16.msra.mxu1 %v1139_v27  ;;  %6649 = vmatprep.subr.bf16.mxu0 %v1132_v28  ;;  %v1172_v27 = vunpack.c.h.s8.bf16 %v929_v19  ;;  %v1165_v28 = vunpack.c.l.s8.bf16 %v926_v24  ;;  %v950_v19 = vld [vmem:[%s9875_s22 + $0x1f8] sm:$0xff] }
  0x67   : > { %6677 = vmatprep.subr.bf16.mxu1 %v1148_v29  ;;  %v1181_v29 = vunpack.c.l.s8.bf16 %v934_v25 }
  0x69   : > { %6650 = vmatpush3.bf16.msra.mxu0 %v1124_v34  ;;  %v1166_v34 = vunpack.c.h.s8.bf16 %v926_v24  ;;  %v938_v24 = vld [vmem:[%s9875_s22 + $0x198] sm:$0xff] }
  0x6a   : > { %6678 = vmatpush3.bf16.msra.mxu1 %v1140_v35  ;;  %6651 = vmatprep.subr.bf16.mxu0 %v1133_v36  ;;  %v1182_v35 = vunpack.c.h.s8.bf16 %v934_v25  ;;  %v939_v36 = vld [vmem:[%s9875_s22 + $0x1a0] sm:$0xff]  ;;  %v946_v25 = vld [vmem:[%s9875_s22 + $0x1d8] sm:$0xff] }
  0x6b   : > { %6679 = vmatprep.subr.bf16.mxu1 %v1149_v37  ;;  %v947_v37 = vld [vmem:[%s9875_s22 + $0x1e0] sm:$0xff] }
  0x6d   : > { %6652 = vmatpush3.bf16.msra.mxu0 %v1125_v38  ;;  %v1158_v38 = vunpack.c.h.s8.bf16 %v922_v30  ;;  %v955_v30 = vld [vmem:[%s9875_s22 + $0x220] sm:$0xff] }
  0x6e   : > { %6680 = vmatpush3.bf16.msra.mxu1 %v1141_v39  ;;  %6653 = vmatprep.subr.bf16.mxu0 %v1134_v40  ;;  %v1174_v39 = vunpack.c.h.s8.bf16 %v930_v31  ;;  %v1191_v40 = vunpack.c.l.s8.bf16 %v939_v36  ;;  %v963_v31 = vld [vmem:[%s9875_s22 + $0x260] sm:$0xff] }
  0x6f   : > { %6681 = vmatprep.subr.bf16.mxu1 %v1150_v41  ;;  %v1207_v41 = vunpack.c.l.s8.bf16 %v947_v37 }
  0x71   : > { %6654 = vmatpush3.bf16.msra.mxu0 %v1126_v44  ;;  %v7778_v44 = vld [vmem:[%s9876_s6 + $0x20] ss:$200 sps:$4 sm:$0xff]  }
  0x72   : > { %6682 = vmatpush3.bf16.msra.mxu1 %v1142_v45  ;;  %6695 = vmatprep.subr.bf16.mxu0 %v1159_v46  ;;  %v7781_v45 = vld [vmem:[%s9876_s6 + $0x28] ss:$200 sps:$4 sm:$0xff]  }
  0x73   : > { %6723 = vmatprep.subr.bf16.mxu1 %v1175_v47  ;;  %v1541_v46 = vld [vmem:[%s9876_s6 + $0x1b0] sm:$0xff]  ;;  %v1542_v47 = vld [vmem:[%s9876_s6 + $0x1b8] sm:$0xff] }
  0x74   : > { %2116 = vmatmul.mubr.bf16.vlgmr.msra.gmra.mrb[8].mxu0 %v7768_v50  ;;  %v1192_v50 = vunpack.c.h.s8.bf16 %v939_v36  ;;  %v6471_v52 = vcombine.high %v1541_v46, %v1541_v46  ;;  %v951_v36 = vld [vmem:[%s9875_s22 + $0x200] sm:$0xff] }
  0x75   : > { %2164 = vmatmul.mubr.bf16.vlgmr.msra.gmra.mrb[8].mxu1 %v7771_v51  ;;  %6696 = vmatpush3.bf16.msra.mxu0 %v1151_v54  ;;  %v1208_v51 = vunpack.c.h.s8.bf16 %v947_v37  ;;  %v948_v54 = vld [vmem:[%s9875_s22 + $0x1e8] sm:$0xff]  ;;  %v959_v37 = vld [vmem:[%s9875_s22 + $0x240] sm:$0xff] }
  0x76   : > { %6724 = vmatpush3.bf16.msra.mxu1 %v1167_v55  ;;  %6697 = vmatprep.subr.bf16.mxu0 %v1160_v56  ;;  %v6473_v55 = vcombine.high %v1542_v47, %v1542_v47  ;;  %v1184_v56 = vunpack.c.h.s8.bf16 %v935_v42  ;;  %v1209_v59 = vunpack.c.l.s8.bf16 %v948_v54  ;;  %v1210_v3 = vunpack.c.h.s8.bf16 %v948_v54  ;;  %v952_v54 = vld [vmem:[%s9875_s22 + $0x208] sm:$0xff] }
  0x77   : > { %6725 = vmatprep.subr.bf16.mxu1 %v1176_v57  ;;  %2123 = vmatprep.mubr.bf16.mxu0 %v6467_v58  ;;  %v1200_v57 = vunpack.c.h.s8.bf16 %v943_v43  ;;  %v1193_v58 = vunpack.c.l.s8.bf16 %v940_v53  ;;  %v1215_v42 = vunpack.c.l.s8.bf16 %v951_v36  ;;  %v1231_v43 = vunpack.c.l.s8.bf16 %v959_v37 }
  0x78   : > { %2171 = vmatprep.mubr.bf16.mxu1 %v6469_v61  ;;  %v944_v61 = vld [vmem:[%s9875_s22 + $0x1c8] sm:$0xff] }
  0x79   : > { %6698 = vmatpush3.bf16.msra.mxu0 %v1152_v62  ;;  %v6470_v62 = vcombine.low %v1541_v46, %v1541_v46 }
  0x7a   : > { %6726 = vmatpush3.bf16.msra.mxu1 %v1168_v63  ;;  %6699 = vmatprep.subr.bf16.mxu0 %v1161_v0  ;;  %v6472_v63 = vcombine.low %v1542_v47, %v1542_v47  ;;  %v1185_v0 = vunpack.c.l.s8.bf16 %v936_v60  ;;  %v956_v47 = vld [vmem:[%s9875_s22 + $0x228] sm:$0xff] }
  0x7b   : > { %6727 = vmatprep.subr.bf16.mxu1 %v1177_v1  ;;  %v1201_v1 = vunpack.c.l.s8.bf16 %v944_v61 }
  0x7c   : > { %2124 = vmatmul.mubr.bf16.gmra.mrb[12].mxu0 %v6466_v4  ;;  %v941_v4 = vld [vmem:[%s9875_s22 + $0x1b0] sm:$0xff] }
  0x7d   : > { %2172 = vmatmul.mubr.bf16.gmra.mrb[12].mxu1 %v6468_v5  ;;  %6700 = vmatpush3.bf16.msra.mxu0 %v1153_v6  ;;  %v949_v5 = vld [vmem:[%s9875_s22 + $0x1f0] sm:$0xff]  ;;  %v1195_v10 = vunpack.c.l.s8.bf16 %v941_v4 }
  0x7e   : > { %6728 = vmatpush3.bf16.msra.mxu1 %v1169_v7  ;;  %6701 = vmatprep.subr.bf16.mxu0 %v1162_v8  ;;  %v7790_v6 = vld [vmem:[%s9876_s6 + $0x34] ss:$200 sps:$4 sm:$0xff]   ;;  %v1186_v8 = vunpack.c.h.s8.bf16 %v936_v60  ;;  %v1211_v11 = vunpack.c.l.s8.bf16 %v949_v5  ;;  %v1226_v60 = vunpack.c.h.s8.bf16 %v956_v47 }
  0x7f   : > { %6729 = vmatprep.subr.bf16.mxu1 %v1178_v9  ;;  %2211 = vmatprep.mubr.bf16.mxu0 %v7780_v12  ;;  %v7793_v7 = vld [vmem:[%s9876_s6 + $0x3c] ss:$200 sps:$4 sm:$0xff]   ;;  %v1202_v9 = vunpack.c.h.s8.bf16 %v944_v61  ;;  %v937_v12 = vld [vmem:[%s9875_s22 + $0x190] sm:$0xff] }
  0x80   : > { %2259 = vmatprep.mubr.bf16.mxu1 %v7783_v13  ;;  %v945_v13 = vld [vmem:[%s9875_s22 + $0x1d0] sm:$0xff] }
  0x81   : > { %6702 = vmatpush3.bf16.msra.mxu0 %v1154_v14  ;;  %v1187_v14 = vunpack.c.l.s8.bf16 %v937_v12 }
  0x82   : > { %6730 = vmatpush3.bf16.msra.mxu1 %v1170_v15  ;;  %6703 = vmatprep.subr.bf16.mxu0 %v1163_v16  ;;  %v1203_v15 = vunpack.c.l.s8.bf16 %v945_v13  ;;  %v1196_v16 = vunpack.c.h.s8.bf16 %v941_v4 }
  0x83   : > { %6731 = vmatprep.subr.bf16.mxu1 %v1179_v17  ;;  %v1212_v17 = vunpack.c.h.s8.bf16 %v949_v5 }
  0x85   : > { %6704 = vmatpush3.bf16.msra.mxu0 %v1155_v20  ;;  %v1188_v20 = vunpack.c.h.s8.bf16 %v937_v12  ;;  %v958_v12 = vld [vmem:[%s9875_s22 + $0x238] sm:$0xff] }
  0x86   : > { %6732 = vmatpush3.bf16.msra.mxu1 %v1171_v21  ;;  %6705 = vmatprep.subr.bf16.mxu0 %v1164_v22  ;;  %v1204_v21 = vunpack.c.h.s8.bf16 %v945_v13  ;;  %v1197_v22 = vunpack.c.l.s8.bf16 %v942_v18  ;;  %v966_v13 = vld [vmem:[%s9875_s22 + $0x278] sm:$0xff] }
  0x87   : > { %6733 = vmatprep.subr.bf16.mxu1 %v1180_v23  ;;  %v1213_v23 = vunpack.c.l.s8.bf16 %v950_v19 }
  0x89   : > { %6706 = vmatpush3.bf16.msra.mxu0 %v1156_v26  ;;  %v1189_v26 = vunpack.c.l.s8.bf16 %v938_v24 }
  0x8a   : > { %6734 = vmatpush3.bf16.msra.mxu1 %v1172_v27  ;;  %6707 = vmatprep.subr.bf16.mxu0 %v1165_v28  ;;  %v1205_v27 = vunpack.c.l.s8.bf16 %v946_v25  ;;  %v1198_v28 = vunpack.c.h.s8.bf16 %v942_v18  ;;  %v954_v18 = vld [vmem:[%s9875_s22 + $0x218] sm:$0xff] }
  0x8b   : > { %6735 = vmatprep.subr.bf16.mxu1 %v1181_v29  ;;  %v1214_v29 = vunpack.c.h.s8.bf16 %v950_v19  ;;  %v962_v19 = vld [vmem:[%s9875_s22 + $0x258] sm:$0xff] }
  0x8d   : > { %6708 = vmatpush3.bf16.msra.mxu0 %v1157_v32  ;;  %v1190_v32 = vunpack.c.h.s8.bf16 %v938_v24  ;;  %v971_v24 = vld [vmem:[%s9875_s22 + $0x2a0] sm:$0xff] }
  0x8e   : > { %6736 = vmatpush3.bf16.msra.mxu1 %v1173_v33  ;;  %6709 = vmatprep.subr.bf16.mxu0 %v1166_v34  ;;  %v1206_v33 = vunpack.c.h.s8.bf16 %v946_v25  ;;  %v1223_v34 = vunpack.c.l.s8.bf16 %v955_v30  ;;  %v979_v25 = vld [vmem:[%s9875_s22 + $0x2e0] sm:$0xff] }
  0x8f   : > { %6737 = vmatprep.subr.bf16.mxu1 %v1182_v35  ;;  %v1239_v35 = vunpack.c.l.s8.bf16 %v963_v31 }
  0x91   : > { %6710 = vmatpush3.bf16.msra.mxu0 %v1158_v38  ;;  %v7788_v38 = vld [vmem:[%s9876_s6 + $0x30] ss:$200 sps:$4 sm:$0xff]  }
  0x92   : > { %6738 = vmatpush3.bf16.msra.mxu1 %v1174_v39  ;;  %6751 = vmatprep.subr.bf16.mxu0 %v1191_v40  ;;  %v7791_v39 = vld [vmem:[%s9876_s6 + $0x38] ss:$200 sps:$4 sm:$0xff]  }
  0x93   : > { %6779 = vmatprep.subr.bf16.mxu1 %v1207_v41  ;;  %v1543_v40 = vld [vmem:[%s9876_s6 + $0x1c0] sm:$0xff]  ;;  %v1544_v41 = vld [vmem:[%s9876_s6 + $0x1c8] sm:$0xff] }
  0x94   : > { %2212 = vmatmul.mubr.bf16.vlgmr.msra.gmra.mrb[16].mxu0 %v7778_v44  ;;  %v1224_v44 = vunpack.c.h.s8.bf16 %v955_v30  ;;  %v6475_v46 = vcombine.high %v1543_v40, %v1543_v40  ;;  %v967_v30 = vld [vmem:[%s9875_s22 + $0x280] sm:$0xff] }
  0x95   : > { %2260 = vmatmul.mubr.bf16.vlgmr.msra.gmra.mrb[16].mxu1 %v7781_v45  ;;  %6752 = vmatpush3.bf16.msra.mxu0 %v1183_v48  ;;  %v1240_v45 = vunpack.c.h.s8.bf16 %v963_v31  ;;  %v964_v48 = vld [vmem:[%s9875_s22 + $0x268] sm:$0xff]  ;;  %v975_v31 = vld [vmem:[%s9875_s22 + $0x2c0] sm:$0xff] }
  0x96   : > { %6780 = vmatpush3.bf16.msra.mxu1 %v1199_v49  ;;  %6753 = vmatprep.subr.bf16.mxu0 %v1192_v50  ;;  %v6477_v49 = vcombine.high %v1544_v41, %v1544_v41  ;;  %v1216_v50 = vunpack.c.h.s8.bf16 %v951_v36  ;;  %v1241_v53 = vunpack.c.l.s8.bf16 %v964_v48  ;;  %v1242_v61 = vunpack.c.h.s8.bf16 %v964_v48  ;;  %v968_v48 = vld [vmem:[%s9875_s22 + $0x288] sm:$0xff] }
  0x97   : > { %6781 = vmatprep.subr.bf16.mxu1 %v1208_v51  ;;  %2219 = vmatprep.mubr.bf16.mxu0 %v6471_v52  ;;  %v1232_v51 = vunpack.c.h.s8.bf16 %v959_v37  ;;  %v1225_v52 = vunpack.c.l.s8.bf16 %v956_v47  ;;  %v1247_v36 = vunpack.c.l.s8.bf16 %v967_v30  ;;  %v1263_v37 = vunpack.c.l.s8.bf16 %v975_v31 }
  0x98   : > { %2267 = vmatprep.mubr.bf16.mxu1 %v6473_v55  ;;  %v960_v55 = vld [vmem:[%s9875_s22 + $0x248] sm:$0xff] }
  0x99   : > { %6754 = vmatpush3.bf16.msra.mxu0 %v1184_v56  ;;  %v6474_v56 = vcombine.low %v1543_v40, %v1543_v40 }
  0x9a   : > { %6782 = vmatpush3.bf16.msra.mxu1 %v1200_v57  ;;  %6755 = vmatprep.subr.bf16.mxu0 %v1193_v58  ;;  %v6476_v57 = vcombine.low %v1544_v41, %v1544_v41  ;;  %v1217_v58 = vunpack.c.l.s8.bf16 %v952_v54  ;;  %v972_v41 = vld [vmem:[%s9875_s22 + $0x2a8] sm:$0xff] }
  0x9b   : > { %6783 = vmatprep.subr.bf16.mxu1 %v1209_v59  ;;  %v1233_v59 = vunpack.c.l.s8.bf16 %v960_v55 }
  0x9c   : > { %2220 = vmatmul.mubr.bf16.gmra.mrb[20].mxu0 %v6470_v62  ;;  %v957_v62 = vld [vmem:[%s9875_s22 + $0x230] sm:$0xff] }
  0x9d   : > { %2268 = vmatmul.mubr.bf16.gmra.mrb[20].mxu1 %v6472_v63  ;;  %6756 = vmatpush3.bf16.msra.mxu0 %v1185_v0  ;;  %v965_v63 = vld [vmem:[%s9875_s22 + $0x270] sm:$0xff]  ;;  %v7800_v0 = vld [vmem:[%s9876_s6 + $0x44] ss:$200 sps:$4 sm:$0xff]   ;;  %v1227_v4 = vunpack.c.l.s8.bf16 %v957_v62 }
  0x9e   : > { %6784 = vmatpush3.bf16.msra.mxu1 %v1201_v1  ;;  %6757 = vmatprep.subr.bf16.mxu0 %v1194_v2  ;;  %v7803_v1 = vld [vmem:[%s9876_s6 + $0x4c] ss:$200 sps:$4 sm:$0xff]   ;;  %v1218_v2 = vunpack.c.h.s8.bf16 %v952_v54  ;;  %v1243_v5 = vunpack.c.l.s8.bf16 %v965_v63  ;;  %v1258_v54 = vunpack.c.h.s8.bf16 %v972_v41 }
  0x9f   : > { %6785 = vmatprep.subr.bf16.mxu1 %v1210_v3  ;;  %2307 = vmatprep.mubr.bf16.mxu0 %v7790_v6  ;;  %v1234_v3 = vunpack.c.h.s8.bf16 %v960_v55  ;;  %v953_v6 = vld [vmem:[%s9875_s22 + $0x210] sm:$0xff] }
  0xa0   : > { %2355 = vmatprep.mubr.bf16.mxu1 %v7793_v7  ;;  %v961_v7 = vld [vmem:[%s9875_s22 + $0x250] sm:$0xff] }
  0xa1   : > { %6758 = vmatpush3.bf16.msra.mxu0 %v1186_v8  ;;  %v1219_v8 = vunpack.c.l.s8.bf16 %v953_v6 }
  0xa2   : > { %6786 = vmatpush3.bf16.msra.mxu1 %v1202_v9  ;;  %6759 = vmatprep.subr.bf16.mxu0 %v1195_v10  ;;  %v1235_v9 = vunpack.c.l.s8.bf16 %v961_v7  ;;  %v1228_v10 = vunpack.c.h.s8.bf16 %v957_v62 }
  0xa3   : > { %6787 = vmatprep.subr.bf16.mxu1 %v1211_v11  ;;  %v1244_v11 = vunpack.c.h.s8.bf16 %v965_v63 }
  0xa5   : > { %6760 = vmatpush3.bf16.msra.mxu0 %v1187_v14  ;;  %v1220_v14 = vunpack.c.h.s8.bf16 %v953_v6  ;;  %v974_v6 = vld [vmem:[%s9875_s22 + $0x2b8] sm:$0xff] }
  0xa6   : > { %6788 = vmatpush3.bf16.msra.mxu1 %v1203_v15  ;;  %6761 = vmatprep.subr.bf16.mxu0 %v1196_v16  ;;  %v1236_v15 = vunpack.c.h.s8.bf16 %v961_v7  ;;  %v1229_v16 = vunpack.c.l.s8.bf16 %v958_v12  ;;  %v982_v7 = vld [vmem:[%s9875_s22 + $0x2f8] sm:$0xff] }
  0xa7   : > { %6789 = vmatprep.subr.bf16.mxu1 %v1212_v17  ;;  %v1245_v17 = vunpack.c.l.s8.bf16 %v966_v13 }
  0xa9   : > { %6762 = vmatpush3.bf16.msra.mxu0 %v1188_v20  ;;  %v1221_v20 = vunpack.c.l.s8.bf16 %v954_v18 }
  0xaa   : > { %6790 = vmatpush3.bf16.msra.mxu1 %v1204_v21  ;;  %6763 = vmatprep.subr.bf16.mxu0 %v1197_v22  ;;  %v1237_v21 = vunpack.c.l.s8.bf16 %v962_v19  ;;  %v1230_v22 = vunpack.c.h.s8.bf16 %v958_v12  ;;  %v970_v12 = vld [vmem:[%s9875_s22 + $0x298] sm:$0xff] }
  0xab   : > { %6791 = vmatprep.subr.bf16.mxu1 %v1213_v23  ;;  %v1246_v23 = vunpack.c.h.s8.bf16 %v966_v13  ;;  %v978_v13 = vld [vmem:[%s9875_s22 + $0x2d8] sm:$0xff] }
  0xad   : > { %6764 = vmatpush3.bf16.msra.mxu0 %v1189_v26  ;;  %v1222_v26 = vunpack.c.h.s8.bf16 %v954_v18  ;;  %v987_v18 = vld [vmem:[%s9875_s22 + $0x320] sm:$0xff] }
  0xae   : > { %6792 = vmatpush3.bf16.msra.mxu1 %v1205_v27  ;;  %6765 = vmatprep.subr.bf16.mxu0 %v1198_v28  ;;  %v1238_v27 = vunpack.c.h.s8.bf16 %v962_v19  ;;  %v1255_v28 = vunpack.c.l.s8.bf16 %v971_v24  ;;  %v995_v19 = vld [vmem:[%s9875_s22 + $0x360] sm:$0xff] }
  0xaf   : > { %6793 = vmatprep.subr.bf16.mxu1 %v1214_v29  ;;  %v1271_v29 = vunpack.c.l.s8.bf16 %v979_v25 }
  0xb1   : > { %6766 = vmatpush3.bf16.msra.mxu0 %v1190_v32  ;;  %v7798_v32 = vld [vmem:[%s9876_s6 + $0x40] ss:$200 sps:$4 sm:$0xff]  }
  0xb2   : > { %6794 = vmatpush3.bf16.msra.mxu1 %v1206_v33  ;;  %6807 = vmatprep.subr.bf16.mxu0 %v1223_v34  ;;  %v7801_v33 = vld [vmem:[%s9876_s6 + $0x48] ss:$200 sps:$4 sm:$0xff]  }
  0xb3   : > { %6835 = vmatprep.subr.bf16.mxu1 %v1239_v35  ;;  %v1545_v34 = vld [vmem:[%s9876_s6 + $0x1d0] sm:$0xff]  ;;  %v1546_v35 = vld [vmem:[%s9876_s6 + $0x1d8] sm:$0xff] }
  0xb4   : > { %2308 = vmatmul.mubr.bf16.vlgmr.msra.gmra.mrb[24].mxu0 %v7788_v38  ;;  %v1256_v38 = vunpack.c.h.s8.bf16 %v971_v24  ;;  %v6479_v40 = vcombine.high %v1545_v34, %v1545_v34  ;;  %v983_v24 = vld [vmem:[%s9875_s22 + $0x300] sm:$0xff] }
  0xb5   : > { %2356 = vmatmul.mubr.bf16.vlgmr.msra.gmra.mrb[24].mxu1 %v7791_v39  ;;  %6808 = vmatpush3.bf16.msra.mxu0 %v1215_v42  ;;  %v1272_v39 = vunpack.c.h.s8.bf16 %v979_v25  ;;  %v980_v42 = vld [vmem:[%s9875_s22 + $0x2e8] sm:$0xff]  ;;  %v991_v25 = vld [vmem:[%s9875_s22 + $0x340] sm:$0xff] }
  0xb6   : > { %6836 = vmatpush3.bf16.msra.mxu1 %v1231_v43  ;;  %6809 = vmatprep.subr.bf16.mxu0 %v1224_v44  ;;  %v6481_v43 = vcombine.high %v1546_v35, %v1546_v35  ;;  %v1248_v44 = vunpack.c.h.s8.bf16 %v967_v30  ;;  %v1273_v47 = vunpack.c.l.s8.bf16 %v980_v42  ;;  %v1274_v55 = vunpack.c.h.s8.bf16 %v980_v42  ;;  %v984_v42 = vld [vmem:[%s9875_s22 + $0x308] sm:$0xff] }
  0xb7   : > { %6837 = vmatprep.subr.bf16.mxu1 %v1240_v45  ;;  %2315 = vmatprep.mubr.bf16.mxu0 %v6475_v46  ;;  %v1264_v45 = vunpack.c.h.s8.bf16 %v975_v31  ;;  %v1257_v46 = vunpack.c.l.s8.bf16 %v972_v41  ;;  %v1279_v30 = vunpack.c.l.s8.bf16 %v983_v24  ;;  %v1295_v31 = vunpack.c.l.s8.bf16 %v991_v25 }
  0xb8   : > { %2363 = vmatprep.mubr.bf16.mxu1 %v6477_v49  ;;  %v976_v49 = vld [vmem:[%s9875_s22 + $0x2c8] sm:$0xff] }
  0xb9   : > { %6810 = vmatpush3.bf16.msra.mxu0 %v1216_v50  ;;  %v6478_v50 = vcombine.low %v1545_v34, %v1545_v34 }
  0xba   : > { %6838 = vmatpush3.bf16.msra.mxu1 %v1232_v51  ;;  %6811 = vmatprep.subr.bf16.mxu0 %v1225_v52  ;;  %v6480_v51 = vcombine.low %v1546_v35, %v1546_v35  ;;  %v1249_v52 = vunpack.c.l.s8.bf16 %v968_v48  ;;  %v988_v35 = vld [vmem:[%s9875_s22 + $0x328] sm:$0xff] }
  0xbb   : > { %6839 = vmatprep.subr.bf16.mxu1 %v1241_v53  ;;  %v1265_v53 = vunpack.c.l.s8.bf16 %v976_v49 }
  0xbc   : > { %2316 = vmatmul.mubr.bf16.gmra.mrb[28].mxu0 %v6474_v56  ;;  %v973_v56 = vld [vmem:[%s9875_s22 + $0x2b0] sm:$0xff] }
  0xbd   : > { %2364 = vmatmul.mubr.bf16.gmra.mrb[28].mxu1 %v6476_v57  ;;  %6812 = vmatpush3.bf16.msra.mxu0 %v1217_v58  ;;  %v981_v57 = vld [vmem:[%s9875_s22 + $0x2f0] sm:$0xff]  ;;  %v1259_v62 = vunpack.c.l.s8.bf16 %v973_v56 }
  0xbe   : > { %6840 = vmatpush3.bf16.msra.mxu1 %v1233_v59  ;;  %6813 = vmatprep.subr.bf16.mxu0 %v1226_v60  ;;  %v7810_v58 = vld [vmem:[%s9876_s6 + $0x54] ss:$200 sps:$4 sm:$0xff]   ;;  %v1250_v60 = vunpack.c.h.s8.bf16 %v968_v48  ;;  %v1275_v63 = vunpack.c.l.s8.bf16 %v981_v57  ;;  %v1290_v48 = vunpack.c.h.s8.bf16 %v988_v35 }
  0xbf   : > { %6841 = vmatprep.subr.bf16.mxu1 %v1242_v61  ;;  %2403 = vmatprep.mubr.bf16.mxu0 %v7800_v0  ;;  %v7813_v59 = vld [vmem:[%s9876_s6 + $0x5c] ss:$200 sps:$4 sm:$0xff]   ;;  %v1266_v61 = vunpack.c.h.s8.bf16 %v976_v49  ;;  %v969_v0 = vld [vmem:[%s9875_s22 + $0x290] sm:$0xff] }
  0xc0   : > { %2451 = vmatprep.mubr.bf16.mxu1 %v7803_v1  ;;  %v977_v1 = vld [vmem:[%s9875_s22 + $0x2d0] sm:$0xff] }
  0xc1   : > { %6814 = vmatpush3.bf16.msra.mxu0 %v1218_v2  ;;  %v1251_v2 = vunpack.c.l.s8.bf16 %v969_v0 }
  0xc2   : > { %6842 = vmatpush3.bf16.msra.mxu1 %v1234_v3  ;;  %6815 = vmatprep.subr.bf16.mxu0 %v1227_v4  ;;  %v1267_v3 = vunpack.c.l.s8.bf16 %v977_v1  ;;  %v1260_v4 = vunpack.c.h.s8.bf16 %v973_v56 }
  0xc3   : > { %6843 = vmatprep.subr.bf16.mxu1 %v1243_v5  ;;  %v1276_v5 = vunpack.c.h.s8.bf16 %v981_v57 }
  0xc5   : > { %6816 = vmatpush3.bf16.msra.mxu0 %v1219_v8  ;;  %v1252_v8 = vunpack.c.h.s8.bf16 %v969_v0  ;;  %v990_v0 = vld [vmem:[%s9875_s22 + $0x338] sm:$0xff] }
  0xc6   : > { %6844 = vmatpush3.bf16.msra.mxu1 %v1235_v9  ;;  %6817 = vmatprep.subr.bf16.mxu0 %v1228_v10  ;;  %v1268_v9 = vunpack.c.h.s8.bf16 %v977_v1  ;;  %v1261_v10 = vunpack.c.l.s8.bf16 %v974_v6  ;;  %v998_v1 = vld [vmem:[%s9875_s22 + $0x378] sm:$0xff] }
  0xc7   : > { %6845 = vmatprep.subr.bf16.mxu1 %v1244_v11  ;;  %v1277_v11 = vunpack.c.l.s8.bf16 %v982_v7 }
  0xc9   : > { %6818 = vmatpush3.bf16.msra.mxu0 %v1220_v14  ;;  %v1253_v14 = vunpack.c.l.s8.bf16 %v970_v12 }
  0xca   : > { %6846 = vmatpush3.bf16.msra.mxu1 %v1236_v15  ;;  %6819 = vmatprep.subr.bf16.mxu0 %v1229_v16  ;;  %v1269_v15 = vunpack.c.l.s8.bf16 %v978_v13  ;;  %v1262_v16 = vunpack.c.h.s8.bf16 %v974_v6  ;;  %v986_v6 = vld [vmem:[%s9875_s22 + $0x318] sm:$0xff] }
  0xcb   : > { %6847 = vmatprep.subr.bf16.mxu1 %v1245_v17  ;;  %v1278_v17 = vunpack.c.h.s8.bf16 %v982_v7  ;;  %v994_v7 = vld [vmem:[%s9875_s22 + $0x358] sm:$0xff] }
  0xcd   : > { %6820 = vmatpush3.bf16.msra.mxu0 %v1221_v20  ;;  %v1254_v20 = vunpack.c.h.s8.bf16 %v970_v12  ;;  %v1003_v12 = vld [vmem:[%s9875_s22 + $0x3a0] sm:$0xff] }
  0xce   : > { %6848 = vmatpush3.bf16.msra.mxu1 %v1237_v21  ;;  %6821 = vmatprep.subr.bf16.mxu0 %v1230_v22  ;;  %v1270_v21 = vunpack.c.h.s8.bf16 %v978_v13  ;;  %v1287_v22 = vunpack.c.l.s8.bf16 %v987_v18  ;;  %v1011_v13 = vld [vmem:[%s9875_s22 + $0x3e0] sm:$0xff] }
  0xcf   : > { %6849 = vmatprep.subr.bf16.mxu1 %v1246_v23  ;;  %v1303_v23 = vunpack.c.l.s8.bf16 %v995_v19 }
  0xd1   : > { %6822 = vmatpush3.bf16.msra.mxu0 %v1222_v26  ;;  %v7808_v26 = vld [vmem:[%s9876_s6 + $0x50] ss:$200 sps:$4 sm:$0xff]  }
  0xd2   : > { %6850 = vmatpush3.bf16.msra.mxu1 %v1238_v27  ;;  %6863 = vmatprep.subr.bf16.mxu0 %v1255_v28  ;;  %v7811_v27 = vld [vmem:[%s9876_s6 + $0x58] ss:$200 sps:$4 sm:$0xff]  }
  0xd3   : > { %6891 = vmatprep.subr.bf16.mxu1 %v1271_v29  ;;  %v1547_v28 = vld [vmem:[%s9876_s6 + $0x1e0] sm:$0xff]  ;;  %v1548_v29 = vld [vmem:[%s9876_s6 + $0x1e8] sm:$0xff] }
  0xd4   : > { %2404 = vmatmul.mubr.bf16.vlgmr.msra.gmra.mrb[32].mxu0 %v7798_v32  ;;  %v1288_v32 = vunpack.c.h.s8.bf16 %v987_v18  ;;  %v6483_v34 = vcombine.high %v1547_v28, %v1547_v28  ;;  %v999_v18 = vld [vmem:[%s9875_s22 + $0x380] sm:$0xff] }
  0xd5   : > { %2452 = vmatmul.mubr.bf16.vlgmr.msra.gmra.mrb[32].mxu1 %v7801_v33  ;;  %6864 = vmatpush3.bf16.msra.mxu0 %v1247_v36  ;;  %v1304_v33 = vunpack.c.h.s8.bf16 %v995_v19  ;;  %v996_v36 = vld [vmem:[%s9875_s22 + $0x368] sm:$0xff]  ;;  %v1007_v19 = vld [vmem:[%s9875_s22 + $0x3c0] sm:$0xff] }
  0xd6   : > { %6892 = vmatpush3.bf16.msra.mxu1 %v1263_v37  ;;  %6865 = vmatprep.subr.bf16.mxu0 %v1256_v38  ;;  %v6485_v37 = vcombine.high %v1548_v29, %v1548_v29  ;;  %v1280_v38 = vunpack.c.h.s8.bf16 %v983_v24  ;;  %v1305_v41 = vunpack.c.l.s8.bf16 %v996_v36  ;;  %v1306_v49 = vunpack.c.h.s8.bf16 %v996_v36  ;;  %v1000_v36 = vld [vmem:[%s9875_s22 + $0x388] sm:$0xff] }
  0xd7   : > { %6893 = vmatprep.subr.bf16.mxu1 %v1272_v39  ;;  %2411 = vmatprep.mubr.bf16.mxu0 %v6479_v40  ;;  %v1296_v39 = vunpack.c.h.s8.bf16 %v991_v25  ;;  %v1289_v40 = vunpack.c.l.s8.bf16 %v988_v35  ;;  %v1311_v24 = vunpack.c.l.s8.bf16 %v999_v18  ;;  %v1327_v25 = vunpack.c.l.s8.bf16 %v1007_v19 }
  0xd8   : > { %2459 = vmatprep.mubr.bf16.mxu1 %v6481_v43  ;;  %v992_v43 = vld [vmem:[%s9875_s22 + $0x348] sm:$0xff] }
  0xd9   : > { %6866 = vmatpush3.bf16.msra.mxu0 %v1248_v44  ;;  %v6482_v44 = vcombine.low %v1547_v28, %v1547_v28 }
  0xda   : > { %6894 = vmatpush3.bf16.msra.mxu1 %v1264_v45  ;;  %6867 = vmatprep.subr.bf16.mxu0 %v1257_v46  ;;  %v6484_v45 = vcombine.low %v1548_v29, %v1548_v29  ;;  %v1281_v46 = vunpack.c.l.s8.bf16 %v984_v42  ;;  %v1004_v29 = vld [vmem:[%s9875_s22 + $0x3a8] sm:$0xff] }
  0xdb   : > { %6895 = vmatprep.subr.bf16.mxu1 %v1273_v47  ;;  %v1297_v47 = vunpack.c.l.s8.bf16 %v992_v43 }
  0xdc   : > { %2412 = vmatmul.mubr.bf16.gmra.mrb[36].mxu0 %v6478_v50  ;;  %v989_v50 = vld [vmem:[%s9875_s22 + $0x330] sm:$0xff] }
  0xdd   : > { %2460 = vmatmul.mubr.bf16.gmra.mrb[36].mxu1 %v6480_v51  ;;  %6868 = vmatpush3.bf16.msra.mxu0 %v1249_v52  ;;  %v997_v51 = vld [vmem:[%s9875_s22 + $0x370] sm:$0xff]  ;;  %v7820_v52 = vld [vmem:[%s9876_s6 + $0x64] ss:$200 sps:$4 sm:$0xff]   ;;  %v1291_v56 = vunpack.c.l.s8.bf16 %v989_v50 }
  0xde   : > { %6896 = vmatpush3.bf16.msra.mxu1 %v1265_v53  ;;  %6869 = vmatprep.subr.bf16.mxu0 %v1258_v54  ;;  %v7823_v53 = vld [vmem:[%s9876_s6 + $0x6c] ss:$200 sps:$4 sm:$0xff]   ;;  %v1282_v54 = vunpack.c.h.s8.bf16 %v984_v42  ;;  %v1307_v57 = vunpack.c.l.s8.bf16 %v997_v51  ;;  %v1322_v42 = vunpack.c.h.s8.bf16 %v1004_v29 }
  0xdf   : > { %6897 = vmatprep.subr.bf16.mxu1 %v1274_v55  ;;  %2499 = vmatprep.mubr.bf16.mxu0 %v7810_v58  ;;  %v1298_v55 = vunpack.c.h.s8.bf16 %v992_v43  ;;  %v985_v58 = vld [vmem:[%s9875_s22 + $0x310] sm:$0xff] }
  0xe0   : > { %2547 = vmatprep.mubr.bf16.mxu1 %v7813_v59  ;;  %v993_v59 = vld [vmem:[%s9875_s22 + $0x350] sm:$0xff] }
  0xe1   : > { %6870 = vmatpush3.bf16.msra.mxu0 %v1250_v60  ;;  %v1283_v60 = vunpack.c.l.s8.bf16 %v985_v58 }
  0xe2   : > { %6898 = vmatpush3.bf16.msra.mxu1 %v1266_v61  ;;  %6871 = vmatprep.subr.bf16.mxu0 %v1259_v62  ;;  %v1299_v61 = vunpack.c.l.s8.bf16 %v993_v59  ;;  %v1292_v62 = vunpack.c.h.s8.bf16 %v989_v50 }
  0xe3   : > { %6899 = vmatprep.subr.bf16.mxu1 %v1275_v63  ;;  %v1308_v63 = vunpack.c.h.s8.bf16 %v997_v51 }
  0xe5   : > { %6872 = vmatpush3.bf16.msra.mxu0 %v1251_v2  ;;  %v1284_v2 = vunpack.c.h.s8.bf16 %v985_v58  ;;  %v1006_v58 = vld [vmem:[%s9875_s22 + $0x3b8] sm:$0xff] }
  0xe6   : > { %6900 = vmatpush3.bf16.msra.mxu1 %v1267_v3  ;;  %6873 = vmatprep.subr.bf16.mxu0 %v1260_v4  ;;  %v1300_v3 = vunpack.c.h.s8.bf16 %v993_v59  ;;  %v1293_v4 = vunpack.c.l.s8.bf16 %v990_v0  ;;  %v1014_v59 = vld [vmem:[%s9875_s22 + $0x3f8] sm:$0xff] }
  0xe7   : > { %6901 = vmatprep.subr.bf16.mxu1 %v1276_v5  ;;  %v1309_v5 = vunpack.c.l.s8.bf16 %v998_v1 }
  0xe9   : > { %6874 = vmatpush3.bf16.msra.mxu0 %v1252_v8  ;;  %v1285_v8 = vunpack.c.l.s8.bf16 %v986_v6 }
  0xea   : > { %6902 = vmatpush3.bf16.msra.mxu1 %v1268_v9  ;;  %6875 = vmatprep.subr.bf16.mxu0 %v1261_v10  ;;  %v1301_v9 = vunpack.c.l.s8.bf16 %v994_v7  ;;  %v1294_v10 = vunpack.c.h.s8.bf16 %v990_v0  ;;  %v1002_v0 = vld [vmem:[%s9875_s22 + $0x398] sm:$0xff] }
  0xeb   : > { %6903 = vmatprep.subr.bf16.mxu1 %v1277_v11  ;;  %v1310_v11 = vunpack.c.h.s8.bf16 %v998_v1  ;;  %v1010_v1 = vld [vmem:[%s9875_s22 + $0x3d8] sm:$0xff] }
  0xed   : > { %6876 = vmatpush3.bf16.msra.mxu0 %v1253_v14  ;;  %v1286_v14 = vunpack.c.h.s8.bf16 %v986_v6 }
  0xee   : > { %6904 = vmatpush3.bf16.msra.mxu1 %v1269_v15  ;;  %6877 = vmatprep.subr.bf16.mxu0 %v1262_v16  ;;  %v1302_v15 = vunpack.c.h.s8.bf16 %v994_v7  ;;  %v1319_v16 = vunpack.c.l.s8.bf16 %v1003_v12 }
  0xef   : > { %6905 = vmatprep.subr.bf16.mxu1 %v1278_v17  ;;  %v1335_v17 = vunpack.c.l.s8.bf16 %v1011_v13 }
  0xf1   : > { %6878 = vmatpush3.bf16.msra.mxu0 %v1254_v20  ;;  %v7818_v20 = vld [vmem:[%s9876_s6 + $0x60] ss:$200 sps:$4 sm:$0xff]  }
  0xf2   : > { %6906 = vmatpush3.bf16.msra.mxu1 %v1270_v21  ;;  %6919 = vmatprep.subr.bf16.mxu0 %v1287_v22  ;;  %v7821_v21 = vld [vmem:[%s9876_s6 + $0x68] ss:$200 sps:$4 sm:$0xff]  }
  0xf3   : > { %6947 = vmatprep.subr.bf16.mxu1 %v1303_v23  ;;  %v1549_v22 = vld [vmem:[%s9876_s6 + $0x1f0] sm:$0xff]  ;;  %v1550_v23 = vld [vmem:[%s9876_s6 + $0x1f8] sm:$0xff] }
  0xf4   : > { %2500 = vmatmul.mubr.bf16.vlgmr.msra.gmra.mrb[40].mxu0 %v7808_v26  ;;  %v1320_v26 = vunpack.c.h.s8.bf16 %v1003_v12  ;;  %v6487_v28 = vcombine.high %v1549_v22, %v1549_v22 }
  0xf5   : > { %2548 = vmatmul.mubr.bf16.vlgmr.msra.gmra.mrb[40].mxu1 %v7811_v27  ;;  %6920 = vmatpush3.bf16.msra.mxu0 %v1279_v30  ;;  %v1336_v27 = vunpack.c.h.s8.bf16 %v1011_v13  ;;  %v1012_v30 = vld [vmem:[%s9875_s22 + $0x3e8] sm:$0xff] }
  0xf6   : > { %6948 = vmatpush3.bf16.msra.mxu1 %v1295_v31  ;;  %6921 = vmatprep.subr.bf16.mxu0 %v1288_v32  ;;  %v6489_v31 = vcombine.high %v1550_v23, %v1550_v23  ;;  %v1312_v32 = vunpack.c.h.s8.bf16 %v999_v18  ;;  %v1337_v35 = vunpack.c.l.s8.bf16 %v1012_v30  ;;  %v1338_v43 = vunpack.c.h.s8.bf16 %v1012_v30 }
  0xf7   : > { %6949 = vmatprep.subr.bf16.mxu1 %v1304_v33  ;;  %2507 = vmatprep.mubr.bf16.mxu0 %v6483_v34  ;;  %v1328_v33 = vunpack.c.h.s8.bf16 %v1007_v19  ;;  %v1321_v34 = vunpack.c.l.s8.bf16 %v1004_v29  ;;  %v1019_v19 = vld [vmem:[%s9875_s22 + $0x420] sm:$0xff] }
  0xf8   : > { %2555 = vmatprep.mubr.bf16.mxu1 %v6485_v37  ;;  %v1008_v37 = vld [vmem:[%s9875_s22 + $0x3c8] sm:$0xff] }
  0xf9   : > { %6922 = vmatpush3.bf16.msra.mxu0 %v1280_v38  ;;  %v6486_v38 = vcombine.low %v1549_v22, %v1549_v22  ;;  %v1318_v22 = vunpack.c.h.s8.bf16 %v1002_v0 }
  0xfa   : > { %6950 = vmatpush3.bf16.msra.mxu1 %v1296_v39  ;;  %6923 = vmatprep.subr.bf16.mxu0 %v1289_v40  ;;  %v6488_v39 = vcombine.low %v1550_v23, %v1550_v23  ;;  %v1313_v40 = vunpack.c.l.s8.bf16 %v1000_v36  ;;  %v1334_v23 = vunpack.c.h.s8.bf16 %v1010_v1 }
  0xfb   : > { %6951 = vmatprep.subr.bf16.mxu1 %v1305_v41  ;;  %v1329_v41 = vunpack.c.l.s8.bf16 %v1008_v37 }
  0xfc   : > { %2508 = vmatmul.mubr.bf16.gmra.mrb[44].mxu0 %v6482_v44  ;;  %v1005_v44 = vld [vmem:[%s9875_s22 + $0x3b0] sm:$0xff] }
  0xfd   : > { %2556 = vmatmul.mubr.bf16.gmra.mrb[44].mxu1 %v6484_v45  ;;  %6924 = vmatpush3.bf16.msra.mxu0 %v1281_v46  ;;  %v1013_v45 = vld [vmem:[%s9875_s22 + $0x3f0] sm:$0xff]  ;;  %v1323_v50 = vunpack.c.l.s8.bf16 %v1005_v44 }
  0xfe   : > { %6952 = vmatpush3.bf16.msra.mxu1 %v1297_v47  ;;  %6925 = vmatprep.subr.bf16.mxu0 %v1290_v48  ;;  %v7830_v46 = vld [vmem:[%s9876_s6 + $0x74] ss:$200 sps:$4 sm:$0xff]   ;;  %v1314_v48 = vunpack.c.h.s8.bf16 %v1000_v36  ;;  %v1339_v51 = vunpack.c.l.s8.bf16 %v1013_v45 }
  0xff   : > { %6953 = vmatprep.subr.bf16.mxu1 %v1306_v49  ;;  %2595 = vmatprep.mubr.bf16.mxu0 %v7820_v52  ;;  %v7833_v47 = vld [vmem:[%s9876_s6 + $0x7c] ss:$200 sps:$4 sm:$0xff]   ;;  %v1330_v49 = vunpack.c.h.s8.bf16 %v1008_v37  ;;  %v1001_v52 = vld [vmem:[%s9875_s22 + $0x390] sm:$0xff] }
 0x100   : > { %2643 = vmatprep.mubr.bf16.mxu1 %v7823_v53  ;;  %v1009_v53 = vld [vmem:[%s9875_s22 + $0x3d0] sm:$0xff] }
 0x101   : > { %6926 = vmatpush3.bf16.msra.mxu0 %v1282_v54  ;;  %v1315_v54 = vunpack.c.l.s8.bf16 %v1001_v52 }
 0x102   : > { %6954 = vmatpush3.bf16.msra.mxu1 %v1298_v55  ;;  %6927 = vmatprep.subr.bf16.mxu0 %v1291_v56  ;;  %v1331_v55 = vunpack.c.l.s8.bf16 %v1009_v53  ;;  %v1324_v56 = vunpack.c.h.s8.bf16 %v1005_v44 }
 0x103   : > { %6955 = vmatprep.subr.bf16.mxu1 %v1307_v57  ;;  %v1340_v57 = vunpack.c.h.s8.bf16 %v1013_v45 }
 0x105   : > { %6928 = vmatpush3.bf16.msra.mxu0 %v1283_v60  ;;  %v1316_v60 = vunpack.c.h.s8.bf16 %v1001_v52 }
 0x106   : > { %6956 = vmatpush3.bf16.msra.mxu1 %v1299_v61  ;;  %6929 = vmatprep.subr.bf16.mxu0 %v1292_v62  ;;  %v1332_v61 = vunpack.c.h.s8.bf16 %v1009_v53  ;;  %v1325_v62 = vunpack.c.l.s8.bf16 %v1006_v58 }
 0x107   : > { %6957 = vmatprep.subr.bf16.mxu1 %v1308_v63  ;;  %v1341_v63 = vunpack.c.l.s8.bf16 %v1014_v59 }
 0x109   : > { %6930 = vmatpush3.bf16.msra.mxu0 %v1284_v2 }
 0x10a   : > { %6958 = vmatpush3.bf16.msra.mxu1 %v1300_v3  ;;  %6931 = vmatprep.subr.bf16.mxu0 %v1293_v4 }
 0x10b   : > { %6959 = vmatprep.subr.bf16.mxu1 %v1309_v5 }
 0x10d   : > { %6932 = vmatpush3.bf16.msra.mxu0 %v1285_v8 }
 0x10e   : > { %6960 = vmatpush3.bf16.msra.mxu1 %v1301_v9  ;;  %6933 = vmatprep.subr.bf16.mxu0 %v1294_v10  ;;  %v1317_v10 = vunpack.c.l.s8.bf16 %v1002_v0  ;;  %v1029_v0 = vld [vmem:[%s9875_s22 + $0x470] sm:$0xff] }
 0x10f   : > { %6961 = vmatprep.subr.bf16.mxu1 %v1310_v11  ;;  %v1333_v11 = vunpack.c.l.s8.bf16 %v1010_v1  ;;  %v7840_v1 = vld [vmem:[%s9876_s6 + $0x84] ss:$200 sps:$4 sm:$0xff]  }
 0x111   : > { %6934 = vmatpush3.bf16.msra.mxu0 %v1286_v14  ;;  %v1326_v14 = vunpack.c.h.s8.bf16 %v1006_v58 }
 0x112   : > { %6962 = vmatpush3.bf16.msra.mxu1 %v1302_v15  ;;  %6975 = vmatprep.subr.bf16.mxu0 %v1319_v16  ;;  %v1342_v15 = vunpack.c.h.s8.bf16 %v1014_v59 }
 0x113   : > { %7003 = vmatprep.subr.bf16.mxu1 %v1335_v17 }
 0x114   : > { %2596 = vmatmul.mubr.bf16.vlgmr.msra.gmra.mrb[48].mxu0 %v7818_v20  ;;  %v1027_v20 = vld [vmem:[%s9875_s22 + $0x460] sm:$0xff] }
 0x115   : > { %2644 = vmatmul.mubr.bf16.vlgmr.msra.gmra.mrb[48].mxu1 %v7821_v21  ;;  %6976 = vmatpush3.bf16.msra.mxu0 %v1311_v24  ;;  %v1351_v24 = vunpack.c.l.s8.bf16 %v1019_v19 }
 0x116   : > { %7004 = vmatpush3.bf16.msra.mxu1 %v1327_v25  ;;  %6977 = vmatprep.subr.bf16.mxu0 %v1320_v26  ;;  %v1367_v25 = vunpack.c.l.s8.bf16 %v1027_v20  ;;  %v1015_v26 = vld [vmem:[%s9875_s22 + $0x400] sm:$0xff] }
 0x117   : > { %7005 = vmatprep.subr.bf16.mxu1 %v1336_v27  ;;  %2603 = vmatprep.mubr.bf16.mxu0 %v6487_v28  ;;  %v1023_v27 = vld [vmem:[%s9875_s22 + $0x440] sm:$0xff]  ;;  %v7828_v28 = vld [vmem:[%s9876_s6 + $0x70] ss:$200 sps:$4 sm:$0xff]   ;;  %v1343_v36 = vunpack.c.l.s8.bf16 %v1015_v26 }
 0x118   : > { %2651 = vmatprep.mubr.bf16.mxu1 %v6489_v31  ;;  %v7831_v31 = vld [vmem:[%s9876_s6 + $0x78] ss:$200 sps:$4 sm:$0xff]   ;;  %v1359_v37 = vunpack.c.l.s8.bf16 %v1023_v27  ;;  %v1360_v52 = vunpack.c.h.s8.bf16 %v1023_v27 }
 0x119   : > { %6978 = vmatpush3.bf16.msra.mxu0 %v1312_v32  ;;  %v1551_v32 = vld [vmem:[%s9876_s6 + $0x200] sm:$0xff] }
 0x11a   : > { %7006 = vmatpush3.bf16.msra.mxu1 %v1328_v33  ;;  %6979 = vmatprep.subr.bf16.mxu0 %v1321_v34  ;;  %v1552_v33 = vld [vmem:[%s9876_s6 + $0x208] sm:$0xff] }
 0x11b   : > { %7007 = vmatprep.subr.bf16.mxu1 %v1337_v35  ;;  %v6492_v58 = vcombine.low %v1552_v33, %v1552_v33 }
 0x11c   : > { %2604 = vmatmul.mubr.bf16.gmra.mrb[52].mxu0 %v6486_v38 }
 0x11d   : > { %2652 = vmatmul.mubr.bf16.gmra.mrb[52].mxu1 %v6488_v39  ;;  %6980 = vmatpush3.bf16.msra.mxu0 %v1313_v40 }
 0x11e   : > { %7008 = vmatpush3.bf16.msra.mxu1 %v1329_v41  ;;  %6981 = vmatprep.subr.bf16.mxu0 %v1322_v42  ;;  %v1352_v42 = vunpack.c.h.s8.bf16 %v1019_v19 }
 0x11f   : > { %7009 = vmatprep.subr.bf16.mxu1 %v1338_v43  ;;  %2691 = vmatprep.mubr.bf16.mxu0 %v7830_v46  ;;  %v1368_v43 = vunpack.c.h.s8.bf16 %v1027_v20  ;;  %v6491_v46 = vcombine.high %v1551_v32, %v1551_v32  ;;  %v1018_v20 = vld [vmem:[%s9875_s22 + $0x418] sm:$0xff] }
 0x120   : > { %2739 = vmatprep.mubr.bf16.mxu1 %v7833_v47  ;;  %v1020_v47 = vld [vmem:[%s9875_s22 + $0x428] sm:$0xff] }
 0x121   : > { %6982 = vmatpush3.bf16.msra.mxu0 %v1314_v48  ;;  %v1028_v48 = vld [vmem:[%s9875_s22 + $0x468] sm:$0xff]  ;;  %v1353_v53 = vunpack.c.l.s8.bf16 %v1020_v47 }
 0x122   : > { %7010 = vmatpush3.bf16.msra.mxu1 %v1330_v49  ;;  %6983 = vmatprep.subr.bf16.mxu0 %v1323_v50  ;;  %v6493_v49 = vcombine.high %v1552_v33, %v1552_v33 }
 0x123   : > { %7011 = vmatprep.subr.bf16.mxu1 %v1339_v51  ;;  %v1344_v51 = vunpack.c.h.s8.bf16 %v1015_v26 }
 0x125   : > { %6984 = vmatpush3.bf16.msra.mxu0 %v1315_v54  ;;  %v1369_v54 = vunpack.c.l.s8.bf16 %v1028_v48 }
 0x126   : > { %7012 = vmatpush3.bf16.msra.mxu1 %v1331_v55  ;;  %6985 = vmatprep.subr.bf16.mxu0 %v1324_v56  ;;  %v1016_v55 = vld [vmem:[%s9875_s22 + $0x408] sm:$0xff] }
 0x127   : > { %7013 = vmatprep.subr.bf16.mxu1 %v1340_v57  ;;  %v6599_v2 = vpop.f32.mrb[0].mxu0  ;;  %v1024_v56 = vld [vmem:[%s9875_s22 + $0x448] sm:$0xff]  ;;  %v6490_v57 = vcombine.low %v1551_v32, %v1551_v32  ;;  %v1345_v59 = vunpack.c.l.s8.bf16 %v1016_v55 }
 0x128   : > { %v6627_v3 = vpop.f32.mrb[0].mxu1  ;;  %v6600_v4 = vpop.f32.mrb[1].mxu0 }
 0x129   : > { %v6628_v5 = vpop.f32.mrb[1].mxu1  ;;  %v6601_v6 = vadd.f32 %v6600_v4, %v6599_v2  ;;  %v6602_v8 = vpop.f32.mrb[2].mxu0  ;;  %6986 = vmatpush3.bf16.msra.mxu0 %v1316_v60  ;;  %v1361_v60 = vunpack.c.l.s8.bf16 %v1024_v56  ;;  %v7843_v2 = vld [vmem:[%s9876_s6 + $0x8c] ss:$200 sps:$4 sm:$0xff]   ;;  %v1362_v4 = vunpack.c.h.s8.bf16 %v1024_v56 }
 0x12a   : > { %v6629_v7 = vadd.f32 %v6628_v5, %v6627_v3  ;;  %v6630_v9 = vpop.f32.mrb[2].mxu1  ;;  %7014 = vmatpush3.bf16.msra.mxu1 %v1332_v61  ;;  %v6603_v12 = vpop.f32.mrb[3].mxu0  ;;  %6987 = vmatprep.subr.bf16.mxu0 %v1325_v62  ;;  %v1354_v61 = vunpack.c.h.s8.bf16 %v1020_v47  ;;  %v1370_v62 = vunpack.c.h.s8.bf16 %v1028_v48  ;;  %v1346_v3 = vunpack.c.h.s8.bf16 %v1016_v55  ;;  %v1031_v47 = vld [vmem:[%s9875_s22 + $0x480] sm:$0xff]  ;;  %v7841_v55 = vld [vmem:[%s9876_s6 + $0x88] ss:$200 sps:$4 sm:$0xff]  }
 0x12b   : > { %v6631_v13 = vpop.f32.mrb[3].mxu1  ;;  %7015 = vmatprep.subr.bf16.mxu1 %v1341_v63  ;;  %v6604_v17 = vadd.f32 %v6603_v12, %v6602_v8  ;;  %v1021_v63 = vld [vmem:[%s9875_s22 + $0x430] sm:$0xff]  ;;  %v1372_v12 = vunpack.c.h.s8.bf16 %v1029_v0  ;;  %v1039_v48 = vld [vmem:[%s9875_s22 + $0x4c0] sm:$0xff] }
 0x12c   : > { %v8704_v16 = vadd.f32 %v6629_v7, %v6601_v6  ;;  %v6632_v18 = vadd.f32 %v6631_v13, %v6630_v9  ;;  %v1355_v5 = vunpack.c.l.s8.bf16 %v1021_v63  ;;  %v1371_v6 = vunpack.c.l.s8.bf16 %v1029_v0  ;;  %v1017_v7 = vld [vmem:[%s9875_s22 + $0x410] sm:$0xff]  ;;  %v1022_v13 = vld [vmem:[%s9875_s22 + $0x438] sm:$0xff] }
 0x12d   : > { %6988 = vmatpush3.bf16.msra.mxu0 %v1317_v10  ;;  %v1025_v8 = vld [vmem:[%s9875_s22 + $0x450] sm:$0xff]  ;;  %v1347_v9 = vunpack.c.l.s8.bf16 %v1017_v7 }
 0x12e   : > { %v8712_v21 = vadd.f32 %v6632_v18, %v6604_v17  ;;  %7016 = vmatpush3.bf16.msra.mxu1 %v1333_v11  ;;  %6989 = vmatprep.subr.bf16.mxu0 %v1326_v14  ;;  %v1363_v10 = vunpack.c.l.s8.bf16 %v1025_v8  ;;  %v1356_v11 = vunpack.c.h.s8.bf16 %v1021_v63  ;;  %v1030_v14 = vld [vmem:[%s9875_s22 + $0x478] sm:$0xff]  ;;  %v1364_v17 = vunpack.c.h.s8.bf16 %v1025_v8  ;;  %v1553_v56 = vld [vmem:[%s9876_s6 + $0x210] sm:$0xff] }
 0x12f   : > { %7017 = vmatprep.subr.bf16.mxu1 %v1342_v15  ;;  %v6605_v29 = vpop.f32.mrb[4].mxu0  ;;  %v1348_v15 = vunpack.c.h.s8.bf16 %v1017_v7  ;;  %v1357_v18 = vunpack.c.l.s8.bf16 %v1022_v13  ;;  %v1373_v19 = vunpack.c.l.s8.bf16 %v1030_v14  ;;  %v1044_v7 = vld [vmem:[%s9875_s22 + $0x4e8] sm:$0xff] }
 0x130   : > { %v6633_v30 = vpop.f32.mrb[4].mxu1  ;;  %v6606_v34 = vpop.f32.mrb[5].mxu0 }
 0x131   : > { %v6634_v35 = vpop.f32.mrb[5].mxu1  ;;  %6990 = vmatpush3.bf16.msra.mxu0 %v1318_v22  ;;  %v6607_v38 = vadd.f32 %v6606_v34, %v6605_v29  ;;  %v6608_v39 = vpop.f32.mrb[6].mxu0  ;;  %v1026_v22 = vld [vmem:[%s9875_s22 + $0x458] sm:$0xff] }
 0x132   : > { %7018 = vmatpush3.bf16.msra.mxu1 %v1334_v23  ;;  %v6635_v40 = vadd.f32 %v6634_v35, %v6633_v30  ;;  %v6636_v41 = vpop.f32.mrb[6].mxu1  ;;  %7031 = vmatprep.subr.bf16.mxu0 %v1351_v24  ;;  %v6609_v44 = vpop.f32.mrb[7].mxu0  ;;  %v1365_v32 = vunpack.c.l.s8.bf16 %v1026_v22  ;;  %v1358_v35 = vunpack.c.h.s8.bf16 %v1022_v13  ;;  %v1032_v13 = vld [vmem:[%s9875_s22 + $0x488] sm:$0xff] }
 0x133   : > { %7059 = vmatprep.subr.bf16.mxu1 %v1367_v25  ;;  %v6637_v45 = vpop.f32.mrb[7].mxu1  ;;  %v1043_v41 = vld [vmem:[%s9875_s22 + $0x4e0] sm:$0xff]  ;;  %v1350_v44 = vunpack.c.h.s8.bf16 %v1018_v20 }
 0x134   : > { %v8738_v50 = vadd.f32 %v6635_v40, %v6607_v38  ;;  %2692 = vmatmul.mubr.bf16.vlgmr.msra.gmra.mrb[56].mxu0 %v7828_v28  ;;  %v1035_v40 = vld [vmem:[%s9875_s22 + $0x4a0] sm:$0xff]  ;;  %v1366_v45 = vunpack.c.h.s8.bf16 %v1026_v22  ;;  %v1402_v22 = vunpack.c.h.s8.bf16 %v1044_v7 }
 0x135   : > { %2740 = vmatmul.mubr.bf16.vlgmr.msra.gmra.mrb[56].mxu1 %v7831_v31  ;;  %7032 = vmatpush3.bf16.msra.mxu0 %v1343_v36  ;;  %v1349_v31 = vunpack.c.l.s8.bf16 %v1018_v20  ;;  %v1374_v36 = vunpack.c.h.s8.bf16 %v1030_v14  ;;  %v1384_v0 = vunpack.c.h.s8.bf16 %v1035_v40  ;;  %v1040_v14 = vld [vmem:[%s9875_s22 + $0x4c8] sm:$0xff] }
 0x136   : > { %7060 = vmatpush3.bf16.msra.mxu1 %v1359_v37  ;;  %7033 = vmatprep.subr.bf16.mxu0 %v1352_v42 }
 0x137   : > { %7061 = vmatprep.subr.bf16.mxu1 %v1368_v43  ;;  %2699 = vmatprep.mubr.bf16.mxu0 %v6491_v46  ;;  %v1399_v46 = vunpack.c.l.s8.bf16 %v1043_v41 }
 0x138   : > { %2747 = vmatprep.mubr.bf16.mxu1 %v6493_v49 }
 0x139   : > { %7034 = vmatpush3.bf16.msra.mxu0 %v1344_v51 }
 0x13a   : > { %7062 = vmatpush3.bf16.msra.mxu1 %v1360_v52  ;;  %7035 = vmatprep.subr.bf16.mxu0 %v1353_v53  ;;  %v7838_v52 = vld [vmem:[%s9876_s6 + $0x80] ss:$200 sps:$4 sm:$0xff]  }
 0x13b   : > { %7063 = vmatprep.subr.bf16.mxu1 %v1369_v54 }
 0x13c   : > { %2700 = vmatmul.mubr.bf16.gmra.mrb[60].mxu0 %v6490_v57  ;;  %v1554_v57 = vld [vmem:[%s9876_s6 + $0x218] sm:$0xff] }
 0x13d   : > { %2748 = vmatmul.mubr.bf16.gmra.mrb[60].mxu1 %v6492_v58  ;;  %7036 = vmatpush3.bf16.msra.mxu0 %v1345_v59  ;;  %v6497_v8 = vcombine.high %v1554_v57, %v1554_v57 }
 0x13e   : > { %7064 = vmatpush3.bf16.msra.mxu1 %v1361_v60  ;;  %7037 = vmatprep.subr.bf16.mxu0 %v1354_v61  ;;  %v1375_v60 = vunpack.c.l.s8.bf16 %v1031_v47  ;;  %v1391_v61 = vunpack.c.l.s8.bf16 %v1039_v48 }
 0x13f   : > { %7065 = vmatprep.subr.bf16.mxu1 %v1370_v62  ;;  %2787 = vmatprep.mubr.bf16.mxu0 %v7840_v1  ;;  %v1400_v1 = vunpack.c.h.s8.bf16 %v1043_v41 }
 0x140   : > { %2835 = vmatprep.mubr.bf16.mxu1 %v7843_v2 }
 0x141   : > { %7038 = vmatpush3.bf16.msra.mxu0 %v1346_v3 }
 0x142   : > { %7066 = vmatpush3.bf16.msra.mxu1 %v1362_v4  ;;  %7039 = vmatprep.subr.bf16.mxu0 %v1355_v5  ;;  %v6495_v5 = vcombine.high %v1553_v56, %v1553_v56 }
 0x143   : > { %7067 = vmatprep.subr.bf16.mxu1 %v1371_v6  ;;  %v1036_v6 = vld [vmem:[%s9875_s22 + $0x4a8] sm:$0xff] }
 0x144   : > { %v1386_v20 = vunpack.c.h.s8.bf16 %v1036_v6 }
 0x145   : > { %7040 = vmatpush3.bf16.msra.mxu0 %v1347_v9 }
 0x146   : > { %7068 = vmatpush3.bf16.msra.mxu1 %v1363_v10  ;;  %7041 = vmatprep.subr.bf16.mxu0 %v1356_v11  ;;  %v1376_v10 = vunpack.c.h.s8.bf16 %v1031_v47  ;;  %v1392_v11 = vunpack.c.h.s8.bf16 %v1039_v48 }
 0x147   : > { %7069 = vmatprep.subr.bf16.mxu1 %v1372_v12  ;;  %v6655_v23 = vpop.f32.mrb[8].mxu0  ;;  %v1401_v12 = vunpack.c.l.s8.bf16 %v1044_v7  ;;  %v1055_v7 = vld [vmem:[%s9875_s22 + $0x540] sm:$0xff] }
 0x148   : > { %v6683_v24 = vpop.f32.mrb[8].mxu1  ;;  %v6656_v25 = vpop.f32.mrb[9].mxu0 }
 0x149   : > { %v6684_v26 = vpop.f32.mrb[9].mxu1  ;;  %v6657_v27 = vadd.f32 %v6656_v25, %v6655_v23  ;;  %v6658_v29 = vpop.f32.mrb[10].mxu0  ;;  %7042 = vmatpush3.bf16.msra.mxu0 %v1348_v15  ;;  %v6494_v15 = vcombine.low %v1553_v56, %v1553_v56  ;;  %v1037_v23 = vld [vmem:[%s9875_s22 + $0x4b0] sm:$0xff] }
 0x14a   : > { %v6685_v28 = vadd.f32 %v6684_v26, %v6683_v24  ;;  %v6686_v30 = vpop.f32.mrb[10].mxu1  ;;  %7070 = vmatpush3.bf16.msra.mxu1 %v1364_v17  ;;  %v6659_v33 = vpop.f32.mrb[11].mxu0  ;;  %7043 = vmatprep.subr.bf16.mxu0 %v1357_v18  ;;  %v6496_v17 = vcombine.low %v1554_v57, %v1554_v57  ;;  %v1377_v18 = vunpack.c.l.s8.bf16 %v1032_v13  ;;  %v1045_v24 = vld [vmem:[%s9875_s22 + $0x4f0] sm:$0xff]  ;;  %v7853_v26 = vld [vmem:[%s9876_s6 + $0x9c] ss:$200 sps:$4 sm:$0xff]  }
 0x14b   : > { %v6687_v34 = vpop.f32.mrb[11].mxu1  ;;  %7071 = vmatprep.subr.bf16.mxu1 %v1373_v19  ;;  %v2118_v37 = vadd.f32 %v6657_v27, %v8704_v16  ;;  %v6660_v38 = vadd.f32 %v6659_v33, %v6658_v29  ;;  %v1383_v16 = vunpack.c.l.s8.bf16 %v1035_v40  ;;  %v1393_v19 = vunpack.c.l.s8.bf16 %v1040_v14  ;;  %v7850_v25 = vld [vmem:[%s9876_s6 + $0x94] ss:$200 sps:$4 sm:$0xff]  }
 0x14c   : > { %v6688_v39 = vadd.f32 %v6687_v34, %v6686_v30  ;;  %v1378_v27 = vunpack.c.h.s8.bf16 %v1032_v13  ;;  %v1387_v29 = vunpack.c.l.s8.bf16 %v1037_v23  ;;  %v1403_v30 = vunpack.c.l.s8.bf16 %v1045_v24  ;;  %v7851_v13 = vld [vmem:[%s9876_s6 + $0x98] ss:$200 sps:$4 sm:$0xff]  }
 0x14d   : > { %v8783_v42 = vadd.f32 %v6685_v28, %v2118_v37  ;;  %v2121_v43 = vadd.f32 %v6660_v38, %v8712_v21  ;;  %7044 = vmatpush3.bf16.msra.mxu0 %v1349_v31  ;;  %v1394_v28 = vunpack.c.h.s8.bf16 %v1040_v14  ;;  %v1033_v31 = vld [vmem:[%s9875_s22 + $0x490] sm:$0xff]  ;;  %v1038_v37 = vld [vmem:[%s9875_s22 + $0x4b8] sm:$0xff]  ;;  %v1555_v14 = vld [vmem:[%s9876_s6 + $0x220] sm:$0xff] }
 0x14e   : > { %7072 = vmatpush3.bf16.msra.mxu1 %v1365_v32  ;;  %7045 = vmatprep.subr.bf16.mxu0 %v1358_v35  ;;  %v1041_v32 = vld [vmem:[%s9875_s22 + $0x4d0] sm:$0xff]  ;;  %v1379_v33 = vunpack.c.l.s8.bf16 %v1033_v31  ;;  %v1388_v35 = vunpack.c.h.s8.bf16 %v1037_v23  ;;  %v1046_v38 = vld [vmem:[%s9875_s22 + $0x4f8] sm:$0xff]  ;;  %v1389_v41 = vunpack.c.l.s8.bf16 %v1038_v37 }
 0x14f   : > { %7073 = vmatprep.subr.bf16.mxu1 %v1374_v36  ;;  %v8792_v49 = vadd.f32 %v6688_v39, %v2121_v43  ;;  %v6661_v51 = vpop.f32.mrb[12].mxu0  ;;  %v1395_v34 = vunpack.c.l.s8.bf16 %v1041_v32  ;;  %v1404_v36 = vunpack.c.h.s8.bf16 %v1045_v24  ;;  %v1380_v39 = vunpack.c.h.s8.bf16 %v1033_v31  ;;  %v1060_v31 = vld [vmem:[%s9875_s22 + $0x568] sm:$0xff] }
 0x150   : > { %v6689_v21 = vpop.f32.mrb[12].mxu1  ;;  %v6662_v53 = vpop.f32.mrb[13].mxu0  ;;  %v1396_v40 = vunpack.c.h.s8.bf16 %v1041_v32  ;;  %v1405_v43 = vunpack.c.l.s8.bf16 %v1046_v38 }
 0x151   : > { %v6690_v54 = vpop.f32.mrb[13].mxu1  ;;  %v6663_v58 = vadd.f32 %v6662_v53, %v6661_v51  ;;  %7046 = vmatpush3.bf16.msra.mxu0 %v1350_v44  ;;  %v6664_v62 = vpop.f32.mrb[14].mxu0  ;;  %v1034_v44 = vld [vmem:[%s9875_s22 + $0x498] sm:$0xff] }
 0x152   : > { %7074 = vmatpush3.bf16.msra.mxu1 %v1366_v45  ;;  %v6691_v59 = vadd.f32 %v6690_v54, %v6689_v21  ;;  %v6692_v63 = vpop.f32.mrb[14].mxu1  ;;  %7087 = vmatprep.subr.bf16.mxu0 %v1383_v16  ;;  %v6665_v2 = vpop.f32.mrb[15].mxu0  ;;  %v1042_v45 = vld [vmem:[%s9875_s22 + $0x4d8] sm:$0xff]  ;;  %v1381_v54 = vunpack.c.l.s8.bf16 %v1034_v44 }
 0x153   : > { %7115 = vmatprep.subr.bf16.mxu1 %v1399_v46  ;;  %v6693_v3 = vpop.f32.mrb[15].mxu1  ;;  %v2126_v4 = vadd.f32 %v6663_v58, %v8738_v50  ;;  %v1385_v50 = vunpack.c.l.s8.bf16 %v1036_v6  ;;  %v1390_v58 = vunpack.c.h.s8.bf16 %v1038_v37  ;;  %v1051_v63 = vld [vmem:[%s9875_s22 + $0x520] sm:$0xff]  ;;  %v1048_v37 = vld [vmem:[%s9875_s22 + $0x508] sm:$0xff] }
 0x154   : > { %2788 = vmatmul.mubr.bf16.vlgmr.msra.gmra.mrb[64].mxu0 %v7838_v52  ;;  %v1382_v3 = vunpack.c.h.s8.bf16 %v1034_v44  ;;  %v1047_v6 = vld [vmem:[%s9875_s22 + $0x500] sm:$0xff]  ;;  %v1416_v24 = vunpack.c.h.s8.bf16 %v1051_v63 }
 0x155   : > { %2836 = vmatmul.mubr.bf16.vlgmr.msra.gmra.mrb[64].mxu1 %v7841_v55  ;;  %v8813_v9 = vadd.f32 %v6691_v59, %v2126_v4  ;;  %7088 = vmatpush3.bf16.msra.mxu0 %v1375_v60  ;;  %v1397_v55 = vunpack.c.l.s8.bf16 %v1042_v45  ;;  %v1406_v59 = vunpack.c.h.s8.bf16 %v1046_v38  ;;  %v1398_v4 = vunpack.c.h.s8.bf16 %v1042_v45  ;;  %v1056_v38 = vld [vmem:[%s9875_s22 + $0x548] sm:$0xff] }
 0x156   : > { %7116 = vmatpush3.bf16.msra.mxu1 %v1391_v61  ;;  %7089 = vmatprep.subr.bf16.mxu0 %v1384_v0  ;;  %v1059_v0 = vld [vmem:[%s9875_s22 + $0x560] sm:$0xff]  ;;  %v1434_v45 = vunpack.c.h.s8.bf16 %v1060_v31 }
 0x157   : > { %7117 = vmatprep.subr.bf16.mxu1 %v1400_v1  ;;  %2795 = vmatprep.mubr.bf16.mxu0 %v6495_v5  ;;  %v1431_v5 = vunpack.c.l.s8.bf16 %v1059_v0 }
 0x158   : > { %2843 = vmatprep.mubr.bf16.mxu1 %v6497_v8 }
 0x159   : > { %7090 = vmatpush3.bf16.msra.mxu0 %v1376_v10 }
 0x15a   : > { %7118 = vmatpush3.bf16.msra.mxu1 %v1392_v11  ;;  %7091 = vmatprep.subr.bf16.mxu0 %v1385_v50  ;;  %v7848_v11 = vld [vmem:[%s9876_s6 + $0x90] ss:$200 sps:$4 sm:$0xff]  }
 0x15b   : > { %7119 = vmatprep.subr.bf16.mxu1 %v1401_v12 }
 0x15c   : > { %2796 = vmatmul.mubr.bf16.gmra.mrb[68].mxu0 %v6494_v15  ;;  %v1556_v15 = vld [vmem:[%s9876_s6 + $0x228] sm:$0xff] }
 0x15d   : > { %2844 = vmatmul.mubr.bf16.gmra.mrb[68].mxu1 %v6496_v17  ;;  %7092 = vmatpush3.bf16.msra.mxu0 %v1377_v18  ;;  %v6501_v32 = vcombine.high %v1556_v15, %v1556_v15 }
 0x15e   : > { %7120 = vmatpush3.bf16.msra.mxu1 %v1393_v19  ;;  %7093 = vmatprep.subr.bf16.mxu0 %v1386_v20  ;;  %v1407_v19 = vunpack.c.l.s8.bf16 %v1047_v6  ;;  %v1423_v20 = vunpack.c.l.s8.bf16 %v1055_v7 }
 0x15f   : > { %7121 = vmatprep.subr.bf16.mxu1 %v1402_v22  ;;  %2883 = vmatprep.mubr.bf16.mxu0 %v7850_v25  ;;  %v1432_v25 = vunpack.c.h.s8.bf16 %v1059_v0 }
 0x160   : > { %2931 = vmatprep.mubr.bf16.mxu1 %v7853_v26 }
 0x161   : > { %7094 = vmatpush3.bf16.msra.mxu0 %v1378_v27 }
 0x162   : > { %7122 = vmatpush3.bf16.msra.mxu1 %v1394_v28  ;;  %7095 = vmatprep.subr.bf16.mxu0 %v1387_v29  ;;  %v6499_v29 = vcombine.high %v1555_v14, %v1555_v14 }
 0x163   : > { %7123 = vmatprep.subr.bf16.mxu1 %v1403_v30  ;;  %v1052_v30 = vld [vmem:[%s9875_s22 + $0x528] sm:$0xff] }
 0x164   : > { %v1418_v44 = vunpack.c.h.s8.bf16 %v1052_v30 }
 0x165   : > { %7096 = vmatpush3.bf16.msra.mxu0 %v1379_v33 }
 0x166   : > { %7124 = vmatpush3.bf16.msra.mxu1 %v1395_v34  ;;  %7097 = vmatprep.subr.bf16.mxu0 %v1388_v35  ;;  %v1408_v34 = vunpack.c.h.s8.bf16 %v1047_v6  ;;  %v1424_v35 = vunpack.c.h.s8.bf16 %v1055_v7 }
 0x167   : > { %7125 = vmatprep.subr.bf16.mxu1 %v1404_v36  ;;  %v6711_v16 = vpop.f32.mrb[16].mxu0  ;;  %v1433_v36 = vunpack.c.l.s8.bf16 %v1060_v31  ;;  %v1071_v31 = vld [vmem:[%s9875_s22 + $0x5c0] sm:$0xff] }
 0x168   : > { %v6739_v46 = vpop.f32.mrb[16].mxu1  ;;  %v6712_v47 = vpop.f32.mrb[17].mxu0 }
 0x169   : > { %v6740_v48 = vpop.f32.mrb[17].mxu1  ;;  %v6713_v51 = vadd.f32 %v6712_v47, %v6711_v16  ;;  %v6714_v52 = vpop.f32.mrb[18].mxu0  ;;  %7098 = vmatpush3.bf16.msra.mxu0 %v1380_v39  ;;  %v6498_v39 = vcombine.low %v1555_v14, %v1555_v14  ;;  %v1053_v16 = vld [vmem:[%s9875_s22 + $0x530] sm:$0xff]  ;;  %v7860_v47 = vld [vmem:[%s9876_s6 + $0xa4] ss:$200 sps:$4 sm:$0xff]  }
 0x16a   : > { %v6741_v21 = vadd.f32 %v6740_v48, %v6739_v46  ;;  %v6742_v53 = vpop.f32.mrb[18].mxu1  ;;  %7126 = vmatpush3.bf16.msra.mxu1 %v1396_v40  ;;  %v6715_v56 = vpop.f32.mrb[19].mxu0  ;;  %7099 = vmatprep.subr.bf16.mxu0 %v1389_v41  ;;  %v6500_v40 = vcombine.low %v1556_v15, %v1556_v15  ;;  %v1409_v41 = vunpack.c.l.s8.bf16 %v1048_v37  ;;  %v1061_v46 = vld [vmem:[%s9875_s22 + $0x570] sm:$0xff] }
 0x16b   : > { %v6743_v57 = vpop.f32.mrb[19].mxu1  ;;  %7127 = vmatprep.subr.bf16.mxu1 %v1405_v43  ;;  %v2214_v60 = vadd.f32 %v6713_v51, %v8783_v42  ;;  %v6716_v61 = vadd.f32 %v6715_v56, %v6714_v52  ;;  %v1415_v42 = vunpack.c.l.s8.bf16 %v1051_v63  ;;  %v1425_v43 = vunpack.c.l.s8.bf16 %v1056_v38  ;;  %v7863_v48 = vld [vmem:[%s9876_s6 + $0xac] ss:$200 sps:$4 sm:$0xff]  }
 0x16c   : > { %v6744_v62 = vadd.f32 %v6743_v57, %v6742_v53  ;;  %v1410_v51 = vunpack.c.h.s8.bf16 %v1048_v37  ;;  %v1419_v52 = vunpack.c.l.s8.bf16 %v1053_v16  ;;  %v1435_v53 = vunpack.c.l.s8.bf16 %v1061_v46  ;;  %v7861_v37 = vld [vmem:[%s9876_s6 + $0xa8] ss:$200 sps:$4 sm:$0xff]  }
 0x16d   : > { %v8858_v1 = vadd.f32 %v6741_v21, %v2214_v60  ;;  %v2217_v2 = vadd.f32 %v6716_v61, %v8792_v49  ;;  %7100 = vmatpush3.bf16.msra.mxu0 %v1381_v54  ;;  %v1426_v21 = vunpack.c.h.s8.bf16 %v1056_v38  ;;  %v1049_v54 = vld [vmem:[%s9875_s22 + $0x510] sm:$0xff]  ;;  %v1054_v60 = vld [vmem:[%s9875_s22 + $0x538] sm:$0xff] }
 0x16e   : > { %7128 = vmatpush3.bf16.msra.mxu1 %v1397_v55  ;;  %7101 = vmatprep.subr.bf16.mxu0 %v1390_v58  ;;  %v1057_v55 = vld [vmem:[%s9875_s22 + $0x550] sm:$0xff]  ;;  %v1411_v56 = vunpack.c.l.s8.bf16 %v1049_v54  ;;  %v1420_v58 = vunpack.c.h.s8.bf16 %v1053_v16  ;;  %v1062_v61 = vld [vmem:[%s9875_s22 + $0x578] sm:$0xff]  ;;  %v1421_v0 = vunpack.c.l.s8.bf16 %v1054_v60 }
 0x16f   : > { %7129 = vmatprep.subr.bf16.mxu1 %v1406_v59  ;;  %v8867_v8 = vadd.f32 %v6744_v62, %v2217_v2  ;;  %v6717_v10 = vpop.f32.mrb[20].mxu0  ;;  %v1427_v57 = vunpack.c.l.s8.bf16 %v1057_v55  ;;  %v1436_v59 = vunpack.c.h.s8.bf16 %v1061_v46  ;;  %v1412_v62 = vunpack.c.h.s8.bf16 %v1049_v54  ;;  %v1557_v38 = vld [vmem:[%s9876_s6 + $0x230] sm:$0xff]  ;;  %v1076_v54 = vld [vmem:[%s9875_s22 + $0x5e8] sm:$0xff] }
 0x170   : > { %v6745_v49 = vpop.f32.mrb[20].mxu1  ;;  %v6718_v50 = vpop.f32.mrb[21].mxu0  ;;  %v1428_v63 = vunpack.c.h.s8.bf16 %v1057_v55  ;;  %v1437_v2 = vunpack.c.l.s8.bf16 %v1062_v61 }
 0x171   : > { %v6746_v12 = vpop.f32.mrb[21].mxu1  ;;  %v6719_v17 = vadd.f32 %v6718_v50, %v6717_v10  ;;  %7102 = vmatpush3.bf16.msra.mxu0 %v1382_v3  ;;  %v6720_v22 = vpop.f32.mrb[22].mxu0  ;;  %v1050_v3 = vld [vmem:[%s9875_s22 + $0x518] sm:$0xff] }
 0x172   : > { %7130 = vmatpush3.bf16.msra.mxu1 %v1398_v4  ;;  %v6747_v18 = vadd.f32 %v6746_v12, %v6745_v49  ;;  %v6748_v23 = vpop.f32.mrb[22].mxu1  ;;  %7143 = vmatprep.subr.bf16.mxu0 %v1415_v42  ;;  %v6721_v26 = vpop.f32.mrb[23].mxu0  ;;  %v1058_v4 = vld [vmem:[%s9875_s22 + $0x558] sm:$0xff]  ;;  %v1413_v12 = vunpack.c.l.s8.bf16 %v1050_v3 }
 0x173   : > { %7171 = vmatprep.subr.bf16.mxu1 %v1431_v5  ;;  %v6749_v27 = vpop.f32.mrb[23].mxu1  ;;  %v2222_v28 = vadd.f32 %v6719_v17, %v8813_v9  ;;  %v1417_v9 = vunpack.c.l.s8.bf16 %v1052_v30  ;;  %v1422_v17 = vunpack.c.h.s8.bf16 %v1054_v60  ;;  %v1067_v23 = vld [vmem:[%s9875_s22 + $0x5a0] sm:$0xff]  ;;  %v1064_v60 = vld [vmem:[%s9875_s22 + $0x588] sm:$0xff] }
 0x174   : > { %2884 = vmatmul.mubr.bf16.vlgmr.msra.gmra.mrb[72].mxu0 %v7848_v11  ;;  %v1414_v27 = vunpack.c.h.s8.bf16 %v1050_v3  ;;  %v1063_v30 = vld [vmem:[%s9875_s22 + $0x580] sm:$0xff]  ;;  %v1448_v46 = vunpack.c.h.s8.bf16 %v1067_v23 }
 0x175   : > { %2932 = vmatmul.mubr.bf16.vlgmr.msra.gmra.mrb[72].mxu1 %v7851_v13  ;;  %v8888_v33 = vadd.f32 %v6747_v18, %v2222_v28  ;;  %7144 = vmatpush3.bf16.msra.mxu0 %v1407_v19  ;;  %v1429_v13 = vunpack.c.l.s8.bf16 %v1058_v4  ;;  %v1438_v18 = vunpack.c.h.s8.bf16 %v1062_v61  ;;  %v1430_v28 = vunpack.c.h.s8.bf16 %v1058_v4  ;;  %v1072_v61 = vld [vmem:[%s9875_s22 + $0x5c8] sm:$0xff] }
 0x176   : > { %7172 = vmatpush3.bf16.msra.mxu1 %v1423_v20  ;;  %7145 = vmatprep.subr.bf16.mxu0 %v1416_v24  ;;  %v1075_v24 = vld [vmem:[%s9875_s22 + $0x5e0] sm:$0xff]  ;;  %v1466_v4 = vunpack.c.h.s8.bf16 %v1076_v54 }
 0x177   : > { %7173 = vmatprep.subr.bf16.mxu1 %v1432_v25  ;;  %2891 = vmatprep.mubr.bf16.mxu0 %v6499_v29  ;;  %v1463_v29 = vunpack.c.l.s8.bf16 %v1075_v24 }
 0x178   : > { %2939 = vmatprep.mubr.bf16.mxu1 %v6501_v32 }
 0x179   : > { %7146 = vmatpush3.bf16.msra.mxu0 %v1408_v34 }
 0x17a   : > { %7174 = vmatpush3.bf16.msra.mxu1 %v1424_v35  ;;  %7147 = vmatprep.subr.bf16.mxu0 %v1417_v9  ;;  %v7858_v35 = vld [vmem:[%s9876_s6 + $0xa0] ss:$200 sps:$4 sm:$0xff]  }
 0x17b   : > { %7175 = vmatprep.subr.bf16.mxu1 %v1433_v36 }
 0x17c   : > { %2892 = vmatmul.mubr.bf16.gmra.mrb[76].mxu0 %v6498_v39  ;;  %v1558_v39 = vld [vmem:[%s9876_s6 + $0x238] sm:$0xff] }
 0x17d   : > { %2940 = vmatmul.mubr.bf16.gmra.mrb[76].mxu1 %v6500_v40  ;;  %7148 = vmatpush3.bf16.msra.mxu0 %v1409_v41  ;;  %v6505_v55 = vcombine.high %v1558_v39, %v1558_v39 }
 0x17e   : > { %7176 = vmatpush3.bf16.msra.mxu1 %v1425_v43  ;;  %7149 = vmatprep.subr.bf16.mxu0 %v1418_v44  ;;  %v1439_v43 = vunpack.c.l.s8.bf16 %v1063_v30  ;;  %v1455_v44 = vunpack.c.l.s8.bf16 %v1071_v31 }
 0x17f   : > { %7177 = vmatprep.subr.bf16.mxu1 %v1434_v45  ;;  %2979 = vmatprep.mubr.bf16.mxu0 %v7860_v47  ;;  %v1464_v47 = vunpack.c.h.s8.bf16 %v1075_v24 }
 0x180   : > { %3027 = vmatprep.mubr.bf16.mxu1 %v7863_v48 }
 0x181   : > { %7150 = vmatpush3.bf16.msra.mxu0 %v1410_v51 }
 0x182   : > { %7178 = vmatpush3.bf16.msra.mxu1 %v1426_v21  ;;  %7151 = vmatprep.subr.bf16.mxu0 %v1419_v52  ;;  %v6503_v52 = vcombine.high %v1557_v38, %v1557_v38 }
 0x183   : > { %7179 = vmatprep.subr.bf16.mxu1 %v1435_v53  ;;  %v1068_v53 = vld [vmem:[%s9875_s22 + $0x5a8] sm:$0xff] }
 0x184   : > { %v1450_v3 = vunpack.c.h.s8.bf16 %v1068_v53 }
 0x185   : > { %7152 = vmatpush3.bf16.msra.mxu0 %v1411_v56 }
 0x186   : > { %7180 = vmatpush3.bf16.msra.mxu1 %v1427_v57  ;;  %7153 = vmatprep.subr.bf16.mxu0 %v1420_v58  ;;  %v1440_v57 = vunpack.c.h.s8.bf16 %v1063_v30  ;;  %v1456_v58 = vunpack.c.h.s8.bf16 %v1071_v31 }
 0x187   : > { %7181 = vmatprep.subr.bf16.mxu1 %v1436_v59  ;;  %v6767_v42 = vpop.f32.mrb[24].mxu0  ;;  %v1465_v59 = vunpack.c.l.s8.bf16 %v1076_v54 }
 0x188   : > { %v6795_v5 = vpop.f32.mrb[24].mxu1  ;;  %v6768_v6 = vpop.f32.mrb[25].mxu0 }
 0x189   : > { %v6796_v7 = vpop.f32.mrb[25].mxu1  ;;  %v6769_v10 = vadd.f32 %v6768_v6, %v6767_v42  ;;  %v6770_v11 = vpop.f32.mrb[26].mxu0  ;;  %7154 = vmatpush3.bf16.msra.mxu0 %v1412_v62  ;;  %v6502_v62 = vcombine.low %v1557_v38, %v1557_v38  ;;  %v1069_v42 = vld [vmem:[%s9875_s22 + $0x5b0] sm:$0xff] }
 0x18a   : > { %v6797_v49 = vadd.f32 %v6796_v7, %v6795_v5  ;;  %v6798_v50 = vpop.f32.mrb[26].mxu1  ;;  %7182 = vmatpush3.bf16.msra.mxu1 %v1428_v63  ;;  %v6771_v14 = vpop.f32.mrb[27].mxu0  ;;  %7155 = vmatprep.subr.bf16.mxu0 %v1421_v0  ;;  %v6504_v63 = vcombine.low %v1558_v39, %v1558_v39  ;;  %v1441_v0 = vunpack.c.l.s8.bf16 %v1064_v60  ;;  %v1077_v5 = vld [vmem:[%s9875_s22 + $0x5f0] sm:$0xff]  ;;  %v7873_v7 = vld [vmem:[%s9876_s6 + $0xbc] ss:$200 sps:$4 sm:$0xff]  }
 0x18b   : > { %v6799_v15 = vpop.f32.mrb[27].mxu1  ;;  %7183 = vmatprep.subr.bf16.mxu1 %v1437_v2  ;;  %v2310_v19 = vadd.f32 %v6769_v10, %v8858_v1  ;;  %v6772_v20 = vadd.f32 %v6771_v14, %v6770_v11  ;;  %v1447_v1 = vunpack.c.l.s8.bf16 %v1067_v23  ;;  %v1457_v2 = vunpack.c.l.s8.bf16 %v1072_v61  ;;  %v7870_v6 = vld [vmem:[%s9876_s6 + $0xb4] ss:$200 sps:$4 sm:$0xff]  }
 0x18c   : > { %v6800_v22 = vadd.f32 %v6799_v15, %v6798_v50  ;;  %v1442_v10 = vunpack.c.h.s8.bf16 %v1064_v60  ;;  %v1451_v11 = vunpack.c.l.s8.bf16 %v1069_v42  ;;  %v1467_v50 = vunpack.c.l.s8.bf16 %v1077_v5 }
 0x18d   : > { %v8933_v25 = vadd.f32 %v6797_v49, %v2310_v19  ;;  %v2313_v26 = vadd.f32 %v6772_v20, %v8867_v8  ;;  %7156 = vmatpush3.bf16.msra.mxu0 %v1413_v12  ;;  %v1458_v49 = vunpack.c.h.s8.bf16 %v1072_v61  ;;  %v1065_v12 = vld [vmem:[%s9875_s22 + $0x590] sm:$0xff]  ;;  %v1070_v19 = vld [vmem:[%s9875_s22 + $0x5b8] sm:$0xff] }
 0x18e   : > { %7184 = vmatpush3.bf16.msra.mxu1 %v1429_v13  ;;  %7157 = vmatprep.subr.bf16.mxu0 %v1422_v17  ;;  %v1073_v13 = vld [vmem:[%s9875_s22 + $0x5d0] sm:$0xff]  ;;  %v1443_v14 = vunpack.c.l.s8.bf16 %v1065_v12  ;;  %v1452_v17 = vunpack.c.h.s8.bf16 %v1069_v42  ;;  %v1078_v20 = vld [vmem:[%s9875_s22 + $0x5f8] sm:$0xff]  ;;  %v1453_v24 = vunpack.c.l.s8.bf16 %v1070_v19 }
 0x18f   : > { %7185 = vmatprep.subr.bf16.mxu1 %v1438_v18  ;;  %v8942_v32 = vadd.f32 %v6800_v22, %v2313_v26  ;;  %v6773_v34 = vpop.f32.mrb[28].mxu0  ;;  %v1459_v15 = vunpack.c.l.s8.bf16 %v1073_v13  ;;  %v1468_v18 = vunpack.c.h.s8.bf16 %v1077_v5  ;;  %v1444_v22 = vunpack.c.h.s8.bf16 %v1065_v12 }
 0x190   : > { %v6801_v8 = vpop.f32.mrb[28].mxu1  ;;  %v6774_v9 = vpop.f32.mrb[29].mxu0  ;;  %v1460_v23 = vunpack.c.h.s8.bf16 %v1073_v13  ;;  %v1469_v26 = vunpack.c.l.s8.bf16 %v1078_v20  ;;  %v9037_v13 = vld [vmem:[%s9876_s6 + $0x250] sm:$0xff] }
 0x191   : > { %v6802_v36 = vpop.f32.mrb[29].mxu1  ;;  %v6775_v40 = vadd.f32 %v6774_v9, %v6773_v34  ;;  %7158 = vmatpush3.bf16.msra.mxu0 %v1414_v27  ;;  %v6776_v45 = vpop.f32.mrb[30].mxu0  ;;  %v1066_v27 = vld [vmem:[%s9875_s22 + $0x598] sm:$0xff] }
 0x192   : > { %7186 = vmatpush3.bf16.msra.mxu1 %v1430_v28  ;;  %v6803_v41 = vadd.f32 %v6802_v36, %v6801_v8  ;;  %v6804_v16 = vpop.f32.mrb[30].mxu1  ;;  %7199 = vmatprep.subr.bf16.mxu0 %v1447_v1  ;;  %v6777_v48 = vpop.f32.mrb[31].mxu0  ;;  %v1074_v28 = vld [vmem:[%s9875_s22 + $0x5d8] sm:$0xff]  ;;  %v1445_v36 = vunpack.c.l.s8.bf16 %v1066_v27 }
 0x193   : > { %7227 = vmatprep.subr.bf16.mxu1 %v1463_v29  ;;  %v6805_v51 = vpop.f32.mrb[31].mxu1  ;;  %v2318_v21 = vadd.f32 %v6775_v40, %v8888_v33  ;;  %v1449_v33 = vunpack.c.l.s8.bf16 %v1068_v53  ;;  %v1454_v40 = vunpack.c.h.s8.bf16 %v1070_v19  ;;  %v1083_v16 = vld [vmem:[%s9875_s22 + $0x620] sm:$0xff]  ;;  %v1446_v48 = vunpack.c.h.s8.bf16 %v1066_v27  ;;  %v1086_v27 = vld [vmem:[%s9875_s22 + $0x638] sm:$0xff] }
 0x194   : > { %2980 = vmatmul.mubr.bf16.vlgmr.msra.gmra.mrb[80].mxu0 %v7858_v35  ;;  %v1462_v51 = vunpack.c.h.s8.bf16 %v1074_v28  ;;  %v6511_v19 = vcombine.high %v9037_v13, %v9037_v13 }
 0x195   : > { %3028 = vmatmul.mubr.bf16.vlgmr.msra.gmra.mrb[80].mxu1 %v7861_v37  ;;  %v8963_v56 = vadd.f32 %v6803_v41, %v2318_v21  ;;  %7200 = vmatpush3.bf16.msra.mxu0 %v1439_v43  ;;  %v1461_v37 = vunpack.c.l.s8.bf16 %v1074_v28  ;;  %v1470_v41 = vunpack.c.h.s8.bf16 %v1078_v20  ;;  %v1479_v21 = vunpack.c.l.s8.bf16 %v1083_v16 }
 0x196   : > { %7228 = vmatpush3.bf16.msra.mxu1 %v1455_v44  ;;  %7201 = vmatprep.subr.bf16.mxu0 %v1448_v46 }
 0x197   : > { %7229 = vmatprep.subr.bf16.mxu1 %v1464_v47  ;;  %2987 = vmatprep.mubr.bf16.mxu0 %v6503_v52 }
 0x198   : > { %3035 = vmatprep.mubr.bf16.mxu1 %v6505_v55  ;;  %v7868_v55 = vld [vmem:[%s9876_s6 + $0xb0] ss:$200 sps:$4 sm:$0xff]  }
 0x199   : > { %7202 = vmatpush3.bf16.msra.mxu0 %v1440_v57 }
 0x19a   : > { %7230 = vmatpush3.bf16.msra.mxu1 %v1456_v58  ;;  %7203 = vmatprep.subr.bf16.mxu0 %v1449_v33  ;;  %v7871_v58 = vld [vmem:[%s9876_s6 + $0xb8] ss:$200 sps:$4 sm:$0xff]  }
 0x19b   : > { %7231 = vmatprep.subr.bf16.mxu1 %v1465_v59  ;;  %v1559_v33 = vld [vmem:[%s9876_s6 + $0x240] sm:$0xff]  ;;  %v1560_v59 = vld [vmem:[%s9876_s6 + $0x248] sm:$0xff] }
 0x19c   : > { %2988 = vmatmul.mubr.bf16.gmra.mrb[84].mxu0 %v6502_v62  ;;  %v6507_v5 = vcombine.high %v1559_v33, %v1559_v33  ;;  %v6508_v12 = vcombine.low %v1560_v59, %v1560_v59 }
 0x19d   : > { %3036 = vmatmul.mubr.bf16.gmra.mrb[84].mxu1 %v6504_v63  ;;  %7204 = vmatpush3.bf16.msra.mxu0 %v1441_v0 }
 0x19e   : > { %7232 = vmatpush3.bf16.msra.mxu1 %v1457_v2  ;;  %7205 = vmatprep.subr.bf16.mxu0 %v1450_v3  ;;  %v1480_v2 = vunpack.c.h.s8.bf16 %v1083_v16 }
 0x19f   : > { %7233 = vmatprep.subr.bf16.mxu1 %v1466_v4  ;;  %3075 = vmatprep.mubr.bf16.mxu0 %v7870_v6  ;;  %v1084_v6 = vld [vmem:[%s9875_s22 + $0x628] sm:$0xff] }
 0x1a0   : > { %3123 = vmatprep.mubr.bf16.mxu1 %v7873_v7  ;;  %v6509_v7 = vcombine.high %v1560_v59, %v1560_v59 }
 0x1a1   : > { %7206 = vmatpush3.bf16.msra.mxu0 %v1442_v10 }
 0x1a2   : > { %7234 = vmatpush3.bf16.msra.mxu1 %v1458_v49  ;;  %7207 = vmatprep.subr.bf16.mxu0 %v1451_v11  ;;  %v1481_v11 = vunpack.c.l.s8.bf16 %v1084_v6 }
 0x1a3   : > { %7235 = vmatprep.subr.bf16.mxu1 %v1467_v50  ;;  %v6506_v50 = vcombine.low %v1559_v33, %v1559_v33 }
 0x1a5   : > { %7208 = vmatpush3.bf16.msra.mxu0 %v1443_v14 }
 0x1a6   : > { %7236 = vmatpush3.bf16.msra.mxu1 %v1459_v15  ;;  %7209 = vmatprep.subr.bf16.mxu0 %v1452_v17  ;;  %v1482_v15 = vunpack.c.h.s8.bf16 %v1084_v6  ;;  %v1085_v17 = vld [vmem:[%s9875_s22 + $0x630] sm:$0xff] }
 0x1a7   : > { %7237 = vmatprep.subr.bf16.mxu1 %v1468_v18  ;;  %v6823_v1 = vpop.f32.mrb[32].mxu0  ;;  %v7880_v18 = vld [vmem:[%s9876_s6 + $0xc4] ss:$200 sps:$4 sm:$0xff]  }
 0x1a8   : > { %v6851_v29 = vpop.f32.mrb[32].mxu1  ;;  %v6824_v30 = vpop.f32.mrb[33].mxu0 }
 0x1a9   : > { %v6852_v31 = vpop.f32.mrb[33].mxu1  ;;  %v6825_v34 = vadd.f32 %v6824_v30, %v6823_v1  ;;  %v6826_v35 = vpop.f32.mrb[34].mxu0  ;;  %7210 = vmatpush3.bf16.msra.mxu0 %v1444_v22  ;;  %v1483_v22 = vunpack.c.l.s8.bf16 %v1085_v17  ;;  %v1485_v1 = vunpack.c.l.s8.bf16 %v1086_v27 }
 0x1aa   : > { %v6853_v8 = vadd.f32 %v6852_v31, %v6851_v29  ;;  %v6854_v9 = vpop.f32.mrb[34].mxu1  ;;  %7238 = vmatpush3.bf16.msra.mxu1 %v1460_v23  ;;  %v6827_v38 = vpop.f32.mrb[35].mxu0  ;;  %7211 = vmatprep.subr.bf16.mxu0 %v1453_v24  ;;  %v1081_v23 = vld [vmem:[%s9875_s22 + $0x610] sm:$0xff]  ;;  %v1082_v29 = vld [vmem:[%s9875_s22 + $0x618] sm:$0xff] }
 0x1ab   : > { %v6855_v39 = vpop.f32.mrb[35].mxu1  ;;  %7239 = vmatprep.subr.bf16.mxu1 %v1469_v26  ;;  %v2406_v43 = vadd.f32 %v6825_v34, %v8933_v25  ;;  %v6828_v44 = vadd.f32 %v6827_v38, %v6826_v35  ;;  %v1079_v25 = vld [vmem:[%s9875_s22 + $0x600] sm:$0xff]  ;;  %v1475_v24 = vunpack.c.l.s8.bf16 %v1081_v23  ;;  %v1484_v26 = vunpack.c.h.s8.bf16 %v1085_v17 }
 0x1ac   : > { %v6856_v45 = vadd.f32 %v6855_v39, %v6854_v9  ;;  %v1471_v62 = vunpack.c.l.s8.bf16 %v1079_v25  ;;  %v1472_v49 = vunpack.c.h.s8.bf16 %v1079_v25  ;;  %v1476_v28 = vunpack.c.h.s8.bf16 %v1081_v23 }
 0x1ad   : > { %v9005_v46 = vadd.f32 %v6853_v8, %v2406_v43  ;;  %v2409_v47 = vadd.f32 %v6828_v44, %v8942_v32  ;;  %7212 = vmatpush3.bf16.msra.mxu0 %v1445_v36  ;;  %v1477_v38 = vunpack.c.l.s8.bf16 %v1082_v29 }
 0x1ae   : > { %7240 = vmatpush3.bf16.msra.mxu1 %v1461_v37  ;;  %7213 = vmatprep.subr.bf16.mxu0 %v1454_v40 }
 0x1af   : > { %7241 = vmatprep.subr.bf16.mxu1 %v1470_v41  ;;  %v9011_v52 = vadd.f32 %v6856_v45, %v2409_v47  ;;  %v6829_v53 = vpop.f32.mrb[36].mxu0  ;;  %v1486_v41 = vunpack.c.h.s8.bf16 %v1086_v27 }
 0x1b0   : > { %v6857_v54 = vpop.f32.mrb[36].mxu1  ;;  %v6830_v32 = vpop.f32.mrb[37].mxu0 }
 0x1b1   : > { %v6858_v57 = vpop.f32.mrb[37].mxu1  ;;  %v6831_v60 = vadd.f32 %v6830_v32, %v6829_v53  ;;  %7214 = vmatpush3.bf16.msra.mxu0 %v1446_v48  ;;  %v6832_v63 = vpop.f32.mrb[38].mxu0  ;;  %v1478_v48 = vunpack.c.h.s8.bf16 %v1082_v29 }
 0x1b2   : > { %7242 = vmatpush3.bf16.msra.mxu1 %v1462_v51  ;;  %v6859_v61 = vadd.f32 %v6858_v57, %v6857_v54  ;;  %v6860_v0 = vpop.f32.mrb[38].mxu1  ;;  %7255 = vmatprep.subr.bf16.mxu0 %v1479_v21  ;;  %v6833_v3 = vpop.f32.mrb[39].mxu0 }
 0x1b3   : > { %7727 = vmatprep.subr.bf16.mxu1 %v1479_v21  ;;  %v6861_v4 = vpop.f32.mrb[39].mxu1  ;;  %v2414_v42 = vadd.f32 %v6831_v60, %v8963_v56  ;;  %v1080_v56 = vld [vmem:[%s9875_s22 + $0x608] sm:$0xff] }
 0x1b4   : > { %3076 = vmatmul.mubr.bf16.vlgmr.msra.gmra.mrb[88].mxu0 %v7868_v55  ;;  %v1473_v14 = vunpack.c.l.s8.bf16 %v1080_v56  ;;  %v1474_v20 = vunpack.c.h.s8.bf16 %v1080_v56  ;;  %v7878_v55 = vld [vmem:[%s9876_s6 + $0xc0] ss:$200 sps:$4 sm:$0xff]  }
 0x1b5   : > { %3124 = vmatmul.mubr.bf16.vlgmr.msra.gmra.mrb[88].mxu1 %v7871_v58  ;;  %v9029_v10 = vadd.f32 %v6859_v61, %v2414_v42  ;;  %7256 = vmatpush3.bf16.msra.mxu0 %v1471_v62 }
 0x1b6   : > { %7735 = vmatpush3.bf16.msra.mxu1 %v1471_v62  ;;  %7257 = vmatprep.subr.bf16.mxu0 %v1480_v2 }
 0x1b7   : > { %7728 = vmatprep.subr.bf16.mxu1 %v1480_v2  ;;  %3083 = vmatprep.mubr.bf16.mxu0 %v6507_v5 }
 0x1b8   : > { %3131 = vmatprep.mubr.bf16.mxu1 %v6509_v7 }
 0x1b9   : > { %7258 = vmatpush3.bf16.msra.mxu0 %v1472_v49 }
 0x1ba   : > { %7736 = vmatpush3.bf16.msra.mxu1 %v1472_v49  ;;  %7259 = vmatprep.subr.bf16.mxu0 %v1481_v11 }
 0x1bb   : > { %7729 = vmatprep.subr.bf16.mxu1 %v1481_v11 }
 0x1bc   : > { %3084 = vmatmul.mubr.bf16.gmra.mrb[92].mxu0 %v6506_v50 }
 0x1bd   : > { %3132 = vmatmul.mubr.bf16.gmra.mrb[92].mxu1 %v6508_v12  ;;  %7260 = vmatpush3.bf16.msra.mxu0 %v1473_v14 }
 0x1be   : > { %7737 = vmatpush3.bf16.msra.mxu1 %v1473_v14  ;;  %7261 = vmatprep.subr.bf16.mxu0 %v1482_v15 }
 0x1bf   : > { %7730 = vmatprep.subr.bf16.mxu1 %v1482_v15  ;;  %3171 = vmatprep.mubr.bf16.mxu0 %v7880_v18 }
 0x1c0   : > { %3179 = vmatprep.mubr.bf16.mxu1 %v6511_v19 }
 0x1c1   : > { %7262 = vmatpush3.bf16.msra.mxu0 %v1474_v20 }
 0x1c2   : > { %7738 = vmatpush3.bf16.msra.mxu1 %v1474_v20  ;;  %7263 = vmatprep.subr.bf16.mxu0 %v1483_v22 }
 0x1c3   : > { %7731 = vmatprep.subr.bf16.mxu1 %v1483_v22 }
 0x1c5   : > { %7264 = vmatpush3.bf16.msra.mxu0 %v1475_v24 }
 0x1c6   : > { %7739 = vmatpush3.bf16.msra.mxu1 %v1475_v24  ;;  %7265 = vmatprep.subr.bf16.mxu0 %v1484_v26 }
 0x1c7   : > { %7732 = vmatprep.subr.bf16.mxu1 %v1484_v26  ;;  %v6879_v30 = vpop.f32.mrb[40].mxu0 }
 0x1c8   : > { %v6907_v31 = vpop.f32.mrb[40].mxu1  ;;  %v6880_v34 = vpop.f32.mrb[41].mxu0 }
 0x1c9   : > { %v6908_v8 = vpop.f32.mrb[41].mxu1  ;;  %v6881_v35 = vadd.f32 %v6880_v34, %v6879_v30  ;;  %v6882_v36 = vpop.f32.mrb[42].mxu0  ;;  %7266 = vmatpush3.bf16.msra.mxu0 %v1476_v28 }
 0x1ca   : > { %v6909_v9 = vadd.f32 %v6908_v8, %v6907_v31  ;;  %v6910_v37 = vpop.f32.mrb[42].mxu1  ;;  %7740 = vmatpush3.bf16.msra.mxu1 %v1476_v28  ;;  %v6883_v39 = vpop.f32.mrb[43].mxu0  ;;  %7267 = vmatprep.subr.bf16.mxu0 %v1485_v1 }
 0x1cb   : > { %v6911_v40 = vpop.f32.mrb[43].mxu1  ;;  %7733 = vmatprep.subr.bf16.mxu1 %v1485_v1  ;;  %v2502_v43 = vadd.f32 %v6881_v35, %v9005_v46  ;;  %v6884_v44 = vadd.f32 %v6883_v39, %v6882_v36  ;;  %v6510_v46 = vcombine.low %v9037_v13, %v9037_v13 }
 0x1cc   : > { %v6912_v45 = vadd.f32 %v6911_v40, %v6910_v37 }
 0x1cd   : > { %v2550_v16 = vadd.f32 %v6909_v9, %v2502_v43  ;;  %v2505_v47 = vadd.f32 %v6884_v44, %v9011_v52  ;;  %7268 = vmatpush3.bf16.msra.mxu0 %v1477_v38 }
 0x1ce   : > { %7741 = vmatpush3.bf16.msra.mxu1 %v1477_v38  ;;  %7269 = vmatprep.subr.bf16.mxu0 %v1486_v41 }
 0x1cf   : > { %7734 = vmatprep.subr.bf16.mxu1 %v1486_v41  ;;  %v2553_v51 = vadd.f32 %v6912_v45, %v2505_v47  ;;  %v6885_v21 = vpop.f32.mrb[44].mxu0 }
 0x1d0   : > { %v6913_v25 = vpop.f32.mrb[44].mxu1  ;;  %v6886_v53 = vpop.f32.mrb[45].mxu0 }
 0x1d1   : > { %v6914_v54 = vpop.f32.mrb[45].mxu1  ;;  %v6887_v32 = vadd.f32 %v6886_v53, %v6885_v21  ;;  %7270 = vmatpush3.bf16.msra.mxu0 %v1478_v48  ;;  %v6888_v57 = vpop.f32.mrb[46].mxu0 }
 0x1d2   : > { %7742 = vmatpush3.bf16.msra.mxu1 %v1478_v48  ;;  %v6915_v52 = vadd.f32 %v6914_v54, %v6913_v25  ;;  %v6916_v58 = vpop.f32.mrb[46].mxu1  ;;  %v6889_v33 = vpop.f32.mrb[47].mxu0 }
 0x1d3   : > { %v6917_v59 = vpop.f32.mrb[47].mxu1  ;;  %v2510_v60 = vadd.f32 %v6887_v32, %v9029_v10 }
 0x1d4   : > { %3172 = vmatmul.mubr.bf16.vlgmr.msra.gmra.mrb[96].mxu0 %v7878_v55 }
 0x1d5   : > { %3180 = vmatmul.mubr.bf16.vlgmr.msra.gmra.mrb[96].mxu1 %v6510_v46  ;;  %v2558_v61 = vadd.f32 %v6915_v52, %v2510_v60 }
 0x1e7   : > { %v6935_v62 = vpop.f32.mrb[48].mxu0 }
 0x1e8   : > { %v6963_v63 = vpop.f32.mrb[48].mxu1  ;;  %v6936_v0 = vpop.f32.mrb[49].mxu0 }
 0x1e9   : > { %v6964_v2 = vpop.f32.mrb[49].mxu1  ;;  %v6937_v3 = vadd.f32 %v6936_v0, %v6935_v62  ;;  %v6938_v42 = vpop.f32.mrb[50].mxu0 }
 0x1ea   : > { %v6965_v4 = vadd.f32 %v6964_v2, %v6963_v63  ;;  %v6966_v5 = vpop.f32.mrb[50].mxu1  ;;  %v6939_v6 = vpop.f32.mrb[51].mxu0 }
 0x1eb   : > { %v6967_v7 = vpop.f32.mrb[51].mxu1  ;;  %v2598_v49 = vadd.f32 %v6937_v3, %v2550_v16  ;;  %v6940_v11 = vadd.f32 %v6939_v6, %v6938_v42 }
 0x1ec   : > { %v6968_v56 = vadd.f32 %v6967_v7, %v6966_v5 }
 0x1ed   : > { %v2646_v50 = vadd.f32 %v6965_v4, %v2598_v49  ;;  %v2601_v12 = vadd.f32 %v6940_v11, %v2553_v51 }
 0x1ef   : > { %v2649_v13 = vadd.f32 %v6968_v56, %v2601_v12  ;;  %v6941_v10 = vpop.f32.mrb[52].mxu0 }
 0x1f0   : > { %v6969_v14 = vpop.f32.mrb[52].mxu1  ;;  %v6942_v15 = vpop.f32.mrb[53].mxu0 }
 0x1f1   : > { %v6970_v17 = vpop.f32.mrb[53].mxu1  ;;  %v6943_v18 = vadd.f32 %v6942_v15, %v6941_v10  ;;  %v6944_v20 = vpop.f32.mrb[54].mxu0 }
 0x1f2   : > { %v6971_v19 = vadd.f32 %v6970_v17, %v6969_v14  ;;  %v6972_v22 = vpop.f32.mrb[54].mxu1  ;;  %v6945_v23 = vpop.f32.mrb[55].mxu0 }
 0x1f3   : > { %v6973_v24 = vpop.f32.mrb[55].mxu1  ;;  %v2606_v26 = vadd.f32 %v6943_v18, %v2558_v61 }
 0x1f5   : > { %v2654_v27 = vadd.f32 %v6971_v19, %v2606_v26 }
 0x207   : > { %v6991_v28 = vpop.f32.mrb[56].mxu0 }
 0x208   : > { %v7019_v1 = vpop.f32.mrb[56].mxu1  ;;  %v6992_v29 = vpop.f32.mrb[57].mxu0 }
 0x209   : > { %v7020_v30 = vpop.f32.mrb[57].mxu1  ;;  %v6993_v31 = vadd.f32 %v6992_v29, %v6991_v28  ;;  %v6994_v8 = vpop.f32.mrb[58].mxu0 }
 0x20a   : > { %v7021_v34 = vadd.f32 %v7020_v30, %v7019_v1  ;;  %v7022_v35 = vpop.f32.mrb[58].mxu1  ;;  %v6995_v9 = vpop.f32.mrb[59].mxu0 }
 0x20b   : > { %v7023_v36 = vpop.f32.mrb[59].mxu1  ;;  %v2694_v37 = vadd.f32 %v6993_v31, %v2646_v50  ;;  %v6996_v38 = vadd.f32 %v6995_v9, %v6994_v8 }
 0x20c   : > { %v7024_v39 = vadd.f32 %v7023_v36, %v7022_v35 }
 0x20d   : > { %v2742_v40 = vadd.f32 %v7021_v34, %v2694_v37  ;;  %v2697_v41 = vadd.f32 %v6996_v38, %v2649_v13 }
 0x20f   : > { %v2745_v43 = vadd.f32 %v7024_v39, %v2697_v41  ;;  %v6997_v44 = vpop.f32.mrb[60].mxu0 }
 0x210   : > { %v7025_v45 = vpop.f32.mrb[60].mxu1  ;;  %v6998_v16 = vpop.f32.mrb[61].mxu0 }
 0x211   : > { %v7026_v47 = vpop.f32.mrb[61].mxu1  ;;  %v6999_v48 = vadd.f32 %v6998_v16, %v6997_v44  ;;  %v7000_v21 = vpop.f32.mrb[62].mxu0 }
 0x212   : > { %v7027_v51 = vadd.f32 %v7026_v47, %v7025_v45  ;;  %v7028_v25 = vpop.f32.mrb[62].mxu1  ;;  %v7001_v53 = vpop.f32.mrb[63].mxu0 }
 0x213   : > { %v7029_v54 = vpop.f32.mrb[63].mxu1  ;;  %v2702_v55 = vadd.f32 %v6999_v48, %v2654_v27 }
 0x215   : > { %v2750_v46 = vadd.f32 %v7027_v51, %v2702_v55 }
 0x227   : > { %v7047_v32 = vpop.f32.mrb[64].mxu0 }
 0x228   : > { %v7075_v52 = vpop.f32.mrb[64].mxu1  ;;  %v7048_v57 = vpop.f32.mrb[65].mxu0 }
 0x229   : > { %v7076_v58 = vpop.f32.mrb[65].mxu1  ;;  %v7049_v33 = vadd.f32 %v7048_v57, %v7047_v32  ;;  %v7050_v60 = vpop.f32.mrb[66].mxu0 }
 0x22a   : > { %v7077_v59 = vadd.f32 %v7076_v58, %v7075_v52  ;;  %v7078_v61 = vpop.f32.mrb[66].mxu1  ;;  %v7051_v62 = vpop.f32.mrb[67].mxu0 }
 0x22b   : > { %v7079_v63 = vpop.f32.mrb[67].mxu1  ;;  %v2790_v0 = vadd.f32 %v7049_v33, %v2742_v40  ;;  %v7052_v2 = vadd.f32 %v7051_v62, %v7050_v60 }
 0x22c   : > { %v7080_v3 = vadd.f32 %v7079_v63, %v7078_v61 }
 0x22d   : > { %v2838_v4 = vadd.f32 %v7077_v59, %v2790_v0  ;;  %v2793_v42 = vadd.f32 %v7052_v2, %v2745_v43 }
 0x22f   : > { %v2841_v5 = vadd.f32 %v7080_v3, %v2793_v42  ;;  %v7053_v6 = vpop.f32.mrb[68].mxu0 }
 0x230   : > { %v7081_v7 = vpop.f32.mrb[68].mxu1  ;;  %v7054_v49 = vpop.f32.mrb[69].mxu0 }
 0x231   : > { %v7082_v11 = vpop.f32.mrb[69].mxu1  ;;  %v7055_v56 = vadd.f32 %v7054_v49, %v7053_v6  ;;  %v7056_v12 = vpop.f32.mrb[70].mxu0 }
 0x232   : > { %v7083_v50 = vadd.f32 %v7082_v11, %v7081_v7  ;;  %v7084_v13 = vpop.f32.mrb[70].mxu1  ;;  %v7057_v10 = vpop.f32.mrb[71].mxu0 }
 0x233   : > { %v7085_v14 = vpop.f32.mrb[71].mxu1  ;;  %v2798_v15 = vadd.f32 %v7055_v56, %v2750_v46 }
 0x235   : > { %v2846_v17 = vadd.f32 %v7083_v50, %v2798_v15 }
 0x247   : > { %v7103_v18 = vpop.f32.mrb[72].mxu0 }
 0x248   : > { %v7131_v19 = vpop.f32.mrb[72].mxu1  ;;  %v7104_v20 = vpop.f32.mrb[73].mxu0 }
 0x249   : > { %v7132_v22 = vpop.f32.mrb[73].mxu1  ;;  %v7105_v23 = vadd.f32 %v7104_v20, %v7103_v18  ;;  %v7106_v26 = vpop.f32.mrb[74].mxu0 }
 0x24a   : > { %v7133_v24 = vadd.f32 %v7132_v22, %v7131_v19  ;;  %v7134_v27 = vpop.f32.mrb[74].mxu1  ;;  %v7107_v28 = vpop.f32.mrb[75].mxu0 }
 0x24b   : > { %v7135_v1 = vpop.f32.mrb[75].mxu1  ;;  %v2886_v29 = vadd.f32 %v7105_v23, %v2838_v4  ;;  %v7108_v30 = vadd.f32 %v7107_v28, %v7106_v26 }
 0x24c   : > { %v7136_v31 = vadd.f32 %v7135_v1, %v7134_v27 }
 0x24d   : > { %v2934_v34 = vadd.f32 %v7133_v24, %v2886_v29  ;;  %v2889_v8 = vadd.f32 %v7108_v30, %v2841_v5 }
 0x24f   : > { %v2937_v35 = vadd.f32 %v7136_v31, %v2889_v8  ;;  %v7109_v9 = vpop.f32.mrb[76].mxu0 }
 0x250   : > { %v7137_v36 = vpop.f32.mrb[76].mxu1  ;;  %v7110_v37 = vpop.f32.mrb[77].mxu0 }
 0x251   : > { %v7138_v38 = vpop.f32.mrb[77].mxu1  ;;  %v7111_v39 = vadd.f32 %v7110_v37, %v7109_v9  ;;  %v7112_v41 = vpop.f32.mrb[78].mxu0 }
 0x252   : > { %v7139_v40 = vadd.f32 %v7138_v38, %v7137_v36  ;;  %v7140_v43 = vpop.f32.mrb[78].mxu1  ;;  %v7113_v44 = vpop.f32.mrb[79].mxu0 }
 0x253   : > { %v7141_v45 = vpop.f32.mrb[79].mxu1  ;;  %v2894_v16 = vadd.f32 %v7111_v39, %v2846_v17 }
 0x255   : > { %v2942_v47 = vadd.f32 %v7139_v40, %v2894_v16 }
 0x267   : > { %v7159_v48 = vpop.f32.mrb[80].mxu0 }
 0x268   : > { %v7187_v51 = vpop.f32.mrb[80].mxu1  ;;  %v7160_v21 = vpop.f32.mrb[81].mxu0 }
 0x269   : > { %v7188_v25 = vpop.f32.mrb[81].mxu1  ;;  %v7161_v53 = vadd.f32 %v7160_v21, %v7159_v48  ;;  %v7162_v55 = vpop.f32.mrb[82].mxu0  ;;  %v6512_v48 = vld [vmem:[%s9877_s13] ss:$0 sm:$0xff] }
 0x26a   : > { %v7189_v54 = vadd.f32 %v7188_v25, %v7187_v51  ;;  %v7190_v46 = vpop.f32.mrb[82].mxu1  ;;  %v7163_v32 = vpop.f32.mrb[83].mxu0 }
 0x26b   : > { %v7191_v52 = vpop.f32.mrb[83].mxu1  ;;  %v2982_v57 = vadd.f32 %v7161_v53, %v2934_v34  ;;  %v7164_v58 = vadd.f32 %v7163_v32, %v7162_v55  ;;  %v6513_v55 = vld [vmem:[%s9878_s28] ss:$0 sm:$0xff] }
 0x26c   : > { %v7192_v33 = vadd.f32 %v7191_v52, %v7190_v46  ;;  %v3216_v46 = vld [vmem:[%s9879_s5] sm:$0xff] }
 0x26d   : > { %v3030_v59 = vadd.f32 %v7189_v54, %v2982_v57  ;;  %v2985_v60 = vadd.f32 %v7164_v58, %v2937_v35 }
 0x26f   : > { %v3033_v61 = vadd.f32 %v7192_v33, %v2985_v60  ;;  %v7165_v62 = vpop.f32.mrb[84].mxu0  ;;  %v3219_v33 = vcombine.high %v3216_v46, %v3216_v46 }
 0x270   : > { %v7193_v63 = vpop.f32.mrb[84].mxu1  ;;  %v7166_v0 = vpop.f32.mrb[85].mxu0 }
 0x271   : > { %v7194_v2 = vpop.f32.mrb[85].mxu1  ;;  %v7167_v3 = vadd.f32 %v7166_v0, %v7165_v62  ;;  %v7168_v42 = vpop.f32.mrb[86].mxu0 }
 0x272   : > { %v7195_v4 = vadd.f32 %v7194_v2, %v7193_v63  ;;  %v7196_v5 = vpop.f32.mrb[86].mxu1  ;;  %v7169_v6 = vpop.f32.mrb[87].mxu0 }
 0x273   : > { %v7197_v7 = vpop.f32.mrb[87].mxu1  ;;  %v2990_v49 = vadd.f32 %v7167_v3, %v2942_v47 }
 0x275   : > { %v3038_v11 = vadd.f32 %v7195_v4, %v2990_v49 }
 0x287   : > { %v7215_v56 = vpop.f32.mrb[88].mxu0 }
 0x288   : > { %v7243_v50 = vpop.f32.mrb[88].mxu1  ;;  %v7216_v12 = vpop.f32.mrb[89].mxu0 }
 0x289   : > { %v7244_v13 = vpop.f32.mrb[89].mxu1  ;;  %v7217_v10 = vadd.f32 %v7216_v12, %v7215_v56  ;;  %v7218_v15 = vpop.f32.mrb[90].mxu0 }
 0x28a   : > { %v7245_v14 = vadd.f32 %v7244_v13, %v7243_v50  ;;  %v7246_v17 = vpop.f32.mrb[90].mxu1  ;;  %v7219_v18 = vpop.f32.mrb[91].mxu0 }
 0x28b   : > { %v7247_v19 = vpop.f32.mrb[91].mxu1  ;;  %v3078_v20 = vadd.f32 %v7217_v10, %v3030_v59  ;;  %v7220_v22 = vadd.f32 %v7219_v18, %v7218_v15 }
 0x28c   : > { %v7248_v23 = vadd.f32 %v7247_v19, %v7246_v17 }
 0x28d   : > { %v3126_v24 = vadd.f32 %v7245_v14, %v3078_v20  ;;  %v3081_v26 = vadd.f32 %v7220_v22, %v3033_v61  ;;  %v3217_v61 = vld [vmem:[%s9879_s5 + $0x8] sm:$0xf] }
 0x28f   : > { %v3129_v27 = vadd.f32 %v7248_v23, %v3081_v26  ;;  %v7221_v28 = vpop.f32.mrb[92].mxu0 }
 0x290   : > { %v7249_v1 = vpop.f32.mrb[92].mxu1  ;;  %v7222_v29 = vpop.f32.mrb[93].mxu0 }
 0x291   : > { %v7250_v30 = vpop.f32.mrb[93].mxu1  ;;  %v7223_v31 = vadd.f32 %v7222_v29, %v7221_v28  ;;  %v7224_v8 = vpop.f32.mrb[94].mxu0 }
 0x292   : > { %v7251_v34 = vadd.f32 %v7250_v30, %v7249_v1  ;;  %v7252_v35 = vpop.f32.mrb[94].mxu1  ;;  %v7225_v9 = vpop.f32.mrb[95].mxu0 }
 0x293   : > { %v7253_v36 = vpop.f32.mrb[95].mxu1  ;;  %v3086_v37 = vadd.f32 %v7223_v31, %v3038_v11 }
 0x295   : > { %v3134_v38 = vadd.f32 %v7251_v34, %v3086_v37 }
 0x2a7   : > { %v7271_v39 = vpop.f32.mrb[96].mxu0 }
 0x2a8   : > { %v7277_v40 = vpop.f32.mrb[96].mxu1  ;;  %v7272_v41 = vpop.f32.mrb[97].mxu0 }
 0x2a9   : > { %v7278_v43 = vpop.f32.mrb[97].mxu1  ;;  %v7273_v44 = vadd.f32 %v7272_v41, %v7271_v39  ;;  %v7274_v16 = vpop.f32.mrb[98].mxu0 }
 0x2aa   : > { %v7279_v45 = vadd.f32 %v7278_v43, %v7277_v40  ;;  %v7280_v47 = vpop.f32.mrb[98].mxu1  ;;  %v7275_v51 = vpop.f32.mrb[99].mxu0 }
 0x2ab   : > { %v7281_v21 = vpop.f32.mrb[99].mxu1  ;;  %v3174_v25 = vadd.f32 %v7273_v44, %v3126_v24  ;;  %v7276_v54 = vadd.f32 %v7275_v51, %v7274_v16 }
 0x2ac   : > { %v3182_v53 = vadd.f32 %v7279_v45, %v3134_v38 }
 0x2ad   : > { %v3194_v32 = vmul.f32 %v6512_v48, %v3174_v25  ;;  %v3177_v57 = vadd.f32 %v7276_v54, %v3129_v27 }
 0x2ae   : > { %v3196_v52 = vmul.f32 %v6512_v48, %v3182_v53 }
 0x2af   : > { %v3204_v58 = vadd.f32 %v6513_v55, %v3194_v32  ;;  %v3195_v60 = vmul.f32 %v6512_v48, %v3177_v57 }
 0x2b0   : > { %v3206_v59 = vadd.f32 %v6513_v55, %v3196_v52 }
 0x2b1   : > { %v3210_v62 = vcombine.high %v3204_v58, %v3204_v58  ;;  %v3205_v0 = vadd.f32 %v6513_v55, %v3195_v60  ;;  %v3221_v2 = vadd.f32 %v3216_v46, %v3204_v58 }
 0x2b2   : > { %v3212_v63 = vcombine.high %v3206_v59, %v3206_v59  ;;  %v3225_v4 = vadd.f32 %v3219_v33, %v3206_v59 }
 0x2b3   : > { %v3222_v3 = vadd.f32 %v3219_v33, %v3210_v62  ;;  %v3211_v5 = vcombine.high %v3205_v0, %v3205_v0  ;;  %v3223_v49 = vadd.f32 %v3217_v61, %v3205_v0 }
 0x2b4   : > { %v3226_v42 = vadd.f32 %v3217_v61, %v3212_v63 }
 0x2b5   : > { %v3233_v6 = vcombine.low %v3221_v2, %v3222_v3  ;;  %v3224_v11 = vadd.f32 %v3216_v46, %v3211_v5 }
 0x2b6   : > { %v3235_v7 = vcombine.low %v3225_v4, %v3226_v42 }
 0x2b7   : > { %3239 = vst [vmem:[%s9880_s20] sm:$0xff] %v3233_v6  ;;  %v3234_v56 = vcombine.low %v3223_v49, %v3224_v11 }
 0x2b8   : > { %3241 = vst [vmem:[%s9880_s20 + $0x10] sm:$0xff] %v3235_v7 }
 0x2b9   : > { %3240 = vst [vmem:[%s9880_s20 + $0x8] sm:$0xff] %v3234_v56 }
 0x2ba PF: > { %v3248_v50 = vld [vmem:[%s8122_s23 + $0x8] sm:$0xff]  ;;  %v3247_v12 = vld [vmem:[%s8122_s23] sm:$0xff]  ;;  %v7986_v15 = vmov 0   ;;  %s9881_s0 = sld [smem:[#allocation21_spill]]  ;;  %v3249_v20 = vld [vmem:[%s8122_s23 + $0x10] sm:$0xff]  ;;  %v3384_v46 = vlaneseq  ;;  %vm3601_vm0 = vcmask 261120   ;;  %s9887_s14 = scalar_lea.vmem %s9824_s9, %s8109_s26 }
 0x2bb   : > { %v3260_v13 = vunpack.c.l.s8.bf16 %v3248_v50  ;;  %v3263_v10 = vunpack.c.h.s8.bf16 %v3248_v50  ;;  %v3259_v14 = vunpack.c.l.s8.bf16 %v3247_v12  ;;  %3315 = vmatprep.mubr.bf16.mxu0 %v7986_v15  ;;  %v3251_v17 = vld [vmem:[%s8122_s23 + $0x20] sm:$0xff]  ;;  %v3262_v22 = vunpack.c.h.s8.bf16 %v3247_v12  ;;  %v3250_v24 = vld [vmem:[%s8122_s23 + $0x18] sm:$0xff]  ;;  %v3252_v1 = vld [vmem:[%s8122_s23 + $0x28] sm:$0xff]  ;;  %s7989_s12 = smov 32   ;;  %s9886_s20 = sld [smem:[#allocation3_spill]] }
 0x2bc   : > { %v3266_v23 = vunpack.c.l.s8.bf16 %v3251_v17  ;;  %v3261_v27 = vunpack.c.l.s8.bf16 %v3249_v20  ;;  %v3264_v28 = vunpack.c.h.s8.bf16 %v3249_v20  ;;  %v3265_v29 = vunpack.c.l.s8.bf16 %v3250_v24  ;;  %v3254_v34 = vld [vmem:[%s8122_s23 + $0x38] sm:$0xff]  ;;  %v3253_v9 = vld [vmem:[%s8122_s23 + $0x30] sm:$0xff]  ;;  %v3255_v37 = vld [vmem:[%s8122_s23 + $0x40] sm:$0xff]  ;;  %s9888_s2 = scalar_lea.vmem %s9825_s10, %s8109_s26 }
 0x2bd   : > { %3283 = vmatprep.subr.bf16.mxu0 %v3260_v13  ;;  %v3269_v30 = vunpack.c.h.s8.bf16 %v3251_v17  ;;  %v3267_v31 = vunpack.c.l.s8.bf16 %v3252_v1  ;;  %v3268_v8 = vunpack.c.h.s8.bf16 %v3250_v24  ;;  %v3272_v35 = vunpack.c.l.s8.bf16 %v3254_v34  ;;  %v3257_v41 = vld [vmem:[%s8122_s23 + $0x50] sm:$0xff]  ;;  %v3256_v45 = vld [vmem:[%s8122_s23 + $0x48] sm:$0xff]  ;;  %v3258_v47 = vld [vmem:[%s8122_s23 + $0x58] sm:$0xff] }
 0x2be   : > { %3284 = vmatpush1.bf16.msra.mxu0 %v3259_v14  ;;  %7479 = vmatprep.subr.bf16.mxu1 %v3261_v27  ;;  %v3270_v36 = vunpack.c.h.s8.bf16 %v3252_v1  ;;  %v3271_v38 = vunpack.c.l.s8.bf16 %v3253_v9  ;;  %v3275_v39 = vunpack.c.h.s8.bf16 %v3254_v34  ;;  %v3273_v40 = vunpack.c.l.s8.bf16 %v3255_v37  ;;  %v9114_v57 = vld [vmem:[%s8131_s19] sm:$0x7]  ;;  %s7987_s19 = smov 64   ;;  %vm9136_vm1 = vmpackc.low %vm3601_vm0, %vm3601_vm0 }
 0x2bf   : > { %3285 = vmatprep.subr.bf16.mxu0 %v3263_v10  ;;  %7480 = vmatpush3.bf16.msra.mxu1 %v3261_v27  ;;  %v3274_v43 = vunpack.c.h.s8.bf16 %v3253_v9  ;;  %v3278_v44 = vunpack.c.l.s8.bf16 %v3257_v41  ;;  %v3276_v16 = vunpack.c.h.s8.bf16 %v3255_v37  ;;  %v3277_v48 = vunpack.c.l.s8.bf16 %v3256_v45  ;;  %v9120_v33 = vld [vmem:[%s8136_s3] sm:$0x7]  ;;  %s7988_s3 = smov 96  }
 0x2c0   : > { %v3242_v18 = vld [vmem:[%s9881_s0] sm:$0xff]  ;;  %v3243_v19 = vld [vmem:[%s9881_s0 + $0x8] sm:$0xff]  ;;  %7481 = vmatprep.subr.bf16.mxu1 %v3264_v28  ;;  %v3281_v51 = vunpack.c.h.s8.bf16 %v3257_v41  ;;  %v3279_v21 = vunpack.c.l.s8.bf16 %v3258_v47  ;;  %v3280_v25 = vunpack.c.h.s8.bf16 %v3256_v45  ;;  %v3282_v53 = vunpack.c.h.s8.bf16 %v3258_v47  ;;  %v3244_v54 = vld [vmem:[%s9881_s0 + $0x10] sm:$0xff] }
 0x2c1   : > { %v3245_v26 = vpack.c.bf16 %v3243_v19, %v3242_v18  ;;  %v3246_v55 = vpack.c.bf16 %v3244_v54, %v3244_v54  ;;  %v9108_v32 = vshrl.u32 %v3384_v46, 7  ;;  %vm4487_vm2 = vcmask 1043456  }
 0x2c2   : > { %3286 = vmatpush1.bf16.msra.mxu0 %v3262_v22  ;;  %vm7990_vm3 = vmmov 1   ;;  %vm4305_vm5 = vcmask 93184   ;;  %vm4301_vm6 = vcmask 97280   ;;  %vm5212_vm7 = vcmask 523264  }
 0x2c3   : > { %7495 = vmatprep.mubr.bf16.mxu1 %v3245_v26  ;;  %3287 = vmatprep.subr.bf16.mxu0 %v3266_v23  ;;  %v9111_v52 = vsub.s32 0, %v9108_v32  ;;  %v9117_v58 = vsub.s32 1, %v9108_v32  ;;  %vm9247_vm4 = vmpackc.low %vm4487_vm2, %vm7990_vm3  ;;  %vm5217_vm8 = vcmask 785408  }
 0x2c4   : > { %7482 = vmatpush3.bf16.msra.mxu1 %v3264_v28 }
 0x2c5   : > { %7483 = vmatprep.subr.bf16.mxu1 %v3267_v31  ;;  %v3387_v59 = vrot.slane %v9114_v57, %v9111_v52  ;;  %v3391_v60 = vrot.slane %v9114_v57, %v9117_v58  ;;  %v3413_v61 = vrot.slane %v9120_v33, %v9111_v52  ;;  %v3417_v63 = vrot.slane %v9120_v33, %v9117_v58 }
 0x2c6   : > { %3288 = vmatpush1.bf16.msra.mxu0 %v3265_v29 }
 0x2c7   : > { %3289 = vmatprep.subr.bf16.mxu0 %v3269_v30 }
 0x2c8   : > { %7484 = vmatpush3.bf16.msra.mxu1 %v3267_v31 }
 0x2c9   : > { %7485 = vmatprep.subr.bf16.mxu1 %v3270_v36 }
 0x2ca   : > { %3290 = vmatpush1.bf16.msra.mxu0 %v3268_v8 }
 0x2cb   : > { %3291 = vmatprep.subr.bf16.mxu0 %v3272_v35 }
 0x2cc   : > { %7486 = vmatpush3.bf16.msra.mxu1 %v3270_v36 }
 0x2cd   : > { %7487 = vmatprep.subr.bf16.mxu1 %v3273_v40 }
 0x2ce   : > { %3292 = vmatpush1.bf16.msra.mxu0 %v3271_v38 }
 0x2cf   : > { %3293 = vmatprep.subr.bf16.mxu0 %v3275_v39 }
 0x2d0   : > { %7488 = vmatpush3.bf16.msra.mxu1 %v3273_v40 }
 0x2d1   : > { %7489 = vmatprep.subr.bf16.mxu1 %v3276_v16 }
 0x2d2   : > { %3294 = vmatpush1.bf16.msra.mxu0 %v3274_v43 }
 0x2d3   : > { %3295 = vmatprep.subr.bf16.mxu0 %v3278_v44 }
 0x2d4   : > { %7490 = vmatpush3.bf16.msra.mxu1 %v3276_v16 }
 0x2d5   : > { %7491 = vmatprep.subr.bf16.mxu1 %v3279_v21 }
 0x2d6   : > { %3296 = vmatpush1.bf16.msra.mxu0 %v3277_v48  ;;  %v9167_v48 = vsub.s32 2, %v9108_v32 }
 0x2d7   : > { %3297 = vmatprep.subr.bf16.mxu0 %v3281_v51 }
 0x2d8   : > { %7492 = vmatpush3.bf16.msra.mxu1 %v3279_v21  ;;  %v3395_v21 = vrot.slane %v9114_v57, %v9167_v48 }
 0x2d9   : > { %7493 = vmatprep.subr.bf16.mxu1 %v3282_v53 }
 0x2da   : > { %3298 = vmatpush1.bf16.msra.mxu0 %v3280_v25  ;;  %v3421_v25 = vrot.slane %v9120_v33, %v9167_v48 }
 0x2dc   : > { %7494 = vmatpush3.bf16.msra.mxu1 %v3282_v53 }
 0x2dd   : > { %3316 = vmatmul.mubr.bf16.vlgmr.msra.gmra.mrb[0].mxu0 %v3245_v26 }
 0x2de   : > { %3325 = vmatprep.mubr.bf16.mxu0 %v7986_v15 }
 0x2df   : > { %7496 = vmatmul.mubr.bf16.vlgmr.msra.gmra.mrb[0].mxu1 %v3246_v55 }
 0x2e5   : > { %3326 = vmatmul.mubr.bf16.gmra.mrb[4].mxu0 %v3246_v55 }
 0x3b0   : > { %v3317_v62 = vpop.f32.mrb[0].mxu0 }
 0x3b1   : > { %v3399_v0 = vmul.f32 %v3387_v59, %v3317_v62  ;;  %v3319_v2 = vpop.f32.mrb[1].mxu0 }
 0x3b2   : > { %v3400_v3 = vmul.f32 %v3391_v60, %v3319_v2  ;;  %v3321_v4 = vpop.f32.mrb[2].mxu0  ;;  %v7497_v47 = vpop.f32.mrb[0].mxu1 }
 0x3b3   : > { %v3425_v42 = vadd.f32 %v3413_v61, %v3399_v0  ;;  %v3402_v5 = vmul.f32 %v3387_v59, %v3321_v4  ;;  %v3323_v6 = vpop.f32.mrb[3].mxu0  ;;  %v3368_v51 = vpop.f32.mrb[1].mxu1  ;;  %v3407_v55 = vmul.f32 %v7497_v47, %v3395_v21 }
 0x3b4   : > { %v3426_v7 = vadd.f32 %v3417_v63, %v3400_v3  ;;  %v3403_v49 = vmul.f32 %v3391_v60, %v3323_v6  ;;  %v7498_v53 = vpop.f32.mrb[2].mxu1  ;;  %v3401_v46 = vmul.f32 %v3395_v21, %v3368_v51 }
 0x3b5   : > { %v3428_v11 = vadd.f32 %v3413_v61, %v3402_v5  ;;  %v3371_v54 = vpop.f32.mrb[3].mxu1 }
 0x3b6   : > { %v3443_v56 = vcombine.low %v3425_v42, %v3426_v7  ;;  %v3444_v50 = vcombine.high %v3425_v42, %v3426_v7  ;;  %v3429_v12 = vadd.f32 %v3417_v63, %v3403_v49 }
 0x3b8   : > { %v3446_v13 = vcombine.low %v3428_v11, %v3429_v12  ;;  %v3447_v10 = vcombine.high %v3428_v11, %v3429_v12  ;;  %3478 = vrot.lane.b32.xlu1 %v3444_v50, %s7987_s19  ;;  %3458 = vrot.lane.b32.xlu0 %v3443_v56, %s7988_s3  ;;  %v3327_v14 = vpop.f32.mrb[4].mxu0  ;;  %v3512_v17 = vmul.f32 0.17677669, %v3443_v56  ;;  %v3513_v18 = vmul.f32 0.17677669, %v3444_v50 }
 0x3b9   : > { %v3405_v19 = vmul.f32 %v3387_v59, %v3327_v14  ;;  %v3329_v20 = vpop.f32.mrb[5].mxu0  ;;  %v3536_v22 = vrot.slane %v3443_v56, 4  ;;  %v3537_v23 = vrot.slane %v3444_v50, 4  ;;  %v3404_v59 = vmul.f32 %v3395_v21, %v3371_v54 }
 0x3ba   : > { %v3406_v24 = vmul.f32 %v3391_v60, %v3329_v20  ;;  %v3331_v26 = vpop.f32.mrb[6].mxu0  ;;  %v3599_v27 = vcombine.low %v3512_v17, %v3513_v18  ;;  %v3538_v28 = vrot.slane %v3446_v13, 4  ;;  %v3539_v36 = vrot.slane %v3447_v10, 4 }
 0x3bb   : > { %v3431_v1 = vadd.f32 %v3413_v61, %v3405_v19  ;;  %v3332_v29 = vpop.f32.mrb[7].mxu0  ;;  %v3600_v30 = vcombine.low %v3536_v22, %v3537_v23  ;;  %v3515_v39 = vmul.f32 0.17677669, %v3447_v10  ;;  %v3514_v45 = vmul.f32 0.17677669, %v3446_v13 }
 0x3bc   : > { %v3432_v31 = vadd.f32 %v3417_v63, %v3406_v24  ;;  %3460 = vrot.lane.b32.xlu0 %v3444_v50, %s7988_s3  ;;  %7503 = vmatprep.mubr.msk.f32.mxu1 %vm3601_vm0, %v3599_v27  ;;  %v9173_v60 = vadd.f32 %v3421_v25, %v3407_v55  ;;  %v9175_v61 = vadd.f32 %v3421_v25, %v3401_v46 }
 0x3bd   : > { %3462 = vrot.lane.b32.xlu1 %v3446_v13, %s7988_s3  ;;  %v7631_v8 = vpack.c.bf16 %v3538_v28, %v3600_v30  ;;  %v9177_v62 = vadd.f32 %v3421_v25, %v3404_v59 }
 0x3be   : > { %v3449_v35 = vcombine.low %v3431_v1, %v3432_v31  ;;  %v3450_v9 = vcombine.high %v3431_v1, %v3432_v31  ;;  %v9187_v33 = vcombine.high %v9175_v61, %v9175_v61  ;;  %v9191_v63 = vcombine.high %v9173_v60, %v9173_v60 }
 0x3bf   : > { %7633 = vmatprep.subr.msk.bf16.mxu1 %vm9136_vm1, %v7631_v8  ;;  %v9183_v57 = vcombine.high %v9177_v62, %v9177_v62 }
 0x3c0   : > { %7636 = vmatpush3.bf16.xpose.msk.msra.mxu1 %vm9136_vm1, %v7631_v8  ;;  %3476 = vrot.lane.b32.xlu0 %v3443_v56, %s7987_s19  ;;  %v3540_v37 = vrot.slane %v3449_v35, 4  ;;  %v3541_v38 = vrot.slane %v3450_v9, 4  ;;  %v3516_v40 = vmul.f32 0.17677669, %v3449_v35  ;;  %v3517_v16 = vmul.f32 0.17677669, %v3450_v9 }
 0x3c1   : > { %3464 = vrot.lane.b32.xlu1 %v3447_v10, %s7988_s3  ;;  %v9197_v0 = vpack.i.bf16 %v9191_v63, %v9177_v62 }
 0x3c2   : > { %v3689_v41 = vcombine.low %v3539_v36, %v3540_v37  ;;  %v3688_v43 = vcombine.low %v3515_v39, %v3516_v40 }
 0x3c4   : > { %3466 = vrot.lane.b32.xlu0 %v3449_v35, %s7988_s3  ;;  %v7637_v44 = vpack.c.bf16 %v3541_v38, %v3689_v41 }
 0x3c5   : > { %3468 = vrot.lane.b32.xlu1 %v3450_v9, %s7988_s3 }
 0x3c6   : > { %7639 = vmatprep.subr.msk.bf16.mxu1 %vm9136_vm1, %v7637_v44 }
 0x3c7   : > { %7504 = vmatmul.mubr.msk.f32.vlgmr.msra.gmra.mrb[4].mxu1 %vm3601_vm0, %v3514_v45 }
 0x3c8   : > { %7642 = vmatpush3.bf16.xpose.msk.msra.mxu1 %vm9136_vm1, %v7637_v44  ;;  %7510 = vmatprep.mubr.msk.f32.mxu1 %vm3601_vm0, %v3688_v43 }
 0x3c9   : > { %3496 = vrot.lane.b32.xlu1 %v3444_v50, %s7989_s12  ;;  %3482 = vrot.lane.b32.xlu0 %v3447_v10, %s7987_s19 }
 0x3cd   : > { %3484 = vrot.lane.b32.xlu1 %v3449_v35, %s7987_s19  ;;  %3480 = vrot.lane.b32.xlu0 %v3446_v13, %s7987_s19 }
 0x3cf   : > { %7511 = vmatmul.mubr.msk.f32.vlgmr.msra.gmra.mrb[6].mxu1 %vm3601_vm0, %v3517_v16 }
 0x3d1   : > { %3486 = vrot.lane.b32.xlu1 %v3450_v9, %s7987_s19  ;;  %3494 = vrot.lane.b32.xlu0 %v3443_v56, %s7989_s12 }
 0x3d5   : > { %3502 = vrot.lane.b32.xlu1 %v3449_v35, %s7989_s12  ;;  %3500 = vrot.lane.b32.xlu0 %v3447_v10, %s7989_s12 }
 0x3d9   : > { %3504 = vrot.lane.b32.xlu1 %v3450_v9, %s7989_s12  ;;  %3498 = vrot.lane.b32.xlu0 %v3446_v13, %s7989_s12 }
 0x3dd   : > { %3560 = vrot.lane.b32.xlu1 %v9175_v61, %s7988_s3  ;;  %3562 = vrot.lane.b32.xlu0 %v9187_v33, %s7988_s3 }
 0x3e1   : > { %3566 = vrot.lane.b32.xlu1 %v9183_v57, %s7988_s3  ;;  %7885 = vrot.lane.b32.xlu0 %v9197_v0, %s7988_s3 }
 0x3e5   : > { %3568 = vrot.lane.b32.xlu1 %v9173_v60, %s7988_s3  ;;  %3574 = vrot.lane.b32.xlu0 %v9187_v33, %s7987_s19 }
 0x3e9   : > { %3572 = vrot.lane.b32.xlu1 %v9175_v61, %s7987_s19  ;;  %3580 = vrot.lane.b32.xlu0 %v9173_v60, %s7987_s19 }
 0x3ed   : > { %3578 = vrot.lane.b32.xlu1 %v9183_v57, %s7987_s19  ;;  %3584 = vrot.lane.b32.xlu0 %v9175_v61, %s7989_s12 }
 0x3f1   : > { %7890 = vrot.lane.b32.xlu1 %v9197_v0, %s7987_s19 }
 0x42a   : > { %v3479_v2 = vpop.permute.xlu1 %3478  ;;  %v3459_v3 = vpop.permute.xlu0 %3458 }
 0x42b   : > { %v3518_v42 = vmul.f32 0.17677669, %v3459_v3  ;;  %v3542_v5 = vrot.slane %v3459_v3, 4  ;;  %v3549_v31 = vrot.slane %v3479_v2, 4  ;;  %v3525_v41 = vmul.f32 0.17677669, %v3479_v2 }
 0x42e   : > { %v3461_v4 = vpop.permute.xlu0 %3460 }
 0x42f   : > { %v3519_v6 = vmul.f32 0.17677669, %v3461_v4  ;;  %v3543_v7 = vrot.slane %v3461_v4, 4  ;;  %v3463_v49 = vpop.permute.xlu1 %3462 }
 0x430   : > { %v3544_v50 = vrot.slane %v3463_v49, 4  ;;  %v3520_v26 = vmul.f32 0.17677669, %v3463_v49 }
 0x431   : > { %v3776_v11 = vcombine.low %v3518_v42, %v3519_v6  ;;  %v3777_v56 = vcombine.low %v3542_v5, %v3543_v7  ;;  %v4479_v6 = vcombine.low %v9175_v61, %v9187_v33 }
 0x432   : > { %v3477_v12 = vpop.permute.xlu0 %3476 }
 0x433   : > { %v7643_v13 = vpack.c.bf16 %v3544_v50, %v3777_v56  ;;  %v3465_v10 = vpop.permute.xlu1 %3464  ;;  %7517 = vmatprep.mubr.msk.f32.mxu1 %vm3601_vm0, %v3776_v11  ;;  %v3548_v27 = vrot.slane %v3477_v12, 4  ;;  %v3524_v8 = vmul.f32 0.17677669, %v3477_v12  ;;  %v7679_v61 = vpack.c.bf16 %v9177_v62, %v4479_v6 }
 0x434   : > { %v3545_v17 = vrot.slane %v3465_v10, 4  ;;  %v3521_v24 = vmul.f32 0.17677669, %v3465_v10  ;;  %v4565_v62 = vcombine.low %v9183_v57, %v9173_v60 }
 0x435   : > { %7645 = vmatprep.subr.msk.bf16.mxu1 %vm9136_vm1, %v7643_v13  ;;  %v3953_v35 = vcombine.low %v3548_v27, %v3549_v31  ;;  %v3952_v21 = vcombine.low %v3524_v8, %v3525_v41 }
 0x436   : > { %v3467_v14 = vpop.permute.xlu0 %3466  ;;  %7648 = vmatpush3.bf16.xpose.msk.msra.mxu1 %vm9136_vm1, %v7643_v13 }
 0x437   : > { %v3469_v18 = vpop.permute.xlu1 %3468  ;;  %v3546_v19 = vrot.slane %v3467_v14, 4  ;;  %v3522_v20 = vmul.f32 0.17677669, %v3467_v14 }
 0x438   : > { %v3547_v22 = vrot.slane %v3469_v18, 4  ;;  %v3523_v16 = vmul.f32 0.17677669, %v3469_v18 }
 0x439   : > { %v3865_v23 = vcombine.low %v3545_v17, %v3546_v19  ;;  %v3864_v30 = vcombine.low %v3521_v24, %v3522_v20 }
 0x43b   : > { %v7649_v28 = vpack.c.bf16 %v3547_v22, %v3865_v23  ;;  %v3497_v1 = vpop.permute.xlu1 %3496  ;;  %v3483_v29 = vpop.permute.xlu0 %3482 }
 0x43c   : > { %v3527_v37 = vmul.f32 0.17677669, %v3483_v29  ;;  %v3551_v43 = vrot.slane %v3483_v29, 4  ;;  %v3531_v42 = vmul.f32 0.17677669, %v3497_v1  ;;  %v3555_v5 = vrot.slane %v3497_v1, 4 }
 0x43d   : > { %7518 = vmatmul.mubr.msk.f32.vlgmr.msra.gmra.mrb[8].mxu1 %vm3601_vm0, %v3520_v26  ;;  %7651 = vmatprep.subr.msk.bf16.mxu1 %vm9136_vm1, %v7649_v28  ;;  %v9263_v26 = vpack.c.bf16 %v9191_v63, %v4565_v62 }
 0x43e   : > { %7654 = vmatpush3.bf16.xpose.msk.msra.mxu1 %vm9136_vm1, %v7649_v28  ;;  %7524 = vmatprep.mubr.msk.f32.mxu1 %vm3601_vm0, %v3864_v30 }
 0x43f   : > { %v3485_v9 = vpop.permute.xlu1 %3484  ;;  %v3481_v36 = vpop.permute.xlu0 %3480 }
 0x440   : > { %v3528_v38 = vmul.f32 0.17677669, %v3485_v9  ;;  %v3552_v39 = vrot.slane %v3485_v9, 4  ;;  %v3550_v40 = vrot.slane %v3481_v36, 4  ;;  %v3526_v7 = vmul.f32 0.17677669, %v3481_v36 }
 0x442   : > { %v4040_v44 = vcombine.low %v3527_v37, %v3528_v38  ;;  %v7655_v45 = vpack.c.bf16 %v3550_v40, %v3953_v35  ;;  %v4041_v25 = vcombine.low %v3551_v43, %v3552_v39 }
 0x443   : > { %v3487_v47 = vpop.permute.xlu1 %3486  ;;  %v3495_v51 = vpop.permute.xlu0 %3494 }
 0x444   : > { %v3553_v53 = vrot.slane %v3487_v47, 4  ;;  %7657 = vmatprep.subr.msk.bf16.mxu1 %vm9136_vm1, %v7655_v45  ;;  %7538 = vmatprep.mubr.msk.f32.mxu0 %vm3601_vm0, %v4040_v44  ;;  %v3530_v55 = vmul.f32 0.17677669, %v3495_v51  ;;  %v3554_v46 = vrot.slane %v3495_v51, 4  ;;  %v3529_v18 = vmul.f32 0.17677669, %v3487_v47 }
 0x445   : > { %7525 = vmatmul.mubr.msk.f32.vlgmr.msra.gmra.mrb[10].mxu1 %vm3601_vm0, %v3523_v16 }
 0x446   : > { %v7661_v54 = vpack.c.bf16 %v3553_v53, %v4041_v25  ;;  %7660 = vmatpush3.bf16.xpose.msk.msra.mxu1 %vm9136_vm1, %v7655_v45  ;;  %7531 = vmatprep.mubr.msk.f32.mxu1 %vm3601_vm0, %v3952_v21  ;;  %v4128_v49 = vcombine.low %v3530_v55, %v3531_v42  ;;  %v4129_v11 = vcombine.low %v3554_v46, %v3555_v5 }
 0x447   : > { %v3503_v59 = vpop.permute.xlu1 %3502  ;;  %v3501_v2 = vpop.permute.xlu0 %3500 }
 0x448   : > { %v3558_v3 = vrot.slane %v3503_v59, 4  ;;  %v3557_v4 = vrot.slane %v3501_v2, 4  ;;  %7663 = vmatprep.subr.msk.bf16.mxu0 %vm9136_vm1, %v7661_v54  ;;  %v3534_v56 = vmul.f32 0.17677669, %v3503_v59  ;;  %v3533_v13 = vmul.f32 0.17677669, %v3501_v2 }
 0x449   : > { %7666 = vmatpush3.bf16.xpose.msk.msra.mxu0 %vm9136_vm1, %v7661_v54 }
 0x44a   : > { %v4217_v10 = vcombine.low %v3557_v4, %v3558_v3  ;;  %v4216_v22 = vcombine.low %v3533_v13, %v3534_v56 }
 0x44b   : > { %v3505_v50 = vpop.permute.xlu1 %3504  ;;  %v3499_v12 = vpop.permute.xlu0 %3498 }
 0x44c   : > { %v3559_v14 = vrot.slane %v3505_v50, 4  ;;  %v3556_v17 = vrot.slane %v3499_v12, 4  ;;  %v3532_v24 = vmul.f32 0.17677669, %v3499_v12  ;;  %v3535_v27 = vmul.f32 0.17677669, %v3505_v50 }
 0x44d   : > { %7532 = vmatmul.mubr.msk.f32.vlgmr.msra.gmra.mrb[12].mxu1 %vm3601_vm0, %v3526_v7 }
 0x44e   : > { %v7673_v19 = vpack.c.bf16 %v3559_v14, %v4217_v10  ;;  %v7667_v20 = vpack.c.bf16 %v3556_v17, %v4129_v11  ;;  %7545 = vmatprep.mubr.msk.f32.mxu1 %vm3601_vm0, %v4128_v49 }
 0x44f   : > { %v3561_v34 = vpop.permute.xlu1 %3560  ;;  %v3563_v1 = vpop.permute.xlu0 %3562 }
 0x450   : > { %7539 = vmatmul.mubr.msk.f32.vlgmr.msra.gmra.mrb[8].mxu0 %vm3601_vm0, %v3529_v18  ;;  %7669 = vmatprep.subr.msk.bf16.mxu1 %vm9136_vm1, %v7667_v20  ;;  %v4650_v29 = vcombine.low %v3561_v34, %v3563_v1 }
 0x451   : > { %7675 = vmatprep.subr.msk.bf16.mxu0 %vm9136_vm1, %v7673_v19  ;;  %7672 = vmatpush3.bf16.xpose.msk.msra.mxu1 %vm9136_vm1, %v7667_v20 }
 0x452   : > { %7678 = vmatpush3.bf16.xpose.msk.msra.mxu0 %vm9136_vm1, %v7673_v19  ;;  %7552 = vmatprep.mubr.msk.f32.mxu0 %vm3601_vm0, %v4216_v22 }
 0x453   : > { %7681 = vmatprep.subr.msk.bf16.mxu1 %vm9247_vm4, %v7679_v61  ;;  %v3567_v28 = vpop.permute.xlu1 %3566  ;;  %v7886_v31 = vpop.permute.xlu0 %7885 }
 0x454   : > { %v7888_v8 = vunpack.i.h.bf16 %v7886_v31  ;;  %v7887_v35 = vunpack.i.l.bf16 %v7886_v31 }
 0x456   : > { %v7691_v39 = vpack.c.bf16 %v7887_v35, %v4650_v29 }
 0x457   : > { %v3569_v30 = vpop.permute.xlu1 %3568  ;;  %v3575_v43 = vpop.permute.xlu0 %3574 }
 0x458   : > { %7546 = vmatmul.mubr.msk.f32.vlgmr.msra.gmra.mrb[14].mxu1 %vm3601_vm0, %v3532_v24  ;;  %v4735_v63 = vcombine.low %v3567_v28, %v3569_v30  ;;  %7693 = vmatprep.subr.msk.bf16.mxu0 %vm9247_vm4, %v7691_v39 }
 0x459   : > { %7553 = vmatmul.mubr.msk.f32.vlgmr.msra.gmra.mrb[10].mxu0 %vm3601_vm0, %v3535_v27  ;;  %7684 = vmatpush3.bf16.msk.msra.mxu1 %vm9247_vm4, %v7679_v61 }
 0x45a   : > { %7687 = vmatprep.subr.msk.bf16.mxu1 %vm9247_vm4, %v9263_v26  ;;  %v9278_v38 = vpack.c.bf16 %v7888_v8, %v4735_v63  ;;  %7696 = vmatpush3.bf16.msk.msra.mxu0 %vm9247_vm4, %v7691_v39 }
 0x45b   : > { %v3573_v40 = vpop.permute.xlu1 %3572  ;;  %v9288_v45 = vpop.permute.xlu0 %3580 }
 0x45c   : > { %v4820_v25 = vcombine.low %v3573_v40, %v3575_v43 }
 0x45f   : > { %v9286_v44 = vpop.permute.xlu1 %3578  ;;  %v9350_v27 = vpop.permute.xlu0 %3584 }
 0x460   : > { %v4905_v16 = vcombine.low %v9286_v44, %v9288_v45 }
 0x463   : > { %v9293_v53 = vpop.permute.xlu1 %7890 }
 0x464   : > { %v7892_v54 = vunpack.i.l.bf16 %v9293_v53 }
 0x466   : > { %v9297_v46 = vpack.c.bf16 %v7892_v54, %v4820_v25 }
 0x468   : > { %7705 = vmatprep.subr.msk.bf16.mxu0 %vm9247_vm4, %v9297_v46 }
 0x49a   : > { %v9272_v9 = vpop.f32.mrb[4].mxu1 }
 0x49b   : > { %v9274_v36 = vpop.f32.mrb[5].mxu1  ;;  %v4306_v37 = vsel %vm4305_vm5, %v9272_v9, -inf }
 0x49c   : > { %4307 = vmax.xlane.f32.xlu1 %v4306_v37  ;;  %v4302_v41 = vsel %vm4301_vm6, %v9274_v36, -inf }
 0x49d   : > { %4303 = vmax.xlane.f32.xlu0 %v4302_v41 }
 0x4a2   : > { %v7512_v47 = vpop.f32.mrb[6].mxu1 }
 0x4a3   : > { %v3764_v51 = vpop.f32.mrb[7].mxu1  ;;  %v4312_v21 = vsel %vm4305_vm5, %v7512_v47, -inf }
 0x4a4   : > { %4313 = vmax.xlane.f32.xlu0 %v4312_v21  ;;  %v4309_v55 = vsel %vm4301_vm6, %v3764_v51, -inf }
 0x4a8   : > { %4310 = vmax.xlane.f32.xlu0 %v4309_v55 }
 0x510   : > { %v9302_v59 = vpop.f32.mrb[8].mxu1 }
 0x511   : > { %v9304_v2 = vpop.f32.mrb[9].mxu1  ;;  %v4318_v3 = vsel %vm4305_vm5, %v9302_v59, -inf }
 0x512   : > { %4319 = vmax.xlane.f32.xlu0 %v4318_v3  ;;  %v4315_v4 = vsel %vm4301_vm6, %v9304_v2, -inf }
 0x513   : > { %4316 = vmax.xlane.f32.xlu1 %v4315_v4 }
 0x518   : > { %v9310_v42 = vpop.f32.mrb[10].mxu1 }
 0x519   : > { %v9312_v5 = vpop.f32.mrb[11].mxu1  ;;  %v4324_v6 = vsel %vm4305_vm5, %v9310_v42, -inf }
 0x51a   : > { %4325 = vmax.xlane.f32.xlu0 %v4324_v6  ;;  %v4321_v7 = vsel %vm4301_vm6, %v9312_v5, -inf }
 0x51b   : > { %4322 = vmax.xlane.f32.xlu1 %v4321_v7 }
 0x520   : > { %v9318_v49 = vpop.f32.mrb[12].mxu1 }
 0x521   : > { %v9320_v11 = vpop.f32.mrb[13].mxu1  ;;  %v4330_v10 = vsel %vm4305_vm5, %v9318_v49, -inf }
 0x522   : > { %v4327_v14 = vsel %vm4301_vm6, %v9320_v11, -inf }
 0x523   : > { %v9322_v56 = vpop.f32.mrb[8].mxu0 }
 0x524   : > { %v9324_v50 = vpop.f32.mrb[9].mxu0  ;;  %v4336_v12 = vsel %vm4305_vm5, %v9322_v56, -inf }
 0x525   : > { %4337 = vmax.xlane.f32.xlu0 %v4336_v12  ;;  %v4333_v13 = vsel %vm4301_vm6, %v9324_v50, -inf }
 0x526   : > { %4334 = vmax.xlane.f32.xlu1 %v4333_v13 }
 0x529   : > { %4331 = vmax.xlane.f32.xlu0 %v4330_v10  ;;  %v4308_v1 = vpop.xlane.xlu1 %4307 }
 0x52a   : > { %4328 = vmax.xlane.f32.xlu1 %v4327_v14  ;;  %v4304_v34 = vpop.xlane.xlu0 %4303  ;;  %v4352_v29 = vsub.f32 %v9272_v9, %v4308_v1 }
 0x52b   : > { %v9334_v17 = vpop.f32.mrb[14].mxu1  ;;  %v4351_v30 = vsub.f32 %v9274_v36, %v4304_v34 }
 0x52c   : > { %v9336_v18 = vpop.f32.mrb[10].mxu0  ;;  %v9338_v19 = vpop.f32.mrb[15].mxu1  ;;  %v4342_v62 = vsel %vm4305_vm5, %v9334_v17, -inf  ;;  %v4369_v31 = vmul.f32 1.442695, %v4352_v29 }
 0x52d   : > { %v9340_v20 = vpop.f32.mrb[11].mxu0  ;;  %v4348_v61 = vsel %vm4305_vm5, %v9336_v18, -inf  ;;  %v4339_v24 = vsel %vm4301_vm6, %v9338_v19, -inf  ;;  %v4367_v35 = vmul.f32 1.442695, %v4351_v30 }
 0x52e   : > { %4349 = vmax.xlane.f32.xlu0 %v4348_v61  ;;  %v4345_v22 = vsel %vm4301_vm6, %v9340_v20, -inf  ;;  %7899 = vpow2.f32 %v4369_v31 }
 0x52f   : > { %4346 = vmax.xlane.f32.xlu1 %v4345_v22  ;;  %7901 = vpow2.f32 %v4367_v35 }
 0x531   : > { %v4314_v28 = vpop.xlane.xlu0 %4313 }
 0x532   : > { %4343 = vmax.xlane.f32.xlu0 %v4342_v62  ;;  %v4354_v8 = vsub.f32 %v7512_v47, %v4314_v28 }
 0x533   : > { %4340 = vmax.xlane.f32.xlu1 %v4339_v24 }
 0x534   : > { %v4373_v39 = vmul.f32 1.442695, %v4354_v8 }
 0x535   : > { %v4311_v63 = vpop.xlane.xlu0 %4310 }
 0x536   : > { %v4353_v37 = vsub.f32 %v3764_v51, %v4311_v63  ;;  %7903 = vpow2.f32 %v4373_v39 }
 0x538   : > { %v4371_v40 = vmul.f32 1.442695, %v4353_v37 }
 0x53a   : > { %7905 = vpow2.f32 %v4371_v40 }
 0x544   : > { %3586 = vrot.lane.b32.xlu1 %v9187_v33, %s7989_s12  ;;  %v9358_v33 = vpop.eup %7899 }
 0x545   : > { %v4402_v9 = vsel %vm4305_vm5, %v9358_v33, 0.0 }
 0x548   : > { %3590 = vrot.lane.b32.xlu0 %v9183_v57, %s7989_s12  ;;  %v9360_v57 = vpop.eup %7901 }
 0x549   : > { %v9364_v41 = vpop.eup %7903  ;;  %v4399_v36 = vsel %vm4301_vm6, %v9360_v57, 0.0 }
 0x54a   : > { %v9368_v43 = vpop.eup %7905  ;;  %v4408_v47 = vsel %vm4305_vm5, %v9364_v41, 0.0 }
 0x54b   : > { %v4405_v51 = vsel %vm4301_vm6, %v9368_v43, 0.0 }
 0x567   : > { %4403 = vadd.xlane.f32.xlu0 %v4402_v9 }
 0x568   : > { %4400 = vadd.xlane.f32.xlu1 %v4399_v36 }
 0x56b   : > { %4409 = vadd.xlane.f32.xlu0 %v4408_v47 }
 0x56c   : > { %4406 = vadd.xlane.f32.xlu1 %v4405_v51 }
 0x59f   : > { %v4320_v21 = vpop.xlane.xlu0 %4319 }
 0x5a0   : > { %v4356_v25 = vsub.f32 %v9302_v59, %v4320_v21  ;;  %v4317_v54 = vpop.xlane.xlu1 %4316 }
 0x5a1   : > { %v4355_v55 = vsub.f32 %v9304_v2, %v4317_v54 }
 0x5a2   : > { %v4377_v3 = vmul.f32 1.442695, %v4356_v25 }
 0x5a3   : > { %v4375_v4 = vmul.f32 1.442695, %v4355_v55 }
 0x5a4   : > { %7907 = vpow2.f32 %v4377_v3 }
 0x5a5   : > { %7909 = vpow2.f32 %v4375_v4 }
 0x5a7   : > { %v4326_v6 = vpop.xlane.xlu0 %4325 }
 0x5a8   : > { %v4358_v7 = vsub.f32 %v9310_v42, %v4326_v6  ;;  %v4323_v12 = vpop.xlane.xlu1 %4322 }
 0x5a9   : > { %v4357_v13 = vsub.f32 %v9312_v5, %v4323_v12 }
 0x5aa   : > { %v4381_v10 = vmul.f32 1.442695, %v4358_v7 }
 0x5ab   : > { %v4379_v14 = vmul.f32 1.442695, %v4357_v13 }
 0x5ac   : > { %7911 = vpow2.f32 %v4381_v10 }
 0x5ad   : > { %7913 = vpow2.f32 %v4379_v14 }
 0x5ae   : > { %v9378_v61 = vpop.eup %7907 }
 0x5af   : > { %v9380_v59 = vpop.eup %7909  ;;  %v4414_v2 = vsel %vm4305_vm5, %v9378_v61, 0.0 }
 0x5b0   : > { %4415 = vadd.xlane.f32.xlu0 %v4414_v2  ;;  %v4411_v22 = vsel %vm4301_vm6, %v9380_v59, 0.0 }
 0x5b1   : > { %4412 = vadd.xlane.f32.xlu1 %v4411_v22 }
 0x5b2   : > { %v4338_v42 = vpop.xlane.xlu0 %4337 }
 0x5b3   : > { %v4362_v62 = vsub.f32 %v9322_v56, %v4338_v42  ;;  %v4335_v5 = vpop.xlane.xlu1 %4334 }
 0x5b4   : > { %v4361_v24 = vsub.f32 %v9324_v50, %v4335_v5 }
 0x5b5   : > { %v4389_v34 = vmul.f32 1.442695, %v4362_v62 }
 0x5b6   : > { %v9388_v28 = vpop.eup %7911  ;;  %v4387_v1 = vmul.f32 1.442695, %v4361_v24  ;;  %v4332_v29 = vpop.xlane.xlu0 %4331 }
 0x5b7   : > { %v9390_v30 = vpop.eup %7913  ;;  %7915 = vpow2.f32 %v4389_v34  ;;  %v4360_v63 = vsub.f32 %v9318_v49, %v4332_v29  ;;  %v4329_v31 = vpop.xlane.xlu1 %4328  ;;  %v4420_v8 = vsel %vm4305_vm5, %v9388_v28, 0.0 }
 0x5b8   : > { %7917 = vpow2.f32 %v4387_v1  ;;  %v4359_v56 = vsub.f32 %v9320_v11, %v4329_v31  ;;  %4421 = vadd.xlane.f32.xlu0 %v4420_v8  ;;  %v4417_v50 = vsel %vm4301_vm6, %v9390_v30, 0.0 }
 0x5b9   : > { %v4385_v35 = vmul.f32 1.442695, %v4360_v63  ;;  %4418 = vadd.xlane.f32.xlu1 %v4417_v50 }
 0x5ba   : > { %v4383_v37 = vmul.f32 1.442695, %v4359_v56 }
 0x5bb   : > { %7919 = vpow2.f32 %v4385_v35  ;;  %v4350_v39 = vpop.xlane.xlu0 %4349  ;;  %v7893_v35 = vunpack.i.h.bf16 %v9293_v53 }
 0x5bc   : > { %7921 = vpow2.f32 %v4383_v37  ;;  %v4366_v40 = vsub.f32 %v9336_v18, %v4350_v39  ;;  %v4347_v49 = vpop.xlane.xlu1 %4346 }
 0x5bd   : > { %v4365_v9 = vsub.f32 %v9340_v20, %v4347_v49  ;;  %v7709_v53 = vpack.c.bf16 %v7893_v35, %v4905_v16 }
 0x5be   : > { %v4397_v36 = vmul.f32 1.442695, %v4366_v40 }
 0x5bf   : > { %v4395_v47 = vmul.f32 1.442695, %v4365_v9  ;;  %v4344_v51 = vpop.xlane.xlu0 %4343 }
 0x5c0   : > { %7923 = vpow2.f32 %v4397_v36  ;;  %v4364_v11 = vsub.f32 %v9334_v17, %v4344_v51  ;;  %v4341_v21 = vpop.xlane.xlu1 %4340 }
 0x5c1   : > { %v9401_v25 = vpop.eup %7915  ;;  %7925 = vpow2.f32 %v4395_v47  ;;  %v4363_v54 = vsub.f32 %v9338_v19, %v4341_v21 }
 0x5c2   : > { %v9404_v55 = vpop.eup %7917  ;;  %v4393_v3 = vmul.f32 1.442695, %v4364_v11  ;;  %v4432_v18 = vsel %vm4305_vm5, %v9401_v25, 0.0 }
 0x5c3   : > { %v4391_v4 = vmul.f32 1.442695, %v4363_v54  ;;  %4433 = vadd.xlane.f32.xlu0 %v4432_v18  ;;  %v4429_v20 = vsel %vm4301_vm6, %v9404_v55, 0.0  ;;  %v9438_v5 = vpop.permute.xlu0 %3590 }
 0x5c4   : > { %7927 = vpow2.f32 %v4393_v3  ;;  %4430 = vadd.xlane.f32.xlu1 %v4429_v20  ;;  %v9440_v24 = vpop.permute.xlu1 %3586 }
 0x5c5   : > { %v9410_v17 = vpop.eup %7919  ;;  %7929 = vpow2.f32 %v4391_v4 }
 0x5c6   : > { %v9412_v6 = vpop.eup %7921  ;;  %v4426_v19 = vsel %vm4305_vm5, %v9410_v17, 0.0 }
 0x5c7   : > { %4427 = vadd.xlane.f32.xlu0 %v4426_v19  ;;  %v4423_v7 = vsel %vm4301_vm6, %v9412_v6, 0.0 }
 0x5c8   : > { %4424 = vadd.xlane.f32.xlu1 %v4423_v7  ;;  %v4990_v7 = vcombine.low %v9350_v27, %v9440_v24 }
 0x5ca   : > { %v9418_v12 = vpop.eup %7923 }
 0x5cb   : > { %v9420_v13 = vpop.eup %7925  ;;  %v4444_v10 = vsel %vm4305_vm5, %v9418_v12, 0.0 }
 0x5cc   : > { %4445 = vadd.xlane.f32.xlu0 %v4444_v10  ;;  %v4441_v14 = vsel %vm4301_vm6, %v9420_v13, 0.0 }
 0x5cd   : > { %4442 = vadd.xlane.f32.xlu1 %v4441_v14 }
 0x5ce   : > { %v9426_v2 = vpop.eup %7927 }
 0x5cf   : > { %v9428_v22 = vpop.eup %7929  ;;  %v4438_v42 = vsel %vm4305_vm5, %v9426_v2, 0.0 }
 0x5d0   : > { %4439 = vadd.xlane.f32.xlu0 %v4438_v42  ;;  %v4435_v62 = vsel %vm4301_vm6, %v9428_v22, 0.0 }
 0x5d1   : > { %4436 = vadd.xlane.f32.xlu1 %v4435_v62 }
 0x5e2   : > { %3592 = vrot.lane.b32.xlu1 %v9173_v60, %s7989_s12 }
 0x5e6   : > { %7895 = vrot.lane.b32.xlu0 %v9197_v0, %s7989_s12 }
 0x5f4   : > { %v4404_v34 = vpop.xlane.xlu0 %4403 }
 0x5f5   : > { %7931 = vrcp.f32 %v4404_v34  ;;  %v4401_v1 = vpop.xlane.xlu1 %4400 }
 0x5f6   : > { %7933 = vrcp.f32 %v4401_v1 }
 0x5f8   : > { %v4410_v29 = vpop.xlane.xlu0 %4409 }
 0x5f9   : > { %7935 = vrcp.f32 %v4410_v29  ;;  %v4407_v63 = vpop.xlane.xlu1 %4406 }
 0x5fa   : > { %7937 = vrcp.f32 %v4407_v63 }
 0x5ff   : > { %v7932_v31 = vpop.eup %7931 }
 0x600   : > { %v7934_v8 = vpop.eup %7933  ;;  %v4464_v60 = vmul.f32 %v7932_v31, %v9358_v33 }
 0x601   : > { %v4463_v56 = vmul.f32 %v7934_v8, %v9360_v57 }
 0x603   : > { %v7936_v50 = vpop.eup %7935  ;;  %7559 = vmatprep.mubr.msk.f32.mxu1 %vm4301_vm6, %v4463_v56 }
 0x604   : > { %v7938_v0 = vpop.eup %7937  ;;  %7560 = vmatmul.mubr.msk.f32.vlgmr.msra.gmra.mrb[16].mxu1 %vm4301_vm6, %v4464_v60  ;;  %v4466_v39 = vmul.f32 %v7936_v50, %v9364_v41 }
 0x605   : > { %7690 = vmatpush3.bf16.msk.msra.mxu1 %vm9247_vm4, %v9263_v26  ;;  %v4465_v37 = vmul.f32 %v7938_v0, %v9368_v43 }
 0x606   : > { %7699 = vmatprep.subr.msk.bf16.mxu1 %vm9247_vm4, %v9278_v38 }
 0x607   : > { %7566 = vmatprep.mubr.msk.f32.mxu1 %vm4301_vm6, %v4465_v37 }
 0x608   : > { %7567 = vmatmul.mubr.msk.f32.vlgmr.msra.gmra.mrb[18].mxu1 %vm4301_vm6, %v4466_v39 }
 0x609   : > { %7702 = vmatpush3.bf16.msk.msra.mxu1 %vm9247_vm4, %v9278_v38 }
 0x60a   : > { %7711 = vmatprep.subr.msk.bf16.mxu1 %vm9247_vm4, %v7709_v53 }
 0x63d   : > { %v4416_v26 = vpop.xlane.xlu0 %4415 }
 0x63e   : > { %7939 = vrcp.f32 %v4416_v26  ;;  %v4413_v33 = vpop.xlane.xlu1 %4412 }
 0x63f   : > { %7941 = vrcp.f32 %v4413_v33 }
 0x645   : > { %v4422_v57 = vpop.xlane.xlu0 %4421 }
 0x646   : > { %7943 = vrcp.f32 %v4422_v57  ;;  %v4419_v41 = vpop.xlane.xlu1 %4418 }
 0x647   : > { %7945 = vrcp.f32 %v4419_v41 }
 0x648   : > { %v7940_v43 = vpop.eup %7939 }
 0x649   : > { %v7942_v44 = vpop.eup %7941  ;;  %v4468_v16 = vmul.f32 %v7940_v43, %v9378_v61  ;;  %v5239_v43 = vld [vmem:[%s9886_s20 + $0x18] sm:$0xff] }
 0x64a   : > { %v4467_v45 = vmul.f32 %v7942_v44, %v9380_v59  ;;  %v5246_v44 = vunpack.c.l.s8.bf16 %v5239_v43 }
 0x64c   : > { %7573 = vmatprep.mubr.msk.f32.mxu0 %vm4301_vm6, %v4467_v45 }
 0x64d   : > { %7574 = vmatmul.mubr.msk.f32.vlgmr.msra.gmra.mrb[12].mxu0 %vm4301_vm6, %v4468_v16 }
 0x64e   : > { %7708 = vmatpush3.bf16.msk.msra.mxu0 %vm9247_vm4, %v9297_v46 }
 0x650   : > { %v7944_v38 = vpop.eup %7943  ;;  %v4434_v40 = vpop.xlane.xlu0 %4433 }
 0x651   : > { %v7946_v49 = vpop.eup %7945  ;;  %7947 = vrcp.f32 %v4434_v40  ;;  %v4431_v9 = vpop.xlane.xlu1 %4430  ;;  %v4470_v59 = vmul.f32 %v7944_v38, %v9388_v28  ;;  %v5247_v38 = vunpack.c.h.s8.bf16 %v5239_v43  ;;  %v5378_v43 = vld [vmem:[%s8146_s1 + $0x18] sm:$0xff] }
 0x652   : > { %7949 = vrcp.f32 %v4431_v9  ;;  %v4469_v36 = vmul.f32 %v7946_v49, %v9390_v30 }
 0x654   : > { %v4428_v47 = vpop.xlane.xlu0 %4427  ;;  %7580 = vmatprep.mubr.msk.f32.mxu1 %vm4301_vm6, %v4469_v36 }
 0x655   : > { %7951 = vrcp.f32 %v4428_v47  ;;  %v4425_v61 = vpop.xlane.xlu1 %4424  ;;  %7581 = vmatmul.mubr.msk.f32.vlgmr.msra.gmra.mrb[20].mxu1 %vm4301_vm6, %v4470_v59 }
 0x656   : > { %7953 = vrcp.f32 %v4425_v61  ;;  %7714 = vmatpush3.bf16.msk.msra.mxu1 %vm9247_vm4, %v7709_v53  ;;  %v5238_v53 = vld [vmem:[%s9886_s20 + $0x10] sm:$0xff] }
 0x657   : > { %v5244_v26 = vunpack.c.l.s8.bf16 %v5238_v53  ;;  %v5245_v33 = vunpack.c.h.s8.bf16 %v5238_v53  ;;  %v7976_v53 = vld [vmem:[%s9881_s0 + $0x8] sm:$0xff] }
 0x659   : > { %v4446_v46 = vpop.xlane.xlu0 %4445 }
 0x65a   : > { %v4443_v51 = vpop.xlane.xlu1 %4442 }
 0x65b   : > { %v7948_v11 = vpop.eup %7947  ;;  %7955 = vrcp.f32 %v4443_v51 }
 0x65c   : > { %v7950_v21 = vpop.eup %7949  ;;  %7957 = vrcp.f32 %v4446_v46  ;;  %v4474_v54 = vmul.f32 %v7948_v11, %v9401_v25 }
 0x65d   : > { %v4440_v30 = vpop.xlane.xlu0 %4439  ;;  %v4473_v28 = vmul.f32 %v7950_v21, %v9404_v55 }
 0x65e   : > { %7959 = vrcp.f32 %v4440_v30  ;;  %v4437_v3 = vpop.xlane.xlu1 %4436 }
 0x65f   : > { %v7952_v18 = vpop.eup %7951  ;;  %7961 = vrcp.f32 %v4437_v3  ;;  %7594 = vmatprep.mubr.msk.f32.mxu1 %vm4301_vm6, %v4473_v28 }
 0x660   : > { %v7954_v4 = vpop.eup %7953  ;;  %7595 = vmatmul.mubr.msk.f32.vlgmr.msra.gmra.mrb[22].mxu1 %vm4301_vm6, %v4474_v54  ;;  %v4472_v10 = vmul.f32 %v7952_v18, %v9410_v17 }
 0x661   : > { %v7896_v20 = vpop.permute.xlu0 %7895  ;;  %v4471_v19 = vmul.f32 %v7954_v4, %v9412_v6 }
 0x662   : > { %v7898_v55 = vunpack.i.h.bf16 %v7896_v20  ;;  %v7897_v14 = vunpack.i.l.bf16 %v7896_v20  ;;  %v3593_v25 = vpop.permute.xlu1 %3592 }
 0x663   : > { %v5075_v42 = vcombine.low %v9438_v5, %v3593_v25  ;;  %7587 = vmatprep.mubr.msk.f32.mxu0 %vm4301_vm6, %v4471_v19 }
 0x664   : > { %v7715_v62 = vpack.c.bf16 %v7897_v14, %v4990_v7  ;;  %7588 = vmatmul.mubr.msk.f32.vlgmr.msra.gmra.mrb[14].mxu0 %vm4301_vm6, %v4472_v10 }
 0x665   : > { %v7956_v34 = vpop.eup %7955  ;;  %v7721_v1 = vpack.c.bf16 %v7898_v55, %v5075_v42 }
 0x666   : > { %v7958_v29 = vpop.eup %7957  ;;  %7717 = vmatprep.subr.msk.bf16.mxu0 %vm9247_vm4, %v7715_v62  ;;  %v4477_v27 = vmul.f32 %v7956_v34, %v9420_v13 }
 0x667   : > { %7720 = vmatpush3.bf16.msk.msra.mxu0 %vm9247_vm4, %v7715_v62  ;;  %7723 = vmatprep.subr.msk.bf16.mxu1 %vm9247_vm4, %v7721_v1  ;;  %v4478_v5 = vmul.f32 %v7958_v29, %v9418_v12  ;;  %v5236_v12 = vld [vmem:[%s9886_s20] sm:$0xff] }
 0x668   : > { %v7960_v17 = vpop.eup %7959  ;;  %7726 = vmatpush3.bf16.msk.msra.mxu1 %vm9247_vm4, %v7721_v1  ;;  %7608 = vmatprep.mubr.msk.f32.mxu1 %vm4301_vm6, %v4477_v27  ;;  %v5241_v56 = vunpack.c.h.s8.bf16 %v5236_v12 }
 0x669   : > { %v7962_v6 = vpop.eup %7961  ;;  %v4476_v13 = vmul.f32 %v7960_v17, %v9426_v2  ;;  %v5237_v2 = vld [vmem:[%s9886_s20 + $0x8] sm:$0xff] }
 0x66a   : > { %v4475_v24 = vmul.f32 %v7962_v6, %v9428_v22  ;;  %v5240_v22 = vunpack.c.l.s8.bf16 %v5236_v12  ;;  %v5242_v0 = vunpack.c.l.s8.bf16 %v5237_v2  ;;  %v5243_v37 = vunpack.c.h.s8.bf16 %v5237_v2 }
 0x66b   : > { %7609 = vmatmul.mubr.msk.f32.vlgmr.msra.gmra.mrb[24].mxu1 %vm4301_vm6, %v4478_v5 }
 0x66c   : > { %7601 = vmatprep.mubr.msk.f32.mxu0 %vm4301_vm6, %v4475_v24  ;;  %5503 = vmatprep.mubr.bf16.mxu1 %v7986_v15 }
 0x66d   : > { %7602 = vmatmul.mubr.msk.f32.vlgmr.msra.gmra.mrb[16].mxu0 %vm4301_vm6, %v4476_v13  ;;  %7611 = vmatprep.subr.bf16.mxu0 %v5240_v22 }
 0x66e   : > { %7612 = vmatpush3.bf16.msra.mxu0 %v5240_v22 }
 0x66f   : > { %7613 = vmatprep.subr.bf16.mxu0 %v5241_v56 }
 0x672   : > { %7614 = vmatpush3.bf16.msra.mxu0 %v5241_v56 }
 0x673   : > { %7615 = vmatprep.subr.bf16.mxu0 %v5242_v0 }
 0x676   : > { %7616 = vmatpush3.bf16.msra.mxu0 %v5242_v0 }
 0x677   : > { %7617 = vmatprep.subr.bf16.mxu0 %v5243_v37 }
 0x67a   : > { %7618 = vmatpush3.bf16.msra.mxu0 %v5243_v37 }
 0x67b   : > { %7619 = vmatprep.subr.bf16.mxu0 %v5244_v26 }
 0x67e   : > { %7620 = vmatpush3.bf16.msra.mxu0 %v5244_v26 }
 0x67f   : > { %7621 = vmatprep.subr.bf16.mxu0 %v5245_v33 }
 0x682   : > { %7622 = vmatpush3.bf16.msra.mxu0 %v5245_v33  ;;  %v7977_v33 = vld [vmem:[%s9881_s0 + $0x10] sm:$0xff] }
 0x683   : > { %7623 = vmatprep.subr.bf16.mxu0 %v5246_v44 }
 0x686   : > { %7624 = vmatpush3.bf16.msra.mxu0 %v5246_v44  ;;  %v5375_v44 = vld [vmem:[%s8146_s1] sm:$0xff] }
 0x687   : > { %7625 = vmatprep.subr.bf16.mxu0 %v5247_v38 }
 0x68a   : > { %7626 = vmatpush3.bf16.msra.mxu0 %v5247_v38  ;;  %v5407_v38 = vunpack.c.l.s8.bf16 %v5375_v44 }
 0x6d7   : > { %v9506_v23 = vpop.f32.mrb[16].mxu1 }
 0x6d8   : > { %v9508_v63 = vpop.f32.mrb[17].mxu1 }
 0x6db   : > { %v9510_v31 = vpop.f32.mrb[18].mxu1 }
 0x6dc   : > { %v9512_v8 = vpop.f32.mrb[19].mxu1 }
 0x720   : > { %v7575_v60 = vpop.f32.mrb[12].mxu0 }
 0x721   : > { %5166 = vrot.lane.b32.xlu0 %v7575_v60, %s7989_s12  ;;  %v4726_v50 = vpop.f32.mrb[13].mxu0 }
 0x722   : > { %5164 = vrot.lane.b32.xlu1 %v4726_v50, %s7989_s12 }
 0x728   : > { %v7582_v35 = vpop.f32.mrb[20].mxu1 }
 0x729   : > { %5170 = vrot.lane.b32.xlu1 %v7582_v35, %s7989_s12  ;;  %v4811_v39 = vpop.f32.mrb[21].mxu1  ;;  %v7975_v35 = vld [vmem:[%s9881_s0] sm:$0xff] }
 0x72a   : > { %5168 = vrot.lane.b32.xlu0 %v4811_v39, %s7989_s12 }
 0x733   : > { %v7596_v57 = vpop.f32.mrb[22].mxu1 }
 0x734   : > { %5186 = vrot.lane.b32.xlu0 %v7596_v57, %s7987_s19  ;;  %v4981_v41 = vpop.f32.mrb[23].mxu1 }
 0x735   : > { %5184 = vrot.lane.b32.xlu1 %v4981_v41, %s7987_s19  ;;  %v5376_v41 = vld [vmem:[%s8146_s1 + $0x8] sm:$0xff] }
 0x737   : > { %v7589_v45 = vpop.f32.mrb[14].mxu0 }
 0x738   : > { %5182 = vrot.lane.b32.xlu0 %v7589_v45, %s7987_s19  ;;  %v4896_v16 = vpop.f32.mrb[15].mxu0  ;;  %v5408_v45 = vunpack.c.l.s8.bf16 %v5376_v41 }
 0x739   : > { %5180 = vrot.lane.b32.xlu1 %v4896_v16, %s7987_s19  ;;  %v5410_v16 = vunpack.c.l.s8.bf16 %v5378_v43 }
 0x73a   : > { %5471 = vmatprep.subr.bf16.mxu1 %v5408_v45 }
 0x73b   : > { %5522 = vmatprep.subr.bf16.mxu0 %v5410_v16  ;;  %5472 = vmatpush1.bf16.msra.mxu1 %v5407_v38 }
 0x73e   : > { %v7610_v40 = vpop.f32.mrb[24].mxu1 }
 0x73f   : > { %v5151_v49 = vpop.f32.mrb[25].mxu1 }
 0x740   : > { %v7603_v9 = vpop.f32.mrb[16].mxu0  ;;  %5200 = vrot.lane.b32.xlu1 %v5151_v49, %s7988_s3  ;;  %v5416_v49 = vunpack.c.h.s8.bf16 %v5376_v41 }
 0x741   : > { %v5066_v36 = vpop.f32.mrb[17].mxu0 }
 0x742   : > { %5196 = vrot.lane.b32.xlu0 %v5066_v36, %s7988_s3  ;;  %v5418_v36 = vunpack.c.h.s8.bf16 %v5378_v43  ;;  %5473 = vmatprep.subr.bf16.mxu1 %v5416_v49  ;;  %v5380_v43 = vld [vmem:[%s8146_s1 + $0x28] sm:$0xff] }
 0x743   : > { %v5412_v45 = vunpack.c.l.s8.bf16 %v5380_v43 }
 0x744   : > { %5198 = vrot.lane.b32.xlu1 %v7603_v9, %s7988_s3 }
 0x746   : > { %5202 = vrot.lane.b32.xlu0 %v7610_v40, %s7988_s3  ;;  %v5377_v40 = vld [vmem:[%s8146_s1 + $0x10] sm:$0xff] }
 0x747   : > { %v5409_v9 = vunpack.c.l.s8.bf16 %v5377_v40 }
 0x793   : > { %v5167_v47 = vpop.permute.xlu0 %5166 }
 0x794   : > { %v5165_v59 = vpop.permute.xlu1 %5164  ;;  %v5209_v19 = vsel %vm3601_vm0, %v9506_v23, %v5167_v47  ;;  %v6570_v23 = vld [vmem:[%s9887_s14] ss:$0 sm:$0xff]  ;;  %v5417_v47 = vunpack.c.h.s8.bf16 %v5377_v40  ;;  %s9891_s14 = scalar_lea.vmem %s9830_s15, %s8109_s26 }
 0x795   : > { %v5208_v54 = vsel %vm3601_vm0, %v9508_v63, %v5165_v59  ;;  %v5415_v59 = vunpack.c.h.s8.bf16 %v5375_v44  ;;  %v5382_v44 = vld [vmem:[%s8146_s1 + $0x38] sm:$0xff] }
 0x796   : > { %v5414_v16 = vunpack.c.l.s8.bf16 %v5382_v44 }
 0x797   : > { %5474 = vmatpush1.bf16.msra.mxu1 %v5415_v59 }
 0x79b   : > { %v5171_v61 = vpop.permute.xlu1 %5170 }
 0x79c   : > { %v5169_v46 = vpop.permute.xlu0 %5168  ;;  %v5211_v42 = vsel %vm3601_vm0, %v9510_v31, %v5171_v61  ;;  %v6571_v31 = vld [vmem:[%s9888_s2] ss:$0 sm:$0xff]  ;;  %s9892_s2 = scalar_lea.vmem %s9831_s16, %s8109_s26 }
 0x79d   : > { %v5210_v3 = vsel %vm3601_vm0, %v9512_v8, %v5169_v46 }
 0x7a6   : > { %v5187_v11 = vpop.permute.xlu0 %5186 }
 0x7a7   : > { %v5185_v51 = vpop.permute.xlu1 %5184  ;;  %v5216_v34 = vsel %vm5212_vm7, %v5211_v42, %v5187_v11 }
 0x7a8   : > { %v5215_v18 = vsel %vm5212_vm7, %v5210_v3, %v5185_v51 }
 0x7aa   : > { %v5183_v30 = vpop.permute.xlu0 %5182 }
 0x7ab   : > { %v5181_v21 = vpop.permute.xlu1 %5180  ;;  %v5214_v55 = vsel %vm5212_vm7, %v5209_v19, %v5183_v30  ;;  %v5384_v19 = vld [vmem:[%s8146_s1 + $0x48] sm:$0xff] }
 0x7ac   : > { %v5213_v4 = vsel %vm5212_vm7, %v5208_v54, %v5181_v21 }
 0x7b2   : > { %v5201_v28 = vpop.permute.xlu1 %5200 }
 0x7b3   : > { %v5220_v7 = vsel %vm5217_vm8, %v5215_v18, %v5201_v28 }
 0x7b4   : > { %v5197_v20 = vpop.permute.xlu0 %5196  ;;  %v5227_v1 = vcombine.high %v5220_v7, %v5220_v7 }
 0x7b5   : > { %v5218_v10 = vsel %vm5217_vm8, %v5213_v4, %v5197_v20 }
 0x7b6   : > { %v5226_v14 = vcombine.high %v5218_v10, %v5218_v10  ;;  %v5199_v25 = vpop.permute.xlu1 %5198 }
 0x7b7   : > { %v5219_v62 = vsel %vm5217_vm8, %v5214_v55, %v5199_v25  ;;  %v5385_v25 = vld [vmem:[%s8146_s1 + $0x50] sm:$0xff] }
 0x7b8   : > { %v5228_v29 = vcombine.low %v5218_v10, %v5226_v14  ;;  %v5229_v27 = vcombine.low %v5219_v62, %v5220_v7  ;;  %v5203_v17 = vpop.permute.xlu0 %5202  ;;  %v5386_v7 = vld [vmem:[%s8146_s1 + $0x58] sm:$0xff]  ;;  %v5424_v10 = vunpack.c.l.s8.bf16 %v5384_v19  ;;  %v5383_v14 = vld [vmem:[%s8146_s1 + $0x40] sm:$0xff]  ;;  %v5425_v62 = vunpack.c.l.s8.bf16 %v5385_v25 }
 0x7b9   : > { %v5221_v6 = vsel %vm5217_vm8, %v5216_v34, %v5203_v17  ;;  %v5426_v55 = vunpack.c.l.s8.bf16 %v5386_v7  ;;  %v5423_v42 = vunpack.c.l.s8.bf16 %v5383_v14  ;;  %v5432_v34 = vunpack.c.h.s8.bf16 %v5384_v19  ;;  %v5392_v17 = vld [vmem:[%s8146_s1 + $0x88] sm:$0xff] }
 0x7ba   : > { %v5230_v5 = vcombine.low %v5227_v1, %v5221_v6  ;;  %v5234_v24 = vpack.c.bf16 %v5229_v27, %v5228_v29  ;;  %5475 = vmatprep.subr.bf16.mxu1 %v5424_v10  ;;  %v5434_v1 = vunpack.c.h.s8.bf16 %v5386_v7  ;;  %v5431_v29 = vunpack.c.h.s8.bf16 %v5383_v14  ;;  %v5394_v6 = vld [vmem:[%s8146_s1 + $0x98] sm:$0xff]  ;;  %v5379_v7 = vld [vmem:[%s8146_s1 + $0x20] sm:$0xff]  ;;  %v5381_v10 = vld [vmem:[%s8146_s1 + $0x30] sm:$0xff] }
 0x7bb   : > { %5476 = vmatpush1.bf16.msra.mxu1 %v5423_v42  ;;  %v5433_v27 = vunpack.c.h.s8.bf16 %v5385_v25  ;;  %v5411_v42 = vunpack.c.l.s8.bf16 %v5379_v7 }
 0x7bc   : > { %v5235_v13 = vpack.c.bf16 %v5230_v5, %v5230_v5  ;;  %7627 = vmatprep.mubr.bf16.mxu0 %v5234_v24  ;;  %5477 = vmatprep.subr.bf16.mxu1 %v5432_v34  ;;  %v5440_v5 = vunpack.c.l.s8.bf16 %v5392_v17  ;;  %v5442_v24 = vunpack.c.l.s8.bf16 %v5394_v6  ;;  %v5420_v34 = vunpack.c.h.s8.bf16 %v5380_v43  ;;  %v5404_v43 = vld [vmem:[%s8146_s1 + $0xe8] sm:$0xff] }
 0x7be   : > { %7628 = vmatmul.mubr.bf16.vlgmr.msra.gmra.mrb[20].mxu0 %v5235_v13  ;;  %v5391_v13 = vld [vmem:[%s8146_s1 + $0x80] sm:$0xff] }
 0x7bf   : > { %5554 = vmatprep.mubr.bf16.mxu0 %v7986_v15  ;;  %5523 = vmatpush1.bf16.msra.mxu0 %v5409_v9 }
 0x7c0   : > { %5524 = vmatprep.subr.bf16.mxu0 %v5418_v36  ;;  %5478 = vmatpush1.bf16.msra.mxu1 %v5431_v29 }
 0x7c1   : > { %5479 = vmatprep.subr.bf16.mxu1 %v5440_v5 }
 0x7c3   : > { %5525 = vmatpush1.bf16.msra.mxu0 %v5417_v47 }
 0x7c4   : > { %5526 = vmatprep.subr.bf16.mxu0 %v5426_v55 }
 0x7c7   : > { %5527 = vmatpush1.bf16.msra.mxu0 %v5425_v62 }
 0x7c8   : > { %5528 = vmatprep.subr.bf16.mxu0 %v5434_v1  ;;  %v5422_v1 = vunpack.c.h.s8.bf16 %v5382_v44  ;;  %v5406_v44 = vld [vmem:[%s8146_s1 + $0xf8] sm:$0xff] }
 0x7cb   : > { %5529 = vmatpush1.bf16.msra.mxu0 %v5433_v27  ;;  %v5388_v27 = vld [vmem:[%s8146_s1 + $0x68] sm:$0xff] }
 0x7cc   : > { %5530 = vmatprep.subr.bf16.mxu0 %v5442_v24  ;;  %v5428_v5 = vunpack.c.l.s8.bf16 %v5388_v27 }
 0x891   : > { %v7629_v63 = vpop.f32.mrb[20].mxu0 }
 0x892   : > { %v5282_v8 = vpop.f32.mrb[21].mxu0  ;;  %v5305_v2 = vmul.f32 %v7629_v63, %v6570_v23  ;;  %v5439_v63 = vunpack.c.l.s8.bf16 %v5391_v13 }
 0x893   : > { %v5303_v12 = vmul.f32 %v6570_v23, %v5282_v8  ;;  %v7630_v22 = vpop.f32.mrb[22].mxu0  ;;  %v5448_v8 = vunpack.c.h.s8.bf16 %v5392_v17  ;;  %v5390_v17 = vld [vmem:[%s8146_s1 + $0x78] sm:$0xff] }
 0x894   : > { %v5285_v56 = vpop.f32.mrb[23].mxu0  ;;  %v5315_v39 = vadd.f32 %v6571_v31, %v5305_v2  ;;  %5480 = vmatpush1.bf16.msra.mxu1 %v5439_v63  ;;  %v5447_v22 = vunpack.c.h.s8.bf16 %v5391_v13  ;;  %v5400_v2 = vld [vmem:[%s8146_s1 + $0xc8] sm:$0xff]  ;;  %v5430_v24 = vunpack.c.l.s8.bf16 %v5390_v17  ;;  %v5389_v63 = vld [vmem:[%s8146_s1 + $0x70] sm:$0xff] }
 0x895   : > { %v5313_v60 = vadd.f32 %v6571_v31, %v5303_v12  ;;  %v5304_v50 = vmul.f32 %v6570_v23, %v5285_v56  ;;  %v5393_v23 = vld [vmem:[%s8146_s1 + $0x90] sm:$0xff]  ;;  %v5450_v12 = vunpack.c.h.s8.bf16 %v5394_v6  ;;  %5481 = vmatprep.subr.bf16.mxu1 %v5448_v8  ;;  %v5421_v6 = vunpack.c.h.s8.bf16 %v5381_v10 }
 0x896   : > { %v5318_v57 = vadd.f32 %v7977_v33, %v5315_v39  ;;  %v5449_v56 = vunpack.c.h.s8.bf16 %v5393_v23  ;;  %v5429_v8 = vunpack.c.l.s8.bf16 %v5389_v63 }
 0x897   : > { %v5314_v0 = vadd.f32 %v6571_v31, %v5304_v50  ;;  %v5316_v37 = vadd.f32 %v7975_v35, %v5313_v60  ;;  %v5441_v31 = vunpack.c.l.s8.bf16 %v5393_v23  ;;  %v5402_v60 = vld [vmem:[%s8146_s1 + $0xd8] sm:$0xff]  ;;  %v5456_v50 = vunpack.c.l.s8.bf16 %v5400_v2  ;;  %v5399_v35 = vld [vmem:[%s8146_s1 + $0xc0] sm:$0xff] }
 0x898   : > { %5482 = vmatpush1.bf16.msra.mxu1 %v5447_v22  ;;  %v5455_v39 = vunpack.c.l.s8.bf16 %v5399_v35  ;;  %v5466_v33 = vunpack.c.h.s8.bf16 %v5402_v60  ;;  %v5387_v23 = vld [vmem:[%s8146_s1 + $0x60] sm:$0xff]  ;;  %v5436_v22 = vunpack.c.h.s8.bf16 %v5388_v27  ;;  %v5848_v27 = vld [vmem:[%s8162_s30 + $0x8] sm:$0xff] }
 0x899   : > { %5321 = vadd.xlane.f32.xlu1 %v5316_v37  ;;  %v5317_v26 = vadd.f32 %v7976_v53, %v5314_v0  ;;  %5531 = vmatpush1.bf16.msra.mxu0 %v5441_v31  ;;  %v5458_v0 = vunpack.c.l.s8.bf16 %v5402_v60  ;;  %v5427_v31 = vunpack.c.l.s8.bf16 %v5387_v23  ;;  %v5398_v60 = vld [vmem:[%s8146_s1 + $0xb8] sm:$0xff] }
 0x89a   : > { %5532 = vmatprep.subr.bf16.mxu0 %v5450_v12  ;;  %5483 = vmatprep.subr.bf16.mxu1 %v5456_v50  ;;  %v5435_v50 = vunpack.c.h.s8.bf16 %v5387_v23  ;;  %v5882_v23 = vunpack.c.h.s8.bf16 %v5848_v27 }
 0x89b   : > { %5323 = vadd.xlane.f32.xlu0 %v5317_v26 }
 0x89c   : > { %5484 = vmatpush1.bf16.msra.mxu1 %v5455_v39  ;;  %v5395_v39 = vld [vmem:[%s8146_s1 + $0xa0] sm:$0xff] }
 0x89d   : > { %5533 = vmatpush1.bf16.msra.mxu0 %v5449_v56  ;;  %v5438_v56 = vunpack.c.h.s8.bf16 %v5390_v17  ;;  %v5856_v17 = vld [vmem:[%s8162_s30 + $0x48] sm:$0xff] }
 0x89e   : > { %5534 = vmatprep.subr.bf16.mxu0 %v5458_v0  ;;  %v5437_v0 = vunpack.c.h.s8.bf16 %v5389_v63  ;;  %v5898_v63 = vunpack.c.h.s8.bf16 %v5856_v17 }
 0x89f   : > { %5325 = vadd.xlane.f32.xlu0 %v5318_v57 }
 0x926   : > { %v5322_v61 = vpop.xlane.xlu1 %5321 }
 0x927   : > { %v5328_v46 = vmul.f32 0.0078125, %v5322_v61 }
 0x928   : > { %v5324_v51 = vpop.xlane.xlu0 %5323 }
 0x929   : > { %v9570_v11 = vsub.f32 %v5316_v37, %v5328_v46  ;;  %v5329_v21 = vmul.f32 0.0078125, %v5324_v51  ;;  %v5401_v37 = vld [vmem:[%s8146_s1 + $0xd0] sm:$0xff] }
 0x92a   : > { %v5457_v53 = vunpack.c.l.s8.bf16 %v5401_v37  ;;  %v5465_v41 = vunpack.c.h.s8.bf16 %v5401_v37  ;;  %v5446_v37 = vunpack.c.l.s8.bf16 %v5398_v60 }
 0x92b   : > { %v9572_v30 = vsub.f32 %v5317_v26, %v5329_v21  ;;  %v5334_v28 = vmul.f32 %v9570_v11, %v9570_v11  ;;  %v5464_v26 = vunpack.c.h.s8.bf16 %v5400_v2  ;;  %v6572_v21 = vld [vmem:[%s872_s21] ss:$0 sm:$0xff]  ;;  %v5396_v2 = vld [vmem:[%s8146_s1 + $0xa8] sm:$0xff]  ;;  %s9890_s21 = sld [smem:[#allocation5_spill]] }
 0x92c   : > { %v5326_v54 = vpop.xlane.xlu0 %5325  ;;  %5535 = vmatpush1.bf16.msra.mxu0 %v5457_v53  ;;  %v5397_v53 = vld [vmem:[%s8146_s1 + $0xb0] sm:$0xff] }
 0x92d   : > { %v5330_v3 = vmul.f32 0.0078125, %v5326_v54  ;;  %5337 = vadd.xlane.f32.xlu1 %v5334_v28  ;;  %v5335_v18 = vmul.f32 %v9572_v30, %v9572_v30  ;;  %5485 = vmatprep.subr.bf16.mxu1 %v5464_v26  ;;  %v5443_v26 = vunpack.c.l.s8.bf16 %v5395_v39 }
 0x92e   : > { %5536 = vmatprep.subr.bf16.mxu0 %v5466_v33  ;;  %v5445_v33 = vunpack.c.l.s8.bf16 %v5397_v53 }
 0x92f   : > { %v9578_v4 = vsub.f32 %v5318_v57, %v5330_v3  ;;  %5339 = vadd.xlane.f32.xlu0 %v5335_v18  ;;  %v5463_v57 = vunpack.c.h.s8.bf16 %v5399_v35  ;;  %v5444_v35 = vunpack.c.l.s8.bf16 %v5396_v2 }
 0x930   : > { %5537 = vmatpush1.bf16.msra.mxu0 %v5465_v41  ;;  %v5454_v41 = vunpack.c.h.s8.bf16 %v5398_v60 }
 0x931   : > { %v5336_v20 = vmul.f32 %v9578_v4, %v9578_v4  ;;  %5486 = vmatpush1.bf16.msra.mxu1 %v5463_v57  ;;  %5624 = vmatprep.subr.bf16.mxu0 %v5414_v16  ;;  %v5452_v57 = vunpack.c.h.s8.bf16 %v5396_v2  ;;  %v5453_v16 = vunpack.c.h.s8.bf16 %v5397_v53 }
 0x932   : > { %5573 = vmatprep.subr.bf16.mxu1 %v5412_v45  ;;  %v5451_v45 = vunpack.c.h.s8.bf16 %v5395_v39  ;;  %v5862_v39 = vld [vmem:[%s8162_s30 + $0x78] sm:$0xff] }
 0x933   : > { %5341 = vadd.xlane.f32.xlu1 %v5336_v20  ;;  %v6573_v20 = vld [vmem:[%s875_s29] ss:$0 sm:$0xff] }
 0x9ba   : > { %v5338_v38 = vpop.xlane.xlu1 %5337 }
 0x9bb   : > { %v5343_v40 = vmul.f32 0.0078125, %v5338_v38  ;;  %v5460_v38 = vunpack.c.l.s8.bf16 %v5404_v43 }
 0x9bc   : > { %v5340_v49 = vpop.xlane.xlu0 %5339 }
 0x9bd   : > { %v5346_v9 = vadd.f32 1e-05, %v5343_v40  ;;  %v5344_v36 = vmul.f32 0.0078125, %v5340_v49  ;;  %v5462_v40 = vunpack.c.l.s8.bf16 %v5406_v44  ;;  %v5403_v49 = vld [vmem:[%s8146_s1 + $0xe0] sm:$0xff] }
 0x9bf   : > { %7963 = vrsqrt.f32 %v5346_v9  ;;  %v5347_v59 = vadd.f32 1e-05, %v5344_v36  ;;  %v5405_v9 = vld [vmem:[%s8146_s1 + $0xf0] sm:$0xff]  ;;  %v5459_v36 = vunpack.c.l.s8.bf16 %v5403_v49  ;;  %s9889_s1 = sld [smem:[#allocation4_spill]] }
 0x9c0   : > { %v5342_v47 = vpop.xlane.xlu1 %5341 }
 0x9c1   : > { %7965 = vrsqrt.f32 %v5347_v59  ;;  %v5345_v61 = vmul.f32 0.0078125, %v5342_v47  ;;  %v5461_v59 = vunpack.c.l.s8.bf16 %v5405_v9  ;;  %v5468_v47 = vunpack.c.h.s8.bf16 %v5404_v43 }
 0x9c3   : > { %v5348_v46 = vadd.f32 1e-05, %v5345_v61  ;;  %v5470_v61 = vunpack.c.h.s8.bf16 %v5406_v44 }
 0x9c5   : > { %7967 = vrsqrt.f32 %v5348_v46  ;;  %v5851_v46 = vld [vmem:[%s8162_s30 + $0x20] sm:$0xff] }
 0x9c9   : > { %v7964_v51 = vpop.eup %7963 }
 0x9ca   : > { %v5352_v28 = vmul.f32 %v7964_v51, %v9570_v11  ;;  %v5859_v51 = vld [vmem:[%s8162_s30 + $0x60] sm:$0xff] }
 0x9cb   : > { %v7966_v54 = vpop.eup %7965 }
 0x9cc   : > { %v5353_v3 = vmul.f32 %v7966_v54, %v9572_v30  ;;  %v5361_v18 = vmul.f32 %v6572_v21, %v5352_v28  ;;  %v5413_v30 = vunpack.c.l.s8.bf16 %v5381_v10  ;;  %v5469_v28 = vunpack.c.h.s8.bf16 %v5405_v9 }
 0x9cd   : > { %v5887_v54 = vunpack.c.l.s8.bf16 %v5851_v46  ;;  %v5888_v10 = vunpack.c.h.s8.bf16 %v5851_v46 }
 0x9ce   : > { %v5362_v19 = vmul.f32 %v6572_v21, %v5353_v3  ;;  %v9611_v25 = vadd.f32 %v6573_v20, %v5361_v18  ;;  %v5903_v3 = vunpack.c.l.s8.bf16 %v5859_v51  ;;  %v5847_v18 = vld [vmem:[%s8162_s30] sm:$0xff] }
 0x9cf   : > { %v7968_v55 = vpop.eup %7967 }
 0x9d0   : > { %v5354_v14 = vmul.f32 %v7968_v55, %v9578_v4  ;;  %v9613_v11 = vadd.f32 %v6573_v20, %v5362_v19  ;;  %v5419_v4 = vunpack.c.h.s8.bf16 %v5379_v7  ;;  %v5879_v19 = vunpack.c.l.s8.bf16 %v5847_v18 }
 0x9d1   : > { %v5904_v55 = vunpack.c.h.s8.bf16 %v5859_v51 }
 0x9d2   : > { %v9617_v62 = vpack.c.bf16 %v9613_v11, %v9611_v25  ;;  %v5363_v29 = vmul.f32 %v6572_v21, %v5354_v14  ;;  %v5467_v21 = vunpack.c.h.s8.bf16 %v5403_v49  ;;  %v5852_v14 = vld [vmem:[%s8162_s30 + $0x28] sm:$0xff]  ;;  %v9671_v49 = vld [vmem:[%s8162_s30 + $0xe0] sm:$0xff] }
 0x9d4   : > { %5504 = vmatmul.mubr.bf16.vlgmr.msra.gmra.mrb[28].mxu1 %v9617_v62  ;;  %5555 = vmatmul.mubr.bf16.vlgmr.msra.gmra.mrb[24].mxu0 %v9617_v62  ;;  %v9623_v13 = vadd.f32 %v6573_v20, %v5363_v29  ;;  %v5855_v20 = vld [vmem:[%s8162_s30 + $0x40] sm:$0xff] }
 0x9d5   : > { %5574 = vmatpush1.bf16.msra.mxu1 %v5411_v42  ;;  %5625 = vmatpush1.bf16.msra.mxu0 %v5413_v30  ;;  %v5895_v7 = vunpack.c.l.s8.bf16 %v5855_v20  ;;  %v5860_v42 = vld [vmem:[%s8162_s30 + $0x68] sm:$0xff]  ;;  %v5880_v30 = vunpack.c.h.s8.bf16 %v5847_v18 }
 0x9d6   : > { %5575 = vmatprep.subr.bf16.mxu1 %v5420_v34  ;;  %5626 = vmatprep.subr.bf16.mxu0 %v5422_v1  ;;  %v9631_v12 = vpack.c.bf16 %v9623_v13, %v9623_v13  ;;  %v5896_v34 = vunpack.c.h.s8.bf16 %v5855_v20  ;;  %v5889_v1 = vunpack.c.l.s8.bf16 %v5852_v14  ;;  %v5905_v29 = vunpack.c.l.s8.bf16 %v5860_v42 }
 0x9d7   : > { %5513 = vmatprep.mubr.bf16.mxu1 %v7986_v15  ;;  %5564 = vmatprep.mubr.bf16.mxu0 %v7986_v15 }
 0x9d9   : > { %5576 = vmatpush1.bf16.msra.mxu1 %v5419_v4  ;;  %5627 = vmatpush1.bf16.msra.mxu0 %v5421_v6  ;;  %v5897_v4 = vunpack.c.l.s8.bf16 %v5856_v17  ;;  %v5906_v6 = vunpack.c.h.s8.bf16 %v5860_v42 }
 0x9da   : > { %5577 = vmatprep.subr.bf16.mxu1 %v5428_v5  ;;  %5628 = vmatprep.subr.bf16.mxu0 %v5430_v24  ;;  %v5853_v5 = vld [vmem:[%s8162_s30 + $0x30] sm:$0xff] }
 0x9db   : > { %v5861_v24 = vld [vmem:[%s8162_s30 + $0x70] sm:$0xff] }
 0x9dc   : > { %5514 = vmatmul.mubr.bf16.gmra.mrb[32].mxu1 %v9631_v12  ;;  %5565 = vmatmul.mubr.bf16.gmra.mrb[28].mxu0 %v9631_v12 }
 0x9dd   : > { %5578 = vmatpush1.bf16.msra.mxu1 %v5427_v31  ;;  %5629 = vmatpush1.bf16.msra.mxu0 %v5429_v8  ;;  %v5891_v31 = vunpack.c.l.s8.bf16 %v5853_v5  ;;  %v5907_v8 = vunpack.c.l.s8.bf16 %v5861_v24 }
 0x9de   : > { %5579 = vmatprep.subr.bf16.mxu1 %v5436_v22  ;;  %5630 = vmatprep.subr.bf16.mxu0 %v5438_v56  ;;  %v5849_v22 = vld [vmem:[%s8162_s30 + $0x10] sm:$0xff] }
 0x9df   : > { %5605 = vmatprep.mubr.bf16.mxu1 %v7986_v15  ;;  %5656 = vmatprep.mubr.bf16.mxu0 %v7986_v15  ;;  %v5857_v56 = vld [vmem:[%s8162_s30 + $0x50] sm:$0xff]  ;;  %v5883_v2 = vunpack.c.l.s8.bf16 %v5849_v22 }
 0x9e0   : > { %v5899_v60 = vunpack.c.l.s8.bf16 %v5857_v56 }
 0x9e1   : > { %5580 = vmatpush1.bf16.msra.mxu1 %v5435_v50  ;;  %5631 = vmatpush1.bf16.msra.mxu0 %v5437_v0  ;;  %v5908_v50 = vunpack.c.h.s8.bf16 %v5861_v24  ;;  %v5884_v0 = vunpack.c.h.s8.bf16 %v5849_v22 }
 0x9e2   : > { %5581 = vmatprep.subr.bf16.mxu1 %v5444_v35  ;;  %5632 = vmatprep.subr.bf16.mxu0 %v5446_v37  ;;  %v5900_v35 = vunpack.c.h.s8.bf16 %v5857_v56  ;;  %v5854_v37 = vld [vmem:[%s8162_s30 + $0x38] sm:$0xff] }
 0x9e3   : > { %v5893_v53 = vunpack.c.l.s8.bf16 %v5854_v37  ;;  %v5894_v44 = vunpack.c.h.s8.bf16 %v5854_v37 }
 0x9e5   : > { %5582 = vmatpush1.bf16.msra.mxu1 %v5443_v26  ;;  %5633 = vmatpush1.bf16.msra.mxu0 %v5445_v33  ;;  %v5909_v26 = vunpack.c.l.s8.bf16 %v5862_v39  ;;  %v5850_v33 = vld [vmem:[%s8162_s30 + $0x18] sm:$0xff] }
 0x9e6   : > { %5583 = vmatprep.subr.bf16.mxu1 %v5452_v57  ;;  %5634 = vmatprep.subr.bf16.mxu0 %v5454_v41  ;;  %v5858_v57 = vld [vmem:[%s8162_s30 + $0x58] sm:$0xff]  ;;  %v5885_v41 = vunpack.c.l.s8.bf16 %v5850_v33 }
 0x9e7   : > { %v5901_v43 = vunpack.c.l.s8.bf16 %v5858_v57 }
 0x9e9   : > { %5584 = vmatpush1.bf16.msra.mxu1 %v5451_v45  ;;  %5635 = vmatpush1.bf16.msra.mxu0 %v5453_v16  ;;  %v5910_v45 = vunpack.c.h.s8.bf16 %v5862_v39  ;;  %v5886_v16 = vunpack.c.h.s8.bf16 %v5850_v33 }
 0x9ea   : > { %5585 = vmatprep.subr.bf16.mxu1 %v5460_v38  ;;  %5636 = vmatprep.subr.bf16.mxu0 %v5462_v40  ;;  %v5902_v38 = vunpack.c.h.s8.bf16 %v5858_v57  ;;  %v9668_v40 = vld [vmem:[%s8162_s30 + $0xa0] sm:$0xff] }
 0x9eb   : > { %v5919_v9 = vunpack.c.l.s8.bf16 %v9668_v40 }
 0x9ed   : > { %5586 = vmatpush1.bf16.msra.mxu1 %v5459_v36  ;;  %5637 = vmatpush1.bf16.msra.mxu0 %v5461_v59  ;;  %v5935_v36 = vunpack.c.l.s8.bf16 %v9671_v49  ;;  %v9676_v59 = vld [vmem:[%s9889_s1] sm:$0xff] }
 0x9ee   : > { %5587 = vmatprep.subr.bf16.mxu1 %v5468_v47  ;;  %5638 = vmatprep.subr.bf16.mxu0 %v5470_v61  ;;  %v5691_v47 = vsub.s32 3, %v9108_v32  ;;  %v9680_v61 = vld [vmem:[%s9890_s21] sm:$0xff]  ;;  %v5680_v46 = vrot.slane %v9676_v59, %v9111_v52  ;;  %v5688_v51 = vrot.slane %v9676_v59, %v9167_v48 }
 0x9f1   : > { %5588 = vmatpush1.bf16.msra.mxu1 %v5467_v21  ;;  %5639 = vmatpush1.bf16.msra.mxu0 %v5469_v28  ;;  %v5684_v21 = vrot.slane %v9676_v59, %v9117_v58  ;;  %v5692_v28 = vrot.slane %v9676_v59, %v5691_v47 }
 0x9f2   : > { %7367 = vmatprep.subr.bf16.mxu1 %v5887_v54  ;;  %7395 = vmatprep.subr.bf16.mxu0 %v5903_v3  ;;  %v5746_v54 = vrot.slane %v9680_v61, %v9111_v52  ;;  %v5754_v3 = vrot.slane %v9680_v61, %v9167_v48 }
 0x9f4   : > { %5606 = vmatmul.mubr.bf16.vlgmr.msra.gmra.mrb[36].mxu1 %v9617_v62  ;;  %5657 = vmatmul.mubr.bf16.vlgmr.msra.gmra.mrb[32].mxu0 %v9617_v62  ;;  %v5881_v62 = vunpack.c.l.s8.bf16 %v5848_v27 }
 0x9f5   : > { %5615 = vmatprep.mubr.bf16.mxu1 %v7986_v15  ;;  %5666 = vmatprep.mubr.bf16.mxu0 %v7986_v15  ;;  %v5890_v15 = vunpack.c.h.s8.bf16 %v5852_v14 }
 0x9f6   : > { %7368 = vmatpush3.bf16.msra.mxu1 %v5879_v19  ;;  %7396 = vmatpush3.bf16.msra.mxu0 %v5895_v7  ;;  %v5750_v19 = vrot.slane %v9680_v61, %v9117_v58  ;;  %v5758_v7 = vrot.slane %v9680_v61, %v5691_v47  ;;  %v9700_v58 = vld [vmem:[%s8162_s30 + $0xc0] sm:$0xff] }
 0x9f7   : > { %7369 = vmatprep.subr.bf16.mxu1 %v5888_v10  ;;  %7397 = vmatprep.subr.bf16.mxu0 %v5904_v55 }
 0x9fa   : > { %7370 = vmatpush3.bf16.msra.mxu1 %v5880_v30  ;;  %7398 = vmatpush3.bf16.msra.mxu0 %v5896_v34 }
 0x9fb   : > { %7371 = vmatprep.subr.bf16.mxu1 %v5889_v1  ;;  %7399 = vmatprep.subr.bf16.mxu0 %v5905_v29 }
 0x9fc   : > { %5616 = vmatmul.mubr.bf16.gmra.mrb[40].mxu1 %v9631_v12  ;;  %5667 = vmatmul.mubr.bf16.gmra.mrb[36].mxu0 %v9631_v12  ;;  %v5892_v12 = vunpack.c.h.s8.bf16 %v5853_v5 }
 0x9fe   : > { %7372 = vmatpush3.bf16.msra.mxu1 %v5881_v62  ;;  %7400 = vmatpush3.bf16.msra.mxu0 %v5897_v4 }
 0x9ff   : > { %7373 = vmatprep.subr.bf16.mxu1 %v5890_v15  ;;  %7401 = vmatprep.subr.bf16.mxu0 %v5906_v6  ;;  %v9697_v15 = vld [vmem:[%s8162_s30 + $0x80] sm:$0xff] }
 0xa00   : > { %v5911_v56 = vunpack.c.l.s8.bf16 %v9697_v15 }
 0xa02   : > { %7374 = vmatpush3.bf16.msra.mxu1 %v5882_v23  ;;  %7402 = vmatpush3.bf16.msra.mxu0 %v5898_v63 }
 0xa03   : > { %7375 = vmatprep.subr.bf16.mxu1 %v5891_v31  ;;  %7403 = vmatprep.subr.bf16.mxu0 %v5907_v8 }
 0xa06   : > { %7376 = vmatpush3.bf16.msra.mxu1 %v5883_v2  ;;  %7404 = vmatpush3.bf16.msra.mxu0 %v5899_v60  ;;  %v5927_v2 = vunpack.c.l.s8.bf16 %v9700_v58 }
 0xa07   : > { %7377 = vmatprep.subr.bf16.mxu1 %v5892_v12  ;;  %7405 = vmatprep.subr.bf16.mxu0 %v5908_v50 }
 0xa0a   : > { %7378 = vmatpush3.bf16.msra.mxu1 %v5884_v0  ;;  %7406 = vmatpush3.bf16.msra.mxu0 %v5900_v35 }
 0xa0b   : > { %7379 = vmatprep.subr.bf16.mxu1 %v5893_v53  ;;  %7407 = vmatprep.subr.bf16.mxu0 %v5909_v26 }
 0xa0e   : > { %7380 = vmatpush3.bf16.msra.mxu1 %v5885_v41  ;;  %7408 = vmatpush3.bf16.msra.mxu0 %v5901_v43 }
 0xa0f   : > { %7381 = vmatprep.subr.bf16.mxu1 %v5894_v44  ;;  %7409 = vmatprep.subr.bf16.mxu0 %v5910_v45 }
 0xa12   : > { %7382 = vmatpush3.bf16.msra.mxu1 %v5886_v16  ;;  %7410 = vmatpush3.bf16.msra.mxu0 %v5902_v38 }
 0xa13   : > { %7423 = vmatprep.subr.bf16.mxu1 %v5919_v9  ;;  %7451 = vmatprep.subr.bf16.mxu0 %v5935_v36 }
 0xaa7   : > { %v5505_v18 = vpop.f32.mrb[28].mxu1  ;;  %v5556_v20 = vpop.f32.mrb[24].mxu0 }
 0xaa8   : > { %v5717_v10 = vmul.f32 %v5680_v46, %v5505_v18  ;;  %v5719_v55 = vmul.f32 %v5688_v51, %v5556_v20  ;;  %v5507_v14 = vpop.f32.mrb[29].mxu1  ;;  %v5558_v42 = vpop.f32.mrb[25].mxu0 }
 0xaa9   : > { %v5718_v30 = vmul.f32 %v5684_v21, %v5507_v14  ;;  %v5720_v34 = vmul.f32 %v5692_v28, %v5558_v42  ;;  %v5509_v1 = vpop.f32.mrb[30].mxu1  ;;  %v5560_v52 = vpop.f32.mrb[26].mxu0 }
 0xaaa   : > { %v5783_v29 = vadd.f32 %v5746_v54, %v5717_v10  ;;  %v5785_v27 = vadd.f32 %v5754_v3, %v5719_v55  ;;  %v5725_v48 = vmul.f32 %v5680_v46, %v5509_v1  ;;  %v5727_v17 = vmul.f32 %v5688_v51, %v5560_v52  ;;  %v5511_v62 = vpop.f32.mrb[31].mxu1  ;;  %v5562_v4 = vpop.f32.mrb[27].mxu0 }
 0xaab   : > { %v5784_v6 = vadd.f32 %v5750_v19, %v5718_v30  ;;  %v5786_v5 = vadd.f32 %v5758_v7, %v5720_v34  ;;  %v5726_v24 = vmul.f32 %v5684_v21, %v5511_v62  ;;  %v5728_v23 = vmul.f32 %v5692_v28, %v5562_v4 }
 0xaac   : > { %v5791_v63 = vadd.f32 %v5746_v54, %v5725_v48  ;;  %v5793_v31 = vadd.f32 %v5754_v3, %v5727_v17  ;;  %v5807_v60 = vmax.f32 %v5783_v29, 0.0  ;;  %v5809_v12 = vmax.f32 %v5785_v27, 0.0 }
 0xaad   : > { %v5792_v8 = vadd.f32 %v5750_v19, %v5726_v24  ;;  %v5794_v22 = vadd.f32 %v5758_v7, %v5728_v23  ;;  %v5808_v35 = vmax.f32 %v5784_v6, 0.0  ;;  %v5810_v37 = vmax.f32 %v5786_v5, 0.0  ;;  %v5869_v24 = vld [vmem:[%s8162_s30 + $0xb0] sm:$0xff] }
 0xaae   : > { %v5815_v50 = vmax.f32 %v5791_v63, 0.0  ;;  %v5817_v0 = vmax.f32 %v5793_v31, 0.0  ;;  %v5920_v30 = vunpack.c.h.s8.bf16 %v9668_v40  ;;  %v5936_v34 = vunpack.c.h.s8.bf16 %v9671_v49  ;;  %v5877_v23 = vld [vmem:[%s8162_s30 + $0xf0] sm:$0xff] }
 0xaaf   : > { %v5816_v39 = vmax.f32 %v5792_v8, 0.0  ;;  %v5818_v53 = vmax.f32 %v5794_v22, 0.0  ;;  %v5515_v26 = vpop.f32.mrb[32].mxu1  ;;  %v5566_v33 = vpop.f32.mrb[28].mxu0  ;;  %v5928_v40 = vunpack.c.h.s8.bf16 %v9700_v58  ;;  %v5923_v8 = vunpack.c.l.s8.bf16 %v5869_v24 }
 0xab0   : > { %v5831_v57 = vpack.c.bf16 %v5815_v50, %v5807_v60  ;;  %v5833_v41 = vpack.c.bf16 %v5817_v0, %v5809_v12  ;;  %v5733_v43 = vmul.f32 %v5680_v46, %v5515_v26  ;;  %v5735_v44 = vmul.f32 %v5688_v51, %v5566_v33  ;;  %v5517_v45 = vpop.f32.mrb[33].mxu1  ;;  %v5568_v16 = vpop.f32.mrb[29].mxu0  ;;  %v5870_v26 = vld [vmem:[%s8162_s30 + $0xb8] sm:$0xff] }
 0xab1   : > { %v5734_v38 = vmul.f32 %v5684_v21, %v5517_v45  ;;  %v5736_v9 = vmul.f32 %v5692_v28, %v5568_v16  ;;  %v5519_v36 = vpop.f32.mrb[34].mxu1  ;;  %v5570_v47 = vpop.f32.mrb[30].mxu0  ;;  %v5832_v18 = vpack.c.bf16 %v5816_v39, %v5808_v35  ;;  %v5834_v20 = vpack.c.bf16 %v5818_v53, %v5810_v37  ;;  %v5868_v21 = vld [vmem:[%s8162_s30 + $0xa8] sm:$0xff]  ;;  %v9735_v16 = vld [vmem:[%s8162_s30 + $0x98] sm:$0xff] }
 0xab2   : > { %v5799_v10 = vadd.f32 %v5746_v54, %v5733_v43  ;;  %v5801_v55 = vadd.f32 %v5754_v3, %v5735_v44  ;;  %v5520_v14 = vpop.f32.mrb[35].mxu1  ;;  %v5571_v42 = vpop.f32.mrb[31].mxu0  ;;  %v5876_v28 = vld [vmem:[%s8162_s30 + $0xe8] sm:$0xff]  ;;  %v5912_v54 = vunpack.c.h.s8.bf16 %v9697_v15  ;;  %v5921_v48 = vunpack.c.l.s8.bf16 %v5868_v21 }
 0xab3   : > { %v5800_v46 = vadd.f32 %v5750_v19, %v5734_v38  ;;  %v5802_v51 = vadd.f32 %v5758_v7, %v5736_v9  ;;  %5975 = vmatprep.mubr.bf16.mxu1 %v5832_v18  ;;  %6023 = vmatprep.mubr.bf16.mxu0 %v5834_v20  ;;  %v5864_v19 = vld [vmem:[%s8162_s30 + $0x88] sm:$0xff]  ;;  %v5937_v17 = vunpack.c.l.s8.bf16 %v5876_v28  ;;  %v5922_v58 = vunpack.c.h.s8.bf16 %v5868_v21  ;;  %v9738_v38 = vld [vmem:[%s8162_s30 + $0xd8] sm:$0xff] }
 0xab4   : > { %5976 = vmatmul.mubr.bf16.vlgmr.msra.gmra.mrb[44].mxu1 %v5831_v57  ;;  %6024 = vmatmul.mubr.bf16.vlgmr.msra.gmra.mrb[40].mxu0 %v5833_v41  ;;  %v5823_v3 = vmax.f32 %v5799_v10, 0.0  ;;  %v5825_v49 = vmax.f32 %v5801_v55, 0.0  ;;  %v5872_v7 = vld [vmem:[%s8162_s30 + $0xc8] sm:$0xff]  ;;  %v5913_v62 = vunpack.c.l.s8.bf16 %v5864_v19  ;;  %v5938_v5 = vunpack.c.h.s8.bf16 %v5876_v28  ;;  %v5878_v41 = vld [vmem:[%s8162_s30 + $0xf8] sm:$0xff] }
 0xab5   : > { %v5824_v1 = vmax.f32 %v5800_v46, 0.0  ;;  %v5826_v52 = vmax.f32 %v5802_v51, 0.0  ;;  %7424 = vmatpush3.bf16.msra.mxu1 %v5911_v56  ;;  %7452 = vmatpush3.bf16.msra.mxu0 %v5927_v2  ;;  %v5929_v4 = vunpack.c.l.s8.bf16 %v5872_v7  ;;  %v5914_v63 = vunpack.c.h.s8.bf16 %v5864_v19  ;;  %v5865_v56 = vld [vmem:[%s8162_s30 + $0x90] sm:$0xff] }
 0xab6   : > { %7425 = vmatprep.subr.bf16.mxu1 %v5920_v30  ;;  %7453 = vmatprep.subr.bf16.mxu0 %v5936_v34  ;;  %v5839_v6 = vpack.c.bf16 %v5823_v3, %v5823_v3  ;;  %v5841_v15 = vpack.c.bf16 %v5825_v49, %v5825_v49  ;;  %v5930_v31 = vunpack.c.h.s8.bf16 %v5872_v7  ;;  %v5939_v22 = vunpack.c.l.s8.bf16 %v5877_v23  ;;  %v5873_v2 = vld [vmem:[%s8162_s30 + $0xd0] sm:$0xff] }
 0xab7   : > { %v5840_v29 = vpack.c.bf16 %v5824_v1, %v5824_v1  ;;  %v5842_v27 = vpack.c.bf16 %v5826_v52, %v5826_v52  ;;  %v5695_v60 = vsub.s32 4, %v9108_v32  ;;  %v5703_v12 = vsub.s32 6, %v9108_v32 }
 0xab8   : > { %v5915_v50 = vunpack.c.l.s8.bf16 %v5865_v56  ;;  %v5931_v0 = vunpack.c.l.s8.bf16 %v5873_v2  ;;  %v5699_v35 = vsub.s32 5, %v9108_v32  ;;  %v5707_v37 = vsub.s32 7, %v9108_v32 }
 0xab9   : > { %7426 = vmatpush3.bf16.msra.mxu1 %v5912_v54  ;;  %7454 = vmatpush3.bf16.msra.mxu0 %v5928_v40  ;;  %v5924_v39 = vunpack.c.h.s8.bf16 %v5869_v24  ;;  %v5940_v53 = vunpack.c.h.s8.bf16 %v5877_v23  ;;  %v9722_v33 = vrot.slane %v9676_v59, %v5695_v60  ;;  %v9725_v57 = vrot.slane %v9676_v59, %v5703_v12 }
 0xaba   : > { %5983 = vmatprep.mubr.bf16.mxu1 %v5840_v29  ;;  %6031 = vmatprep.mubr.bf16.mxu0 %v5842_v27  ;;  %v9729_v43 = vrot.slane %v9676_v59, %v5699_v35  ;;  %v9732_v32 = vrot.slane %v9676_v59, %v5707_v37  ;;  %v5916_v44 = vunpack.c.h.s8.bf16 %v5865_v56  ;;  %v5932_v45 = vunpack.c.h.s8.bf16 %v5873_v2 }
 0xabb   : > { %7427 = vmatprep.subr.bf16.mxu1 %v5921_v48  ;;  %7455 = vmatprep.subr.bf16.mxu0 %v5937_v17  ;;  %v9741_v9 = vrot.slane %v9680_v61, %v5695_v60  ;;  %v9744_v36 = vrot.slane %v9680_v61, %v5703_v12  ;;  %v5925_v47 = vunpack.c.l.s8.bf16 %v5870_v26  ;;  %v9747_v59 = vrot.slane %v9680_v61, %v5699_v35 }
 0xabc   : > { %5984 = vmatmul.mubr.bf16.gmra.mrb[48].mxu1 %v5839_v6  ;;  %6032 = vmatmul.mubr.bf16.gmra.mrb[44].mxu0 %v5841_v15  ;;  %v9750_v10 = vrot.slane %v9680_v61, %v5707_v37  ;;  %v5941_v55 = vunpack.c.l.s8.bf16 %v5878_v41  ;;  %v5917_v46 = vunpack.c.l.s8.bf16 %v9735_v16  ;;  %v5933_v51 = vunpack.c.l.s8.bf16 %v9738_v38 }
 0xabd   : > { %7428 = vmatpush3.bf16.msra.mxu1 %v5913_v62  ;;  %7456 = vmatpush3.bf16.msra.mxu0 %v5929_v4  ;;  %v5926_v61 = vunpack.c.h.s8.bf16 %v5870_v26  ;;  %v5942_v54 = vunpack.c.h.s8.bf16 %v5878_v41  ;;  %v5934_v24 = vunpack.c.h.s8.bf16 %v9738_v38 }
 0xabe   : > { %7429 = vmatprep.subr.bf16.mxu1 %v5922_v58  ;;  %7457 = vmatprep.subr.bf16.mxu0 %v5938_v5  ;;  %v5918_v5 = vunpack.c.h.s8.bf16 %v9735_v16 }
 0xac1   : > { %7430 = vmatpush3.bf16.msra.mxu1 %v5914_v63  ;;  %7458 = vmatpush3.bf16.msra.mxu0 %v5930_v31 }
 0xac2   : > { %7431 = vmatprep.subr.bf16.mxu1 %v5923_v8  ;;  %7459 = vmatprep.subr.bf16.mxu0 %v5939_v22 }
 0xac5   : > { %7432 = vmatpush3.bf16.msra.mxu1 %v5915_v50  ;;  %7460 = vmatpush3.bf16.msra.mxu0 %v5931_v0 }
 0xac6   : > { %7433 = vmatprep.subr.bf16.mxu1 %v5924_v39  ;;  %7461 = vmatprep.subr.bf16.mxu0 %v5940_v53 }
 0xac7   : > { %v5607_v18 = vpop.f32.mrb[36].mxu1  ;;  %v5658_v20 = vpop.f32.mrb[32].mxu0 }
 0xac8   : > { %v5721_v14 = vmul.f32 %v9722_v33, %v5607_v18  ;;  %v5723_v42 = vmul.f32 %v9725_v57, %v5658_v20  ;;  %v5609_v30 = vpop.f32.mrb[37].mxu1  ;;  %v5660_v34 = vpop.f32.mrb[33].mxu0 }
 0xac9   : > { %v5722_v21 = vmul.f32 %v9729_v43, %v5609_v30  ;;  %v5724_v28 = vmul.f32 %v9732_v32, %v5660_v34  ;;  %v5611_v1 = vpop.f32.mrb[38].mxu1  ;;  %v5662_v52 = vpop.f32.mrb[34].mxu0  ;;  %7434 = vmatpush3.bf16.msra.mxu1 %v5916_v44  ;;  %7462 = vmatpush3.bf16.msra.mxu0 %v5932_v45 }
 0xaca   : > { %v5787_v40 = vadd.f32 %v9741_v9, %v5721_v14  ;;  %v5789_v3 = vadd.f32 %v9744_v36, %v5723_v42  ;;  %v5729_v49 = vmul.f32 %v9722_v33, %v5611_v1  ;;  %v5731_v19 = vmul.f32 %v9725_v57, %v5662_v52  ;;  %v5613_v7 = vpop.f32.mrb[39].mxu1  ;;  %v5664_v29 = vpop.f32.mrb[35].mxu0  ;;  %7435 = vmatprep.subr.bf16.mxu1 %v5925_v47 }
 0xacb   : > { %v5788_v27 = vadd.f32 %v9747_v59, %v5722_v21  ;;  %v5790_v48 = vadd.f32 %v9750_v10, %v5724_v28  ;;  %v5730_v17 = vmul.f32 %v9729_v43, %v5613_v7  ;;  %v5732_v62 = vmul.f32 %v9732_v32, %v5664_v29  ;;  %7463 = vmatprep.subr.bf16.mxu0 %v5941_v55 }
 0xacc   : > { %v5795_v4 = vadd.f32 %v9741_v9, %v5729_v49  ;;  %v5797_v6 = vadd.f32 %v9744_v36, %v5731_v19  ;;  %v5811_v23 = vmax.f32 %v5787_v40, 0.0  ;;  %v5813_v63 = vmax.f32 %v5789_v3, 0.0 }
 0xacd   : > { %v5796_v15 = vadd.f32 %v9747_v59, %v5730_v17  ;;  %v5798_v58 = vadd.f32 %v9750_v10, %v5732_v62  ;;  %7436 = vmatpush3.bf16.msra.mxu1 %v5917_v46  ;;  %7464 = vmatpush3.bf16.msra.mxu0 %v5933_v51  ;;  %v5812_v22 = vmax.f32 %v5788_v27, 0.0  ;;  %v5814_v56 = vmax.f32 %v5790_v48, 0.0 }
 0xace   : > { %v5819_v31 = vmax.f32 %v5795_v4, 0.0  ;;  %v5821_v8 = vmax.f32 %v5797_v6, 0.0  ;;  %7437 = vmatprep.subr.bf16.mxu1 %v5926_v61  ;;  %7465 = vmatprep.subr.bf16.mxu0 %v5942_v54 }
 0xacf   : > { %v5820_v2 = vmax.f32 %v5796_v15, 0.0  ;;  %v5822_v60 = vmax.f32 %v5798_v58, 0.0  ;;  %v5617_v12 = vpop.f32.mrb[40].mxu1  ;;  %v5668_v50 = vpop.f32.mrb[36].mxu0 }
 0xad0   : > { %v5835_v0 = vpack.c.bf16 %v5819_v31, %v5811_v23  ;;  %v5837_v35 = vpack.c.bf16 %v5821_v8, %v5813_v63  ;;  %v5737_v37 = vmul.f32 %v9722_v33, %v5617_v12  ;;  %v5739_v39 = vmul.f32 %v9725_v57, %v5668_v50  ;;  %v5619_v53 = vpop.f32.mrb[41].mxu1  ;;  %v5670_v26 = vpop.f32.mrb[37].mxu0 }
 0xad1   : > { %v5738_v41 = vmul.f32 %v9729_v43, %v5619_v53  ;;  %v5740_v44 = vmul.f32 %v9732_v32, %v5670_v26  ;;  %v5621_v45 = vpop.f32.mrb[42].mxu1  ;;  %v5672_v16 = vpop.f32.mrb[38].mxu0  ;;  %7438 = vmatpush3.bf16.msra.mxu1 %v5918_v5  ;;  %7466 = vmatpush3.bf16.msra.mxu0 %v5934_v24  ;;  %v5836_v38 = vpack.c.bf16 %v5820_v2, %v5812_v22 }
 0xad2   : > { %v5803_v47 = vadd.f32 %v9741_v9, %v5737_v37  ;;  %v5622_v18 = vpop.f32.mrb[43].mxu1  ;;  %v5673_v20 = vpop.f32.mrb[39].mxu0  ;;  %v5838_v55 = vpack.c.bf16 %v5822_v60, %v5814_v56  ;;  %v5805_v33 = vadd.f32 %v9744_v36, %v5739_v39  ;;  %v6574_v37 = vld [vmem:[%s9891_s14] ss:$0 sm:$0xff] }
 0xad3   : > { %v5804_v57 = vadd.f32 %v9747_v59, %v5738_v41  ;;  %v5806_v14 = vadd.f32 %v9750_v10, %v5740_v44  ;;  %6071 = vmatprep.mubr.bf16.mxu1 %v5836_v38  ;;  %v6575_v41 = vld [vmem:[%s9892_s2] ss:$0 sm:$0xff] }
 0xad4   : > { %6119 = vmatprep.mubr.bf16.mxu0 %v5838_v55  ;;  %6072 = vmatmul.mubr.bf16.vlgmr.msra.gmra.mrb[52].mxu1 %v5835_v0  ;;  %v5827_v42 = vmax.f32 %v5803_v47, 0.0  ;;  %v5829_v30 = vmax.f32 %v5805_v33, 0.0 }
 0xad5   : > { %v5828_v43 = vmax.f32 %v5804_v57, 0.0  ;;  %v5830_v32 = vmax.f32 %v5806_v14, 0.0  ;;  %6120 = vmatmul.mubr.bf16.vlgmr.msra.gmra.mrb[48].mxu0 %v5837_v35 }
 0xad6   : > { %v5843_v9 = vpack.c.bf16 %v5827_v42, %v5827_v42  ;;  %v5845_v51 = vpack.c.bf16 %v5829_v30, %v5829_v30 }
 0xad7   : > { %v5844_v34 = vpack.c.bf16 %v5828_v43, %v5828_v43  ;;  %v5846_v46 = vpack.c.bf16 %v5830_v32, %v5830_v32 }
 0xad9   : > { %6079 = vmatprep.mubr.bf16.mxu1 %v5844_v34  ;;  %6127 = vmatprep.mubr.bf16.mxu0 %v5846_v46 }
 0xadc   : > { %6080 = vmatmul.mubr.bf16.gmra.mrb[56].mxu1 %v5843_v9 }
 0xadd   : > { %6128 = vmatmul.mubr.bf16.gmra.mrb[52].mxu0 %v5845_v51 }
 0xb87   : > { %v7383_v36 = vpop.f32.mrb[44].mxu1  ;;  %v7411_v59 = vpop.f32.mrb[40].mxu0 }
 0xb88   : > { %v7384_v21 = vpop.f32.mrb[45].mxu1  ;;  %v7412_v10 = vpop.f32.mrb[41].mxu0 }
 0xb89   : > { %v7385_v28 = vadd.f32 %v7384_v21, %v7383_v36  ;;  %v7413_v1 = vadd.f32 %v7412_v10, %v7411_v59  ;;  %v7386_v52 = vpop.f32.mrb[46].mxu1  ;;  %v7414_v61 = vpop.f32.mrb[42].mxu0 }
 0xb8a   : > { %v7387_v54 = vpop.f32.mrb[47].mxu1  ;;  %v7415_v40 = vpop.f32.mrb[43].mxu0 }
 0xb8b   : > { %v6026_v3 = vadd.f32 %v7413_v1, %v7385_v28  ;;  %v7388_v49 = vadd.f32 %v7387_v54, %v7386_v52  ;;  %v7416_v19 = vadd.f32 %v7415_v40, %v7414_v61 }
 0xb8d   : > { %v6029_v7 = vadd.f32 %v7416_v19, %v7388_v49 }
 0xb8f   : > { %v7389_v29 = vpop.f32.mrb[48].mxu1  ;;  %v7417_v27 = vpop.f32.mrb[44].mxu0 }
 0xb90   : > { %v7390_v48 = vpop.f32.mrb[49].mxu1  ;;  %v7418_v17 = vpop.f32.mrb[45].mxu0 }
 0xb91   : > { %v7391_v62 = vadd.f32 %v7390_v48, %v7389_v29  ;;  %v7419_v4 = vadd.f32 %v7418_v17, %v7417_v27  ;;  %v7392_v6 = vpop.f32.mrb[50].mxu1  ;;  %v7420_v15 = vpop.f32.mrb[46].mxu0 }
 0xb92   : > { %v7393_v58 = vpop.f32.mrb[51].mxu1  ;;  %v7421_v5 = vpop.f32.mrb[47].mxu0 }
 0xb93   : > { %v6034_v24 = vadd.f32 %v7419_v4, %v7391_v62  ;;  %v6576_v58 = vld [vmem:[%s878_s8] ss:$0 sm:$0xff] }
 0xba7   : > { %v7439_v23 = vpop.f32.mrb[52].mxu1 }
 0xba8   : > { %v7467_v63 = vpop.f32.mrb[48].mxu0  ;;  %v7440_v31 = vpop.f32.mrb[53].mxu1 }
 0xba9   : > { %v7441_v8 = vadd.f32 %v7440_v31, %v7439_v23  ;;  %v7468_v22 = vpop.f32.mrb[49].mxu0  ;;  %v7442_v56 = vpop.f32.mrb[54].mxu1  ;;  %v6577_v23 = vld [vmem:[%s881_s4] ss:$0 sm:$0xff] }
 0xbaa   : > { %v7469_v2 = vadd.f32 %v7468_v22, %v7467_v63  ;;  %v7470_v60 = vpop.f32.mrb[50].mxu0  ;;  %v7443_v12 = vpop.f32.mrb[55].mxu1 }
 0xbab   : > { %v6074_v50 = vadd.f32 %v7441_v8, %v6026_v3  ;;  %v7444_v0 = vadd.f32 %v7443_v12, %v7442_v56  ;;  %v7471_v35 = vpop.f32.mrb[51].mxu0 }
 0xbac   : > { %v7472_v39 = vadd.f32 %v7471_v35, %v7470_v60 }
 0xbad   : > { %v6122_v53 = vadd.f32 %v7469_v2, %v6074_v50  ;;  %v6077_v26 = vadd.f32 %v7444_v0, %v6029_v7 }
 0xbaf   : > { %v6142_v44 = vmul.f32 %v6574_v37, %v6122_v53  ;;  %v6125_v45 = vadd.f32 %v7472_v39, %v6077_v26  ;;  %v7445_v16 = vpop.f32.mrb[56].mxu1 }
 0xbb0   : > { %v7473_v38 = vpop.f32.mrb[52].mxu0  ;;  %v7446_v47 = vpop.f32.mrb[57].mxu1 }
 0xbb1   : > { %v6143_v18 = vmul.f32 %v6574_v37, %v6125_v45  ;;  %v7447_v20 = vadd.f32 %v7446_v47, %v7445_v16  ;;  %v7474_v55 = vpop.f32.mrb[53].mxu0  ;;  %v7448_v33 = vpop.f32.mrb[58].mxu1  ;;  %v6152_v57 = vadd.f32 %v6575_v41, %v6142_v44 }
 0xbb2   : > { %v7475_v14 = vadd.f32 %v7474_v55, %v7473_v38  ;;  %v7476_v43 = vpop.f32.mrb[54].mxu0  ;;  %v7449_v32 = vpop.f32.mrb[59].mxu1 }
 0xbb3   : > { %v6082_v42 = vadd.f32 %v7447_v20, %v6034_v24  ;;  %v7477_v30 = vpop.f32.mrb[55].mxu0  ;;  %v6155_v34 = vadd.f32 %v6152_v57, %v9611_v25  ;;  %v6153_v46 = vadd.f32 %v6575_v41, %v6143_v18 }
 0xbb5   : > { %v6130_v9 = vadd.f32 %v7475_v14, %v6082_v42  ;;  %6160 = vadd.xlane.f32.xlu0 %v6155_v34  ;;  %v6156_v51 = vadd.f32 %v6153_v46, %v9613_v11 }
 0xbb7   : > { %v6144_v36 = vmul.f32 %v6574_v37, %v6130_v9  ;;  %6162 = vadd.xlane.f32.xlu1 %v6156_v51 }
 0xbb9   : > { %v6154_v59 = vadd.f32 %v6575_v41, %v6144_v36 }
 0xbbb   : > { %v6157_v21 = vadd.f32 %v6154_v59, %v9623_v13 }
 0xbbd   : > { %6164 = vadd.xlane.f32.xlu0 %v6157_v21 }
 0xc42   : > { %v6161_v10 = vpop.xlane.xlu0 %6160 }
 0xc43   : > { %v6166_v28 = vmul.f32 0.0078125, %v6161_v10 }
 0xc44   : > { %v6163_v1 = vpop.xlane.xlu1 %6162 }
 0xc45   : > { %v6169_v52 = vsub.f32 %v6155_v34, %v6166_v28  ;;  %v6167_v61 = vmul.f32 0.0078125, %v6163_v1 }
 0xc47   : > { %v6170_v54 = vsub.f32 %v6156_v51, %v6167_v61  ;;  %v6172_v40 = vmul.f32 %v6169_v52, %v6169_v52 }
 0xc49   : > { %6175 = vadd.xlane.f32.xlu1 %v6172_v40  ;;  %v6173_v25 = vmul.f32 %v6170_v54, %v6170_v54 }
 0xc4a   : > { %v6165_v3 = vpop.xlane.xlu0 %6164 }
 0xc4b   : > { %v6168_v49 = vmul.f32 0.0078125, %v6165_v3  ;;  %6177 = vadd.xlane.f32.xlu0 %v6173_v25 }
 0xc4d   : > { %v6171_v19 = vsub.f32 %v6157_v21, %v6168_v49 }
 0xc4f   : > { %v6174_v11 = vmul.f32 %v6171_v19, %v6171_v19 }
 0xc51   : > { %6179 = vadd.xlane.f32.xlu1 %v6174_v11 }
 0xcd6   : > { %v6176_v7 = vpop.xlane.xlu1 %6175 }
 0xcd7   : > { %v6181_v13 = vmul.f32 0.0078125, %v6176_v7 }
 0xcd8   : > { %v6178_v29 = vpop.xlane.xlu0 %6177 }
 0xcd9   : > { %v6184_v27 = vadd.f32 1e-05, %v6181_v13  ;;  %v6182_v48 = vmul.f32 0.0078125, %v6178_v29 }
 0xcdb   : > { %7969 = vrsqrt.f32 %v6184_v27  ;;  %v6185_v17 = vadd.f32 1e-05, %v6182_v48 }
 0xcdd   : > { %7971 = vrsqrt.f32 %v6185_v17 }
 0xcde   : > { %v6180_v62 = vpop.xlane.xlu1 %6179 }
 0xcdf   : > { %v6183_v4 = vmul.f32 0.0078125, %v6180_v62 }
 0xce1   : > { %v6186_v6 = vadd.f32 1e-05, %v6183_v4 }
 0xce3   : > { %7973 = vrsqrt.f32 %v6186_v6 }
 0xce5   : > { %v7970_v15 = vpop.eup %7969 }
 0xce6   : > { %v6190_v5 = vmul.f32 %v7970_v15, %v6169_v52 }
 0xce7   : > { %v7972_v24 = vpop.eup %7971 }
 0xce8   : > { %v6199_v63 = vmul.f32 %v6576_v58, %v6190_v5  ;;  %v6191_v31 = vmul.f32 %v7972_v24, %v6170_v54 }
 0xcea   : > { %v6208_v8 = vadd.f32 %v6577_v23, %v6199_v63  ;;  %v6200_v22 = vmul.f32 %v6576_v58, %v6191_v31 }
 0xcec   : > { %6211 = vst [vmem:[%s9881_s0] sm:$0xff] %v6208_v8  ;;  %v6209_v56 = vadd.f32 %v6577_v23, %v6200_v22 }
 0xced   : > { %v7974_v2 = vpop.eup %7973 }
 0xcee   : > { %6212 = vst [vmem:[%s9881_s0 + $0x8] sm:$0xff] %v6209_v56  ;;  %v6192_v60 = vmul.f32 %v7974_v2, %v6171_v19 }
 0xcf0   : > { %v6201_v12 = vmul.f32 %v6576_v58, %v6192_v60 }
 0xcf2   : > { %v6210_v50 = vadd.f32 %v6577_v23, %v6201_v12 }
 0xcf4   : > { %6213 = vst [vmem:[%s9881_s0 + $0x10] sm:$0xff] %v6210_v50 }
 0xcf5 PF: > { %s9895_s4 = sld [smem:[#allocation2_spill]] }
 0xcfb   : > { %s31_s2 = sadd.s32 1, %s9895_s4  }
 0xcfc   : > { %p28_p5 = scmp.ge.s32.totalorder %s31_s2, 6  }
 0xcfe   :  { %30 = sbr.rel (!%p28_p5) target bundleno = 17 (0x11), region = 179 }

</bundles_post_ra>
